<compile_context>
chip_gen: v6e
topology: v6e:2x2x1
jax: 0.10.0
libtpu: 0.0.40
codegen_flags: <defaults>
</compile_context>

<pallas_src>
import functools

import jax
import jax.numpy as jnp
from jax import lax
from jax.experimental import pallas as pl
from jax.experimental.pallas import tpu as pltpu

H1 = 50          # lstm1 hidden size
H2 = 1           # lstm2 hidden size
H1P = 128        # lstm1 hidden size padded to one lane tile
GBLK = 128       # per-gate block width (128-lane aligned)
GW = 4 * GBLK    # fused layer-1 gate width (512)


def _fast_sigmoid(x):
    # sigmoid(x) == 0.5 * tanh(0.5 * x) + 0.5 : one EUP push + two VPU ops,
    # vs. the exp + reciprocal pair jax.nn.sigmoid lowers to.
    return 0.5 * jnp.tanh(0.5 * x) + 0.5


# ---------------------------------------------------------------------------
# Pallas kernel
# ---------------------------------------------------------------------------
def _sequence_kernel(x_ref, wh1_ref, wx1_ref, b1_ref, wx2_ref, wh2_ref, b2_ref,
                     out_ref, gx_ref, *, T, future, B, out_pad):
    f32 = jnp.float32
    bf16 = jnp.bfloat16

    # ---- hoisted loop-invariant loads (small) ------------------------------
    wx1 = wx1_ref[...]          # (1, GW)    f32   layer-1 input weights
    b1 = b1_ref[...]            # (1, GW)    f32   layer-1 combined bias
    wh1 = wh1_ref[...]          # (H1P, GW)  bf16  fused layer-1 recurrent W
    wx2 = wx2_ref[...]          # (H1P, 4)   bf16  fused layer-2 input W
    wh2 = wh2_ref[...]          # (1, 4)     f32   layer-2 recurrent weights
    b2 = b2_ref[...]            # (1, 4)     f32   layer-2 combined bias

    # ---- vectorized precompute of input-side gate pre-activations ----------
    # gx[t*B:(t+1)*B] = x_t * W_ih1 + b1 : one broadcasted op + one dense
    # (T*B, GW) store (sublane-dense; no per-step partial stores).
    gx_ref[...] = x_ref[...] * wx1 + b1

    # ---- recurrent state ----------------------------------------------------
    h1b = jnp.zeros((B, H1P), bf16)     # bf16 copy of h1 fed to the MXU
    c1 = jnp.zeros((B, H1P), f32)
    h2 = jnp.zeros((B, H2), f32)
    c2 = jnp.zeros((B, H2), f32)

    outs = jnp.zeros((B, out_pad), f32)
    lane = lax.broadcasted_iota(jnp.int32, (B, out_pad), 1)

    def cell1(gx_t, h1b, c1):
        # Single fused (B,128) x (128,512) bf16 MXU matmul, f32 accumulation.
        # Gate k lives at lanes [k*128, k*128+50); padded lanes have zero
        # weights & bias so the padded part of h1/c1 stays exactly zero.
        gates = gx_t + jnp.dot(h1b, wh1, preferred_element_type=f32)
        i = _fast_sigmoid(gates[:, 0 * GBLK:1 * GBLK])
        f = _fast_sigmoid(gates[:, 1 * GBLK:2 * GBLK])
        g = jnp.tanh(gates[:, 2 * GBLK:3 * GBLK])
        o = _fast_sigmoid(gates[:, 3 * GBLK:4 * GBLK])
        c1 = f * c1 + i * g
        h1 = o * jnp.tanh(c1)
        return h1.astype(bf16), c1

    def cell2(h1b, h2, c2):
        # Single fused (B,128) x (128,4) bf16 matmul for the 4 scalar gates.
        gates = (jnp.dot(h1b, wx2, preferred_element_type=f32)
                 + h2 * wh2 + b2)                  # (B, 4); gate order i,f,g,o
        sg = _fast_sigmoid(gates)                  # one EUP pass for i, f, o
        g = jnp.tanh(gates[:, 2:3])                # one EUP pass for g
        c2 = sg[:, 1:2] * c2 + sg[:, 0:1] * g
        h2 = sg[:, 3:4] * jnp.tanh(c2)
        return h2, c2

    # Fully unrolled time loops (T / future are small compile-time constants).
    # During teacher forcing cell2 does not feed cell1 (gx is precomputed), so
    # the scheduler can overlap cell2 with the next step's cell1 matmul.
    for t in range(T):
        h1b, c1 = cell1(gx_ref[pl.ds(t * B, B), :], h1b, c1)
        h2, c2 = cell2(h1b, h2, c2)
        outs = jnp.where(lane == t, h2, outs)

    for k in range(future):
        gx_t = h2 * wx1 + b1                       # closed-loop input proj (f32)
        h1b, c1 = cell1(gx_t, h1b, c1)
        h2, c2 = cell2(h1b, h2, c2)
        outs = jnp.where(lane == (T + k), h2, outs)

    # Single lane-dense store of all T+future outputs.
    out_ref[...] = outs


# ---------------------------------------------------------------------------
# Parameter setup (deterministic, PyTorch-style init)
# ---------------------------------------------------------------------------
def init_params(key):
    """PyTorch nn.LSTMCell init: U(-1/sqrt(hidden), 1/sqrt(hidden))."""
    ks = jax.random.split(key, 8)

    def u(k, shape, bound):
        return jax.random.uniform(k, shape, jnp.float32, -bound, bound)

    bnd1 = 1.0 / (H1 ** 0.5)
    bnd2 = 1.0 / (H2 ** 0.5)
    return dict(
        w_ih1=u(ks[0], (4 * H1, 1), bnd1),
        w_hh1=u(ks[1], (4 * H1, H1), bnd1),
        b_ih1=u(ks[2], (4 * H1,), bnd1),
        b_hh1=u(ks[3], (4 * H1,), bnd1),
        w_ih2=u(ks[4], (4 * H2, H1), bnd2),
        w_hh2=u(ks[5], (4 * H2, H2), bnd2),
        b_ih2=u(ks[6], (4 * H2,), bnd2),
        b_hh2=u(ks[7], (4 * H2,), bnd2),
    )


# ---------------------------------------------------------------------------
# Weight packing: fused, lane-aligned gate layout (bf16 MXU operands)
# ---------------------------------------------------------------------------
def _pack_layer1(w_ih, w_hh, b_ih, b_hh):
    """PyTorch (4*H1, in)/(4*H1, H1) -> fused lane-aligned (1,GW)f32/(H1P,GW)bf16."""
    wx = jnp.zeros((1, GW), jnp.float32)
    wh = jnp.zeros((H1P, GW), jnp.float32)
    b = jnp.zeros((1, GW), jnp.float32)
    bsum = (b_ih + b_hh).astype(jnp.float32)
    for k in range(4):
        wx = wx.at[0, k * GBLK:k * GBLK + H1].set(w_ih[k * H1:(k + 1) * H1, 0])
        wh = wh.at[:H1, k * GBLK:k * GBLK + H1].set(w_hh[k * H1:(k + 1) * H1, :].T)
        b = b.at[0, k * GBLK:k * GBLK + H1].set(bsum[k * H1:(k + 1) * H1])
    return wx, wh.astype(jnp.bfloat16), b


def _pack_layer2(w_ih, w_hh, b_ih, b_hh):
    """PyTorch (4, H1)/(4, 1) -> fused (H1P, 4)bf16/(1, 4)f32."""
    wx = jnp.zeros((H1P, 4), jnp.float32).at[:H1, :].set(w_ih.T)
    wh = w_hh.T.astype(jnp.float32)                       # (1, 4)
    b = (b_ih + b_hh).reshape(1, 4).astype(jnp.float32)
    return wx.astype(jnp.bfloat16), wh, b


# ---------------------------------------------------------------------------
# Wrapper
# ---------------------------------------------------------------------------
def sequence_forward(x, params, future=0):
    """x: (B, T) float32 -> (B, T + future) float32."""
    B, T = x.shape
    # time-major, batch-dense rows: row t*B + b holds x[b, t]
    x_tb = jnp.transpose(x).reshape(T * B, 1).astype(jnp.float32)

    wx1, wh1, b1 = _pack_layer1(params["w_ih1"], params["w_hh1"],
                                params["b_ih1"], params["b_hh1"])
    wx2, wh2, b2 = _pack_layer2(params["w_ih2"], params["w_hh2"],
                                params["b_ih2"], params["b_hh2"])

    out_pad = max(128, ((T + future + 127) // 128) * 128)
    kernel = functools.partial(_sequence_kernel, T=T, future=future, B=B,
                               out_pad=out_pad)
    vmem = pl.BlockSpec(memory_space=pltpu.MemorySpace.VMEM)  # whole-array VMEM
    out = pl.pallas_call(
        kernel,
        out_shape=jax.ShapeDtypeStruct((B, out_pad), jnp.float32),
        in_specs=[vmem] * 7,
        out_specs=vmem,
        scratch_shapes=[pltpu.VMEM((T * B, GW), jnp.float32)],
    )(x_tb, wh1, wx1, b1, wx2, wh2, b2)

    return out[:, :T + future]                              # (B, T + future)


# ---------------------------------------------------------------------------
# Numerics-matched pure-JAX reference (same bf16 MXU operands, same
# tanh-based sigmoid) — tight correctness check for the kernel.
# ---------------------------------------------------------------------------
def matched_forward(x, params, future=0):
    f32 = jnp.float32
    wx1, wh1, b1 = _pack_layer1(params["w_ih1"], params["w_hh1"],
                                params["b_ih1"], params["b_hh1"])
    wx2, wh2, b2 = _pack_layer2(params["w_ih2"], params["w_hh2"],
                                params["b_ih2"], params["b_hh2"])
    B, T = x.shape

    def cell1(gx_t, h1b, c1):
        gates = gx_t + jnp.dot(h1b, wh1, preferred_element_type=f32)
        i = _fast_sigmoid(gates[:, 0 * GBLK:1 * GBLK])
        f = _fast_sigmoid(gates[:, 1 * GBLK:2 * GBLK])
        g = jnp.tanh(gates[:, 2 * GBLK:3 * GBLK])
        o = _fast_sigmoid(gates[:, 3 * GBLK:4 * GBLK])
        c1 = f * c1 + i * g
        h1 = o * jnp.tanh(c1)
        return h1.astype(jnp.bfloat16), c1

    def cell2(h1b, h2, c2):
        gates = jnp.dot(h1b, wx2, preferred_element_type=f32) + h2 * wh2 + b2
        sg = _fast_sigmoid(gates)
        g = jnp.tanh(gates[:, 2:3])
        c2 = sg[:, 1:2] * c2 + sg[:, 0:1] * g
        h2 = sg[:, 3:4] * jnp.tanh(c2)
        return h2, c2

    h1b = jnp.zeros((B, H1P), jnp.bfloat16)
    c1 = jnp.zeros((B, H1P), f32)
    h2 = jnp.zeros((B, H2), f32)
    c2 = jnp.zeros((B, H2), f32)
    outs = []
    for t in range(T):
        gx_t = x[:, t:t + 1].astype(f32) * wx1 + b1
        h1b, c1 = cell1(gx_t, h1b, c1)
        h2, c2 = cell2(h1b, h2, c2)
        outs.append(h2)
    for _ in range(future):
        gx_t = h2 * wx1 + b1
        h1b, c1 = cell1(gx_t, h1b, c1)
        h2, c2 = cell2(h1b, h2, c2)
        outs.append(h2)
    return jnp.concatenate(outs, axis=1)                    # (B, T + future)


# ---------------------------------------------------------------------------
# Exact-module pure-JAX reference (f32, full-precision matmuls)
# ---------------------------------------------------------------------------
def reference_forward(x, params, future=0):
    hp = jax.lax.Precision.HIGHEST

    def cell(x_t, h, c, w_ih, w_hh, b_ih, b_hh):
        gates = (jnp.dot(x_t, w_ih.T, precision=hp)
                 + jnp.dot(h, w_hh.T, precision=hp) + b_ih + b_hh)
        hid = h.shape[1]
        i = jax.nn.sigmoid(gates[:, 0:hid])
        f = jax.nn.sigmoid(gates[:, hid:2 * hid])
        g = jnp.tanh(gates[:, 2 * hid:3 * hid])
        o = jax.nn.sigmoid(gates[:, 3 * hid:4 * hid])
        c = f * c + i * g
        h = o * jnp.tanh(c)
        return h, c

    B, T = x.shape
    h1 = jnp.zeros((B, H1), jnp.float32)
    c1 = jnp.zeros((B, H1), jnp.float32)
    h2 = jnp.zeros((B, H2), jnp.float32)
    c2 = jnp.zeros((B, H2), jnp.float32)
    outs = []
    for t in range(T):
        x_t = x[:, t:t + 1]
        h1, c1 = cell(x_t, h1, c1, params["w_ih1"], params["w_hh1"],
                      params["b_ih1"], params["b_hh1"])
        h2, c2 = cell(h1, h2, c2, params["w_ih2"], params["w_hh2"],
                      params["b_ih2"], params["b_hh2"])
        outs.append(h2)
    for _ in range(future):
        h1, c1 = cell(h2, h1, c1, params["w_ih1"], params["w_hh1"],
                      params["b_ih1"], params["b_hh1"])
        h2, c2 = cell(h1, h2, c2, params["w_ih2"], params["w_hh2"],
                      params["b_ih2"], params["b_hh2"])
        outs.append(h2)
    return jnp.concatenate(outs, axis=1)                    # (B, T + future)


if __name__ == "__main__":
    key = jax.random.PRNGKey(0)
    kp, kx = jax.random.split(key)
    params = init_params(kp)

    B, T, FUTURE = 2, 8, 4
    x = jax.random.normal(kx, (B, T), jnp.float32)

    y = sequence_forward(x, params, future=FUTURE)
    y = jax.block_until_ready(y)
    assert y.shape == (B, T + FUTURE), y.shape

    # (1) Tight check vs. a numerics-matched reference (same bf16 operands,
    #     same sigmoid lowering): validates packing / gate order / recurrence.
    y_m = matched_forward(x, params, future=FUTURE)
    err_m = float(jnp.max(jnp.abs(y - y_m)))
    assert err_m < 2e-3, f"kernel vs matched-numerics reference: {err_m}"

    # (2) Loose check vs. the exact module semantics (f32 HIGHEST matmuls):
    #     bounds the bf16-MXU drift over the 12-step recurrence.
    y_ref = reference_forward(x, params, future=FUTURE)
    err_r = float(jnp.max(jnp.abs(y - y_ref)))
    assert err_r < 2e-2, f"kernel vs exact f32 reference: {err_r}"

    print("KERNEL_OK")
</pallas_src>

<mosaic_0001>
module attributes {stable_mosaic.version = 11 : i64} {
  func.func @_sequence_kernel(%arg0: memref<16x1xf32, #tpu.memory_space<vmem>>, %arg1: memref<128x512xbf16, #tpu.memory_space<vmem>>, %arg2: memref<1x512xf32, #tpu.memory_space<vmem>>, %arg3: memref<1x512xf32, #tpu.memory_space<vmem>>, %arg4: memref<128x4xbf16, #tpu.memory_space<vmem>>, %arg5: memref<1x4xf32, #tpu.memory_space<vmem>>, %arg6: memref<1x4xf32, #tpu.memory_space<vmem>>, %arg7: memref<2x128xf32, #tpu.memory_space<vmem>>, %arg8: memref<16x512xf32, #tpu.memory_space<vmem>>) attributes {dimension_semantics = [], scalar_prefetch = 0 : i64, scratch_operands = 1 : i64, tpu.core_type = #tpu.core_type<tc>} {
    %c0 = arith.constant 0 : index
    %c0_0 = arith.constant 0 : index
    %0 = vector.load %arg2[%c0, %c0_0] : memref<1x512xf32, #tpu.memory_space<vmem>>, vector<1x512xf32>
    %c0_1 = arith.constant 0 : index
    %c0_2 = arith.constant 0 : index
    %1 = vector.load %arg3[%c0_1, %c0_2] : memref<1x512xf32, #tpu.memory_space<vmem>>, vector<1x512xf32>
    %c0_3 = arith.constant 0 : index
    %c0_4 = arith.constant 0 : index
    %2 = vector.load %arg1[%c0_3, %c0_4] : memref<128x512xbf16, #tpu.memory_space<vmem>>, vector<128x512xbf16>
    %c0_5 = arith.constant 0 : index
    %c0_6 = arith.constant 0 : index
    %3 = vector.load %arg4[%c0_5, %c0_6] : memref<128x4xbf16, #tpu.memory_space<vmem>>, vector<128x4xbf16>
    %c0_7 = arith.constant 0 : index
    %c0_8 = arith.constant 0 : index
    %4 = vector.load %arg5[%c0_7, %c0_8] : memref<1x4xf32, #tpu.memory_space<vmem>>, vector<1x4xf32>
    %c0_9 = arith.constant 0 : index
    %c0_10 = arith.constant 0 : index
    %5 = vector.load %arg6[%c0_9, %c0_10] : memref<1x4xf32, #tpu.memory_space<vmem>>, vector<1x4xf32>
    %c0_11 = arith.constant 0 : index
    %c0_12 = arith.constant 0 : index
    %6 = vector.load %arg0[%c0_11, %c0_12] : memref<16x1xf32, #tpu.memory_space<vmem>>, vector<16x1xf32>
    %7 = vector.broadcast %6 : vector<16x1xf32> to vector<16x512xf32>
    %8 = vector.broadcast %0 : vector<1x512xf32> to vector<16x512xf32>
    %9 = arith.mulf %7, %8 : vector<16x512xf32>
    %10 = vector.broadcast %1 : vector<1x512xf32> to vector<16x512xf32>
    %11 = arith.addf %9, %10 : vector<16x512xf32>
    %c0_13 = arith.constant 0 : index
    %c0_14 = arith.constant 0 : index
    %12 = vector.load %arg8[%c0_13, %c0_14] : memref<16x512xf32, #tpu.memory_space<vmem>>, vector<16x512xf32>
    tpu.vector_store %arg8[%c0_13, %c0_14], %11 {strides = array<i32>} : memref<16x512xf32, #tpu.memory_space<vmem>>, vector<16x512xf32>,
    %cst = arith.constant 0.000000e+00 : bf16
    %13 = vector.broadcast %cst : bf16 to vector<2x128xbf16>
    %cst_15 = arith.constant 0.000000e+00 : f32
    %14 = vector.broadcast %cst_15 : f32 to vector<2x128xf32>
    %cst_16 = arith.constant 0.000000e+00 : f32
    %15 = vector.broadcast %cst_16 : f32 to vector<2x1xf32>
    %cst_17 = arith.constant 0.000000e+00 : f32
    %16 = vector.broadcast %cst_17 : f32 to vector<2x1xf32>
    %cst_18 = arith.constant 0.000000e+00 : f32
    %17 = vector.broadcast %cst_18 : f32 to vector<2x128xf32>
    %18 = tpu.iota {dimensions = array<i32: 1>} : vector<2x128xi32>
    %c0_19 = arith.constant 0 : index
    %c0_20 = arith.constant 0 : index
    %19 = vector.load %arg8[%c0_19, %c0_20] : memref<16x512xf32, #tpu.memory_space<vmem>>, vector<2x512xf32>
    %cst_21 = arith.constant dense<0.000000e+00> : vector<2x512xf32>
    %20 = tpu.matmul %13, %2, %cst_21 {dimension_numbers = #tpu.dot_dimension_numbers<[1], [0], [0], [1], [0, 0, 1, 1], [], []>} : vector<2x128xbf16>, vector<128x512xbf16>, vector<2x512xf32> -> vector<2x512xf32>
    %21 = arith.addf %19, %20 : vector<2x512xf32>
    %22 = vector.extract_strided_slice %21 {offsets = [0, 0], sizes = [2, 128], strides = [1, 1]} : vector<2x512xf32> to vector<2x128xf32>
    %cst_22 = arith.constant 5.000000e-01 : f32
    %23 = vector.broadcast %cst_22 : f32 to vector<2x128xf32>
    %24 = arith.mulf %23, %22 : vector<2x128xf32>
    %25 = math.tanh %24 : vector<2x128xf32>
    %cst_23 = arith.constant 5.000000e-01 : f32
    %26 = vector.broadcast %cst_23 : f32 to vector<2x128xf32>
    %27 = arith.mulf %26, %25 : vector<2x128xf32>
    %cst_24 = arith.constant 5.000000e-01 : f32
    %28 = vector.broadcast %cst_24 : f32 to vector<2x128xf32>
    %29 = arith.addf %27, %28 : vector<2x128xf32>
    %30 = vector.extract_strided_slice %21 {offsets = [0, 128], sizes = [2, 128], strides = [1, 1]} : vector<2x512xf32> to vector<2x128xf32>
    %cst_25 = arith.constant 5.000000e-01 : f32
    %31 = vector.broadcast %cst_25 : f32 to vector<2x128xf32>
    %32 = arith.mulf %31, %30 : vector<2x128xf32>
    %33 = math.tanh %32 : vector<2x128xf32>
    %cst_26 = arith.constant 5.000000e-01 : f32
    %34 = vector.broadcast %cst_26 : f32 to vector<2x128xf32>
    %35 = arith.mulf %34, %33 : vector<2x128xf32>
    %cst_27 = arith.constant 5.000000e-01 : f32
    %36 = vector.broadcast %cst_27 : f32 to vector<2x128xf32>
    %37 = arith.addf %35, %36 : vector<2x128xf32>
    %38 = vector.extract_strided_slice %21 {offsets = [0, 256], sizes = [2, 128], strides = [1, 1]} : vector<2x512xf32> to vector<2x128xf32>
    %39 = math.tanh %38 : vector<2x128xf32>
    %40 = vector.extract_strided_slice %21 {offsets = [0, 384], sizes = [2, 128], strides = [1, 1]} : vector<2x512xf32> to vector<2x128xf32>
    %cst_28 = arith.constant 5.000000e-01 : f32
    %41 = vector.broadcast %cst_28 : f32 to vector<2x128xf32>
    %42 = arith.mulf %41, %40 : vector<2x128xf32>
    %43 = math.tanh %42 : vector<2x128xf32>
    %cst_29 = arith.constant 5.000000e-01 : f32
    %44 = vector.broadcast %cst_29 : f32 to vector<2x128xf32>
    %45 = arith.mulf %44, %43 : vector<2x128xf32>
    %cst_30 = arith.constant 5.000000e-01 : f32
    %46 = vector.broadcast %cst_30 : f32 to vector<2x128xf32>
    %47 = arith.addf %45, %46 : vector<2x128xf32>
    %48 = arith.mulf %37, %14 : vector<2x128xf32>
    %49 = arith.mulf %29, %39 : vector<2x128xf32>
    %50 = arith.addf %48, %49 : vector<2x128xf32>
    %51 = math.tanh %50 : vector<2x128xf32>
    %52 = arith.mulf %47, %51 : vector<2x128xf32>
    %53 = arith.truncf %52 : vector<2x128xf32> to vector<2x128xbf16>
    %cst_31 = arith.constant dense<0.000000e+00> : vector<2x4xf32>
    %54 = tpu.matmul %53, %3, %cst_31 {dimension_numbers = #tpu.dot_dimension_numbers<[1], [0], [0], [1], [0, 0, 1, 1], [], []>} : vector<2x128xbf16>, vector<128x4xbf16>, vector<2x4xf32> -> vector<2x4xf32>
    %55 = vector.broadcast %15 : vector<2x1xf32> to vector<2x4xf32>
    %56 = vector.broadcast %4 : vector<1x4xf32> to vector<2x4xf32>
    %57 = arith.mulf %55, %56 : vector<2x4xf32>
    %58 = arith.addf %54, %57 : vector<2x4xf32>
    %59 = vector.broadcast %5 : vector<1x4xf32> to vector<2x4xf32>
    %60 = arith.addf %58, %59 : vector<2x4xf32>
    %cst_32 = arith.constant 5.000000e-01 : f32
    %61 = vector.broadcast %cst_32 : f32 to vector<2x4xf32>
    %62 = arith.mulf %61, %60 : vector<2x4xf32>
    %63 = math.tanh %62 : vector<2x4xf32>
    %cst_33 = arith.constant 5.000000e-01 : f32
    %64 = vector.broadcast %cst_33 : f32 to vector<2x4xf32>
    %65 = arith.mulf %64, %63 : vector<2x4xf32>
    %cst_34 = arith.constant 5.000000e-01 : f32
    %66 = vector.broadcast %cst_34 : f32 to vector<2x4xf32>
    %67 = arith.addf %65, %66 : vector<2x4xf32>
    %68 = vector.extract_strided_slice %60 {offsets = [0, 2], sizes = [2, 1], strides = [1, 1]} : vector<2x4xf32> to vector<2x1xf32>
    %69 = math.tanh %68 : vector<2x1xf32>
    %70 = vector.extract_strided_slice %67 {offsets = [0, 1], sizes = [2, 1], strides = [1, 1]} : vector<2x4xf32> to vector<2x1xf32>
    %71 = arith.mulf %70, %16 : vector<2x1xf32>
    %72 = vector.extract_strided_slice %67 {offsets = [0, 0], sizes = [2, 1], strides = [1, 1]} : vector<2x4xf32> to vector<2x1xf32>
    %73 = arith.mulf %72, %69 : vector<2x1xf32>
    %74 = arith.addf %71, %73 : vector<2x1xf32>
    %75 = vector.extract_strided_slice %67 {offsets = [0, 3], sizes = [2, 1], strides = [1, 1]} : vector<2x4xf32> to vector<2x1xf32>
    %76 = math.tanh %74 : vector<2x1xf32>
    %77 = arith.mulf %75, %76 : vector<2x1xf32>
    %c0_i32 = arith.constant 0 : i32
    %78 = vector.broadcast %c0_i32 : i32 to vector<2x128xi32>
    %79 = arith.cmpi eq, %18, %78 : vector<2x128xi32>
    %80 = vector.shape_cast %77 : vector<2x1xf32> to vector<2x1xf32>
    %81 = vector.broadcast %80 : vector<2x1xf32> to vector<2x128xf32>
    %82 = arith.select %79, %81, %17 : vector<2x128xi1>, vector<2x128xf32>
    %c2 = arith.constant 2 : index
    %c0_35 = arith.constant 0 : index
    %83 = vector.load %arg8[%c2, %c0_35] : memref<16x512xf32, #tpu.memory_space<vmem>>, vector<2x512xf32>
    %cst_36 = arith.constant dense<0.000000e+00> : vector<2x512xf32>
    %84 = tpu.matmul %53, %2, %cst_36 {dimension_numbers = #tpu.dot_dimension_numbers<[1], [0], [0], [1], [0, 0, 1, 1], [], []>} : vector<2x128xbf16>, vector<128x512xbf16>, vector<2x512xf32> -> vector<2x512xf32>
    %85 = arith.addf %83, %84 : vector<2x512xf32>
    %86 = vector.extract_strided_slice %85 {offsets = [0, 0], sizes = [2, 128], strides = [1, 1]} : vector<2x512xf32> to vector<2x128xf32>
    %cst_37 = arith.constant 5.000000e-01 : f32
    %87 = vector.broadcast %cst_37 : f32 to vector<2x128xf32>
    %88 = arith.mulf %87, %86 : vector<2x128xf32>
    %89 = math.tanh %88 : vector<2x128xf32>
    %cst_38 = arith.constant 5.000000e-01 : f32
    %90 = vector.broadcast %cst_38 : f32 to vector<2x128xf32>
    %91 = arith.mulf %90, %89 : vector<2x128xf32>
    %cst_39 = arith.constant 5.000000e-01 : f32
    %92 = vector.broadcast %cst_39 : f32 to vector<2x128xf32>
    %93 = arith.addf %91, %92 : vector<2x128xf32>
    %94 = vector.extract_strided_slice %85 {offsets = [0, 128], sizes = [2, 128], strides = [1, 1]} : vector<2x512xf32> to vector<2x128xf32>
    %cst_40 = arith.constant 5.000000e-01 : f32
    %95 = vector.broadcast %cst_40 : f32 to vector<2x128xf32>
    %96 = arith.mulf %95, %94 : vector<2x128xf32>
    %97 = math.tanh %96 : vector<2x128xf32>
    %cst_41 = arith.constant 5.000000e-01 : f32
    %98 = vector.broadcast %cst_41 : f32 to vector<2x128xf32>
    %99 = arith.mulf %98, %97 : vector<2x128xf32>
    %cst_42 = arith.constant 5.000000e-01 : f32
    %100 = vector.broadcast %cst_42 : f32 to vector<2x128xf32>
    %101 = arith.addf %99, %100 : vector<2x128xf32>
    %102 = vector.extract_strided_slice %85 {offsets = [0, 256], sizes = [2, 128], strides = [1, 1]} : vector<2x512xf32> to vector<2x128xf32>
    %103 = math.tanh %102 : vector<2x128xf32>
    %104 = vector.extract_strided_slice %85 {offsets = [0, 384], sizes = [2, 128], strides = [1, 1]} : vector<2x512xf32> to vector<2x128xf32>
    %cst_43 = arith.constant 5.000000e-01 : f32
    %105 = vector.broadcast %cst_43 : f32 to vector<2x128xf32>
    %106 = arith.mulf %105, %104 : vector<2x128xf32>
    %107 = math.tanh %106 : vector<2x128xf32>
    %cst_44 = arith.constant 5.000000e-01 : f32
    %108 = vector.broadcast %cst_44 : f32 to vector<2x128xf32>
    %109 = arith.mulf %108, %107 : vector<2x128xf32>
    %cst_45 = arith.constant 5.000000e-01 : f32
    %110 = vector.broadcast %cst_45 : f32 to vector<2x128xf32>
    %111 = arith.addf %109, %110 : vector<2x128xf32>
    %112 = arith.mulf %101, %50 : vector<2x128xf32>
    %113 = arith.mulf %93, %103 : vector<2x128xf32>
    %114 = arith.addf %112, %113 : vector<2x128xf32>
    %115 = math.tanh %114 : vector<2x128xf32>
    %116 = arith.mulf %111, %115 : vector<2x128xf32>
    %117 = arith.truncf %116 : vector<2x128xf32> to vector<2x128xbf16>
    %cst_46 = arith.constant dense<0.000000e+00> : vector<2x4xf32>
    %118 = tpu.matmul %117, %3, %cst_46 {dimension_numbers = #tpu.dot_dimension_numbers<[1], [0], [0], [1], [0, 0, 1, 1], [], []>} : vector<2x128xbf16>, vector<128x4xbf16>, vector<2x4xf32> -> vector<2x4xf32>
    %119 = vector.broadcast %77 : vector<2x1xf32> to vector<2x4xf32>
    %120 = vector.broadcast %4 : vector<1x4xf32> to vector<2x4xf32>
    %121 = arith.mulf %119, %120 : vector<2x4xf32>
    %122 = arith.addf %118, %121 : vector<2x4xf32>
    %123 = vector.broadcast %5 : vector<1x4xf32> to vector<2x4xf32>
    %124 = arith.addf %122, %123 : vector<2x4xf32>
    %cst_47 = arith.constant 5.000000e-01 : f32
    %125 = vector.broadcast %cst_47 : f32 to vector<2x4xf32>
    %126 = arith.mulf %125, %124 : vector<2x4xf32>
    %127 = math.tanh %126 : vector<2x4xf32>
    %cst_48 = arith.constant 5.000000e-01 : f32
    %128 = vector.broadcast %cst_48 : f32 to vector<2x4xf32>
    %129 = arith.mulf %128, %127 : vector<2x4xf32>
    %cst_49 = arith.constant 5.000000e-01 : f32
    %130 = vector.broadcast %cst_49 : f32 to vector<2x4xf32>
    %131 = arith.addf %129, %130 : vector<2x4xf32>
    %132 = vector.extract_strided_slice %124 {offsets = [0, 2], sizes = [2, 1], strides = [1, 1]} : vector<2x4xf32> to vector<2x1xf32>
    %133 = math.tanh %132 : vector<2x1xf32>
    %134 = vector.extract_strided_slice %131 {offsets = [0, 1], sizes = [2, 1], strides = [1, 1]} : vector<2x4xf32> to vector<2x1xf32>
    %135 = arith.mulf %134, %74 : vector<2x1xf32>
    %136 = vector.extract_strided_slice %131 {offsets = [0, 0], sizes = [2, 1], strides = [1, 1]} : vector<2x4xf32> to vector<2x1xf32>
    %137 = arith.mulf %136, %133 : vector<2x1xf32>
    %138 = arith.addf %135, %137 : vector<2x1xf32>
    %139 = vector.extract_strided_slice %131 {offsets = [0, 3], sizes = [2, 1], strides = [1, 1]} : vector<2x4xf32> to vector<2x1xf32>
    %140 = math.tanh %138 : vector<2x1xf32>
    %141 = arith.mulf %139, %140 : vector<2x1xf32>
    %c1_i32 = arith.constant 1 : i32
    %142 = vector.broadcast %c1_i32 : i32 to vector<2x128xi32>
    %143 = arith.cmpi eq, %18, %142 : vector<2x128xi32>
    %144 = vector.shape_cast %141 : vector<2x1xf32> to vector<2x1xf32>
    %145 = vector.broadcast %144 : vector<2x1xf32> to vector<2x128xf32>
    %146 = arith.select %143, %145, %82 : vector<2x128xi1>, vector<2x128xf32>
    %c4 = arith.constant 4 : index
    %c0_50 = arith.constant 0 : index
    %147 = vector.load %arg8[%c4, %c0_50] : memref<16x512xf32, #tpu.memory_space<vmem>>, vector<2x512xf32>
    %cst_51 = arith.constant dense<0.000000e+00> : vector<2x512xf32>
    %148 = tpu.matmul %117, %2, %cst_51 {dimension_numbers = #tpu.dot_dimension_numbers<[1], [0], [0], [1], [0, 0, 1, 1], [], []>} : vector<2x128xbf16>, vector<128x512xbf16>, vector<2x512xf32> -> vector<2x512xf32>
    %149 = arith.addf %147, %148 : vector<2x512xf32>
    %150 = vector.extract_strided_slice %149 {offsets = [0, 0], sizes = [2, 128], strides = [1, 1]} : vector<2x512xf32> to vector<2x128xf32>
    %cst_52 = arith.constant 5.000000e-01 : f32
    %151 = vector.broadcast %cst_52 : f32 to vector<2x128xf32>
    %152 = arith.mulf %151, %150 : vector<2x128xf32>
    %153 = math.tanh %152 : vector<2x128xf32>
    %cst_53 = arith.constant 5.000000e-01 : f32
    %154 = vector.broadcast %cst_53 : f32 to vector<2x128xf32>
    %155 = arith.mulf %154, %153 : vector<2x128xf32>
    %cst_54 = arith.constant 5.000000e-01 : f32
    %156 = vector.broadcast %cst_54 : f32 to vector<2x128xf32>
    %157 = arith.addf %155, %156 : vector<2x128xf32>
    %158 = vector.extract_strided_slice %149 {offsets = [0, 128], sizes = [2, 128], strides = [1, 1]} : vector<2x512xf32> to vector<2x128xf32>
    %cst_55 = arith.constant 5.000000e-01 : f32
    %159 = vector.broadcast %cst_55 : f32 to vector<2x128xf32>
    %160 = arith.mulf %159, %158 : vector<2x128xf32>
    %161 = math.tanh %160 : vector<2x128xf32>
    %cst_56 = arith.constant 5.000000e-01 : f32
    %162 = vector.broadcast %cst_56 : f32 to vector<2x128xf32>
    %163 = arith.mulf %162, %161 : vector<2x128xf32>
    %cst_57 = arith.constant 5.000000e-01 : f32
    %164 = vector.broadcast %cst_57 : f32 to vector<2x128xf32>
    %165 = arith.addf %163, %164 : vector<2x128xf32>
    %166 = vector.extract_strided_slice %149 {offsets = [0, 256], sizes = [2, 128], strides = [1, 1]} : vector<2x512xf32> to vector<2x128xf32>
    %167 = math.tanh %166 : vector<2x128xf32>
    %168 = vector.extract_strided_slice %149 {offsets = [0, 384], sizes = [2, 128], strides = [1, 1]} : vector<2x512xf32> to vector<2x128xf32>
    %cst_58 = arith.constant 5.000000e-01 : f32
    %169 = vector.broadcast %cst_58 : f32 to vector<2x128xf32>
    %170 = arith.mulf %169, %168 : vector<2x128xf32>
    %171 = math.tanh %170 : vector<2x128xf32>
    %cst_59 = arith.constant 5.000000e-01 : f32
    %172 = vector.broadcast %cst_59 : f32 to vector<2x128xf32>
    %173 = arith.mulf %172, %171 : vector<2x128xf32>
    %cst_60 = arith.constant 5.000000e-01 : f32
    %174 = vector.broadcast %cst_60 : f32 to vector<2x128xf32>
    %175 = arith.addf %173, %174 : vector<2x128xf32>
    %176 = arith.mulf %165, %114 : vector<2x128xf32>
    %177 = arith.mulf %157, %167 : vector<2x128xf32>
    %178 = arith.addf %176, %177 : vector<2x128xf32>
    %179 = math.tanh %178 : vector<2x128xf32>
    %180 = arith.mulf %175, %179 : vector<2x128xf32>
    %181 = arith.truncf %180 : vector<2x128xf32> to vector<2x128xbf16>
    %cst_61 = arith.constant dense<0.000000e+00> : vector<2x4xf32>
    %182 = tpu.matmul %181, %3, %cst_61 {dimension_numbers = #tpu.dot_dimension_numbers<[1], [0], [0], [1], [0, 0, 1, 1], [], []>} : vector<2x128xbf16>, vector<128x4xbf16>, vector<2x4xf32> -> vector<2x4xf32>
    %183 = vector.broadcast %141 : vector<2x1xf32> to vector<2x4xf32>
    %184 = vector.broadcast %4 : vector<1x4xf32> to vector<2x4xf32>
    %185 = arith.mulf %183, %184 : vector<2x4xf32>
    %186 = arith.addf %182, %185 : vector<2x4xf32>
    %187 = vector.broadcast %5 : vector<1x4xf32> to vector<2x4xf32>
    %188 = arith.addf %186, %187 : vector<2x4xf32>
    %cst_62 = arith.constant 5.000000e-01 : f32
    %189 = vector.broadcast %cst_62 : f32 to vector<2x4xf32>
    %190 = arith.mulf %189, %188 : vector<2x4xf32>
    %191 = math.tanh %190 : vector<2x4xf32>
    %cst_63 = arith.constant 5.000000e-01 : f32
    %192 = vector.broadcast %cst_63 : f32 to vector<2x4xf32>
    %193 = arith.mulf %192, %191 : vector<2x4xf32>
    %cst_64 = arith.constant 5.000000e-01 : f32
    %194 = vector.broadcast %cst_64 : f32 to vector<2x4xf32>
    %195 = arith.addf %193, %194 : vector<2x4xf32>
    %196 = vector.extract_strided_slice %188 {offsets = [0, 2], sizes = [2, 1], strides = [1, 1]} : vector<2x4xf32> to vector<2x1xf32>
    %197 = math.tanh %196 : vector<2x1xf32>
    %198 = vector.extract_strided_slice %195 {offsets = [0, 1], sizes = [2, 1], strides = [1, 1]} : vector<2x4xf32> to vector<2x1xf32>
    %199 = arith.mulf %198, %138 : vector<2x1xf32>
    %200 = vector.extract_strided_slice %195 {offsets = [0, 0], sizes = [2, 1], strides = [1, 1]} : vector<2x4xf32> to vector<2x1xf32>
    %201 = arith.mulf %200, %197 : vector<2x1xf32>
    %202 = arith.addf %199, %201 : vector<2x1xf32>
    %203 = vector.extract_strided_slice %195 {offsets = [0, 3], sizes = [2, 1], strides = [1, 1]} : vector<2x4xf32> to vector<2x1xf32>
    %204 = math.tanh %202 : vector<2x1xf32>
    %205 = arith.mulf %203, %204 : vector<2x1xf32>
    %c2_i32 = arith.constant 2 : i32
    %206 = vector.broadcast %c2_i32 : i32 to vector<2x128xi32>
    %207 = arith.cmpi eq, %18, %206 : vector<2x128xi32>
    %208 = vector.shape_cast %205 : vector<2x1xf32> to vector<2x1xf32>
    %209 = vector.broadcast %208 : vector<2x1xf32> to vector<2x128xf32>
    %210 = arith.select %207, %209, %146 : vector<2x128xi1>, vector<2x128xf32>
    %c6 = arith.constant 6 : index
    %c0_65 = arith.constant 0 : index
    %211 = vector.load %arg8[%c6, %c0_65] : memref<16x512xf32, #tpu.memory_space<vmem>>, vector<2x512xf32>
    %cst_66 = arith.constant dense<0.000000e+00> : vector<2x512xf32>
    %212 = tpu.matmul %181, %2, %cst_66 {dimension_numbers = #tpu.dot_dimension_numbers<[1], [0], [0], [1], [0, 0, 1, 1], [], []>} : vector<2x128xbf16>, vector<128x512xbf16>, vector<2x512xf32> -> vector<2x512xf32>
    %213 = arith.addf %211, %212 : vector<2x512xf32>
    %214 = vector.extract_strided_slice %213 {offsets = [0, 0], sizes = [2, 128], strides = [1, 1]} : vector<2x512xf32> to vector<2x128xf32>
    %cst_67 = arith.constant 5.000000e-01 : f32
    %215 = vector.broadcast %cst_67 : f32 to vector<2x128xf32>
    %216 = arith.mulf %215, %214 : vector<2x128xf32>
    %217 = math.tanh %216 : vector<2x128xf32>
    %cst_68 = arith.constant 5.000000e-01 : f32
    %218 = vector.broadcast %cst_68 : f32 to vector<2x128xf32>
    %219 = arith.mulf %218, %217 : vector<2x128xf32>
    %cst_69 = arith.constant 5.000000e-01 : f32
    %220 = vector.broadcast %cst_69 : f32 to vector<2x128xf32>
    %221 = arith.addf %219, %220 : vector<2x128xf32>
    %222 = vector.extract_strided_slice %213 {offsets = [0, 128], sizes = [2, 128], strides = [1, 1]} : vector<2x512xf32> to vector<2x128xf32>
    %cst_70 = arith.constant 5.000000e-01 : f32
    %223 = vector.broadcast %cst_70 : f32 to vector<2x128xf32>
    %224 = arith.mulf %223, %222 : vector<2x128xf32>
    %225 = math.tanh %224 : vector<2x128xf32>
    %cst_71 = arith.constant 5.000000e-01 : f32
    %226 = vector.broadcast %cst_71 : f32 to vector<2x128xf32>
    %227 = arith.mulf %226, %225 : vector<2x128xf32>
    %cst_72 = arith.constant 5.000000e-01 : f32
    %228 = vector.broadcast %cst_72 : f32 to vector<2x128xf32>
    %229 = arith.addf %227, %228 : vector<2x128xf32>
    %230 = vector.extract_strided_slice %213 {offsets = [0, 256], sizes = [2, 128], strides = [1, 1]} : vector<2x512xf32> to vector<2x128xf32>
    %231 = math.tanh %230 : vector<2x128xf32>
    %232 = vector.extract_strided_slice %213 {offsets = [0, 384], sizes = [2, 128], strides = [1, 1]} : vector<2x512xf32> to vector<2x128xf32>
    %cst_73 = arith.constant 5.000000e-01 : f32
    %233 = vector.broadcast %cst_73 : f32 to vector<2x128xf32>
    %234 = arith.mulf %233, %232 : vector<2x128xf32>
    %235 = math.tanh %234 : vector<2x128xf32>
    %cst_74 = arith.constant 5.000000e-01 : f32
    %236 = vector.broadcast %cst_74 : f32 to vector<2x128xf32>
    %237 = arith.mulf %236, %235 : vector<2x128xf32>
    %cst_75 = arith.constant 5.000000e-01 : f32
    %238 = vector.broadcast %cst_75 : f32 to vector<2x128xf32>
    %239 = arith.addf %237, %238 : vector<2x128xf32>
    %240 = arith.mulf %229, %178 : vector<2x128xf32>
    %241 = arith.mulf %221, %231 : vector<2x128xf32>
    %242 = arith.addf %240, %241 : vector<2x128xf32>
    %243 = math.tanh %242 : vector<2x128xf32>
    %244 = arith.mulf %239, %243 : vector<2x128xf32>
    %245 = arith.truncf %244 : vector<2x128xf32> to vector<2x128xbf16>
    %cst_76 = arith.constant dense<0.000000e+00> : vector<2x4xf32>
    %246 = tpu.matmul %245, %3, %cst_76 {dimension_numbers = #tpu.dot_dimension_numbers<[1], [0], [0], [1], [0, 0, 1, 1], [], []>} : vector<2x128xbf16>, vector<128x4xbf16>, vector<2x4xf32> -> vector<2x4xf32>
    %247 = vector.broadcast %205 : vector<2x1xf32> to vector<2x4xf32>
    %248 = vector.broadcast %4 : vector<1x4xf32> to vector<2x4xf32>
    %249 = arith.mulf %247, %248 : vector<2x4xf32>
    %250 = arith.addf %246, %249 : vector<2x4xf32>
    %251 = vector.broadcast %5 : vector<1x4xf32> to vector<2x4xf32>
    %252 = arith.addf %250, %251 : vector<2x4xf32>
    %cst_77 = arith.constant 5.000000e-01 : f32
    %253 = vector.broadcast %cst_77 : f32 to vector<2x4xf32>
    %254 = arith.mulf %253, %252 : vector<2x4xf32>
    %255 = math.tanh %254 : vector<2x4xf32>
    %cst_78 = arith.constant 5.000000e-01 : f32
    %256 = vector.broadcast %cst_78 : f32 to vector<2x4xf32>
    %257 = arith.mulf %256, %255 : vector<2x4xf32>
    %cst_79 = arith.constant 5.000000e-01 : f32
    %258 = vector.broadcast %cst_79 : f32 to vector<2x4xf32>
    %259 = arith.addf %257, %258 : vector<2x4xf32>
    %260 = vector.extract_strided_slice %252 {offsets = [0, 2], sizes = [2, 1], strides = [1, 1]} : vector<2x4xf32> to vector<2x1xf32>
    %261 = math.tanh %260 : vector<2x1xf32>
    %262 = vector.extract_strided_slice %259 {offsets = [0, 1], sizes = [2, 1], strides = [1, 1]} : vector<2x4xf32> to vector<2x1xf32>
    %263 = arith.mulf %262, %202 : vector<2x1xf32>
    %264 = vector.extract_strided_slice %259 {offsets = [0, 0], sizes = [2, 1], strides = [1, 1]} : vector<2x4xf32> to vector<2x1xf32>
    %265 = arith.mulf %264, %261 : vector<2x1xf32>
    %266 = arith.addf %263, %265 : vector<2x1xf32>
    %267 = vector.extract_strided_slice %259 {offsets = [0, 3], sizes = [2, 1], strides = [1, 1]} : vector<2x4xf32> to vector<2x1xf32>
    %268 = math.tanh %266 : vector<2x1xf32>
    %269 = arith.mulf %267, %268 : vector<2x1xf32>
    %c3_i32 = arith.constant 3 : i32
    %270 = vector.broadcast %c3_i32 : i32 to vector<2x128xi32>
    %271 = arith.cmpi eq, %18, %270 : vector<2x128xi32>
    %272 = vector.shape_cast %269 : vector<2x1xf32> to vector<2x1xf32>
    %273 = vector.broadcast %272 : vector<2x1xf32> to vector<2x128xf32>
    %274 = arith.select %271, %273, %210 : vector<2x128xi1>, vector<2x128xf32>
    %c8 = arith.constant 8 : index
    %c0_80 = arith.constant 0 : index
    %275 = vector.load %arg8[%c8, %c0_80] : memref<16x512xf32, #tpu.memory_space<vmem>>, vector<2x512xf32>
    %cst_81 = arith.constant dense<0.000000e+00> : vector<2x512xf32>
    %276 = tpu.matmul %245, %2, %cst_81 {dimension_numbers = #tpu.dot_dimension_numbers<[1], [0], [0], [1], [0, 0, 1, 1], [], []>} : vector<2x128xbf16>, vector<128x512xbf16>, vector<2x512xf32> -> vector<2x512xf32>
    %277 = arith.addf %275, %276 : vector<2x512xf32>
    %278 = vector.extract_strided_slice %277 {offsets = [0, 0], sizes = [2, 128], strides = [1, 1]} : vector<2x512xf32> to vector<2x128xf32>
    %cst_82 = arith.constant 5.000000e-01 : f32
    %279 = vector.broadcast %cst_82 : f32 to vector<2x128xf32>
    %280 = arith.mulf %279, %278 : vector<2x128xf32>
    %281 = math.tanh %280 : vector<2x128xf32>
    %cst_83 = arith.constant 5.000000e-01 : f32
    %282 = vector.broadcast %cst_83 : f32 to vector<2x128xf32>
    %283 = arith.mulf %282, %281 : vector<2x128xf32>
    %cst_84 = arith.constant 5.000000e-01 : f32
    %284 = vector.broadcast %cst_84 : f32 to vector<2x128xf32>
    %285 = arith.addf %283, %284 : vector<2x128xf32>
    %286 = vector.extract_strided_slice %277 {offsets = [0, 128], sizes = [2, 128], strides = [1, 1]} : vector<2x512xf32> to vector<2x128xf32>
    %cst_85 = arith.constant 5.000000e-01 : f32
    %287 = vector.broadcast %cst_85 : f32 to vector<2x128xf32>
    %288 = arith.mulf %287, %286 : vector<2x128xf32>
    %289 = math.tanh %288 : vector<2x128xf32>
    %cst_86 = arith.constant 5.000000e-01 : f32
    %290 = vector.broadcast %cst_86 : f32 to vector<2x128xf32>
    %291 = arith.mulf %290, %289 : vector<2x128xf32>
    %cst_87 = arith.constant 5.000000e-01 : f32
    %292 = vector.broadcast %cst_87 : f32 to vector<2x128xf32>
    %293 = arith.addf %291, %292 : vector<2x128xf32>
    %294 = vector.extract_strided_slice %277 {offsets = [0, 256], sizes = [2, 128], strides = [1, 1]} : vector<2x512xf32> to vector<2x128xf32>
    %295 = math.tanh %294 : vector<2x128xf32>
    %296 = vector.extract_strided_slice %277 {offsets = [0, 384], sizes = [2, 128], strides = [1, 1]} : vector<2x512xf32> to vector<2x128xf32>
    %cst_88 = arith.constant 5.000000e-01 : f32
    %297 = vector.broadcast %cst_88 : f32 to vector<2x128xf32>
    %298 = arith.mulf %297, %296 : vector<2x128xf32>
    %299 = math.tanh %298 : vector<2x128xf32>
    %cst_89 = arith.constant 5.000000e-01 : f32
    %300 = vector.broadcast %cst_89 : f32 to vector<2x128xf32>
    %301 = arith.mulf %300, %299 : vector<2x128xf32>
    %cst_90 = arith.constant 5.000000e-01 : f32
    %302 = vector.broadcast %cst_90 : f32 to vector<2x128xf32>
    %303 = arith.addf %301, %302 : vector<2x128xf32>
    %304 = arith.mulf %293, %242 : vector<2x128xf32>
    %305 = arith.mulf %285, %295 : vector<2x128xf32>
    %306 = arith.addf %304, %305 : vector<2x128xf32>
    %307 = math.tanh %306 : vector<2x128xf32>
    %308 = arith.mulf %303, %307 : vector<2x128xf32>
    %309 = arith.truncf %308 : vector<2x128xf32> to vector<2x128xbf16>
    %cst_91 = arith.constant dense<0.000000e+00> : vector<2x4xf32>
    %310 = tpu.matmul %309, %3, %cst_91 {dimension_numbers = #tpu.dot_dimension_numbers<[1], [0], [0], [1], [0, 0, 1, 1], [], []>} : vector<2x128xbf16>, vector<128x4xbf16>, vector<2x4xf32> -> vector<2x4xf32>
    %311 = vector.broadcast %269 : vector<2x1xf32> to vector<2x4xf32>
    %312 = vector.broadcast %4 : vector<1x4xf32> to vector<2x4xf32>
    %313 = arith.mulf %311, %312 : vector<2x4xf32>
    %314 = arith.addf %310, %313 : vector<2x4xf32>
    %315 = vector.broadcast %5 : vector<1x4xf32> to vector<2x4xf32>
    %316 = arith.addf %314, %315 : vector<2x4xf32>
    %cst_92 = arith.constant 5.000000e-01 : f32
    %317 = vector.broadcast %cst_92 : f32 to vector<2x4xf32>
    %318 = arith.mulf %317, %316 : vector<2x4xf32>
    %319 = math.tanh %318 : vector<2x4xf32>
    %cst_93 = arith.constant 5.000000e-01 : f32
    %320 = vector.broadcast %cst_93 : f32 to vector<2x4xf32>
    %321 = arith.mulf %320, %319 : vector<2x4xf32>
    %cst_94 = arith.constant 5.000000e-01 : f32
    %322 = vector.broadcast %cst_94 : f32 to vector<2x4xf32>
    %323 = arith.addf %321, %322 : vector<2x4xf32>
    %324 = vector.extract_strided_slice %316 {offsets = [0, 2], sizes = [2, 1], strides = [1, 1]} : vector<2x4xf32> to vector<2x1xf32>
    %325 = math.tanh %324 : vector<2x1xf32>
    %326 = vector.extract_strided_slice %323 {offsets = [0, 1], sizes = [2, 1], strides = [1, 1]} : vector<2x4xf32> to vector<2x1xf32>
    %327 = arith.mulf %326, %266 : vector<2x1xf32>
    %328 = vector.extract_strided_slice %323 {offsets = [0, 0], sizes = [2, 1], strides = [1, 1]} : vector<2x4xf32> to vector<2x1xf32>
    %329 = arith.mulf %328, %325 : vector<2x1xf32>
    %330 = arith.addf %327, %329 : vector<2x1xf32>
    %331 = vector.extract_strided_slice %323 {offsets = [0, 3], sizes = [2, 1], strides = [1, 1]} : vector<2x4xf32> to vector<2x1xf32>
    %332 = math.tanh %330 : vector<2x1xf32>
    %333 = arith.mulf %331, %332 : vector<2x1xf32>
    %c4_i32 = arith.constant 4 : i32
    %334 = vector.broadcast %c4_i32 : i32 to vector<2x128xi32>
    %335 = arith.cmpi eq, %18, %334 : vector<2x128xi32>
    %336 = vector.shape_cast %333 : vector<2x1xf32> to vector<2x1xf32>
    %337 = vector.broadcast %336 : vector<2x1xf32> to vector<2x128xf32>
    %338 = arith.select %335, %337, %274 : vector<2x128xi1>, vector<2x128xf32>
    %c10 = arith.constant 10 : index
    %c0_95 = arith.constant 0 : index
    %339 = vector.load %arg8[%c10, %c0_95] : memref<16x512xf32, #tpu.memory_space<vmem>>, vector<2x512xf32>
    %cst_96 = arith.constant dense<0.000000e+00> : vector<2x512xf32>
    %340 = tpu.matmul %309, %2, %cst_96 {dimension_numbers = #tpu.dot_dimension_numbers<[1], [0], [0], [1], [0, 0, 1, 1], [], []>} : vector<2x128xbf16>, vector<128x512xbf16>, vector<2x512xf32> -> vector<2x512xf32>
    %341 = arith.addf %339, %340 : vector<2x512xf32>
    %342 = vector.extract_strided_slice %341 {offsets = [0, 0], sizes = [2, 128], strides = [1, 1]} : vector<2x512xf32> to vector<2x128xf32>
    %cst_97 = arith.constant 5.000000e-01 : f32
    %343 = vector.broadcast %cst_97 : f32 to vector<2x128xf32>
    %344 = arith.mulf %343, %342 : vector<2x128xf32>
    %345 = math.tanh %344 : vector<2x128xf32>
    %cst_98 = arith.constant 5.000000e-01 : f32
    %346 = vector.broadcast %cst_98 : f32 to vector<2x128xf32>
    %347 = arith.mulf %346, %345 : vector<2x128xf32>
    %cst_99 = arith.constant 5.000000e-01 : f32
    %348 = vector.broadcast %cst_99 : f32 to vector<2x128xf32>
    %349 = arith.addf %347, %348 : vector<2x128xf32>
    %350 = vector.extract_strided_slice %341 {offsets = [0, 128], sizes = [2, 128], strides = [1, 1]} : vector<2x512xf32> to vector<2x128xf32>
    %cst_100 = arith.constant 5.000000e-01 : f32
    %351 = vector.broadcast %cst_100 : f32 to vector<2x128xf32>
    %352 = arith.mulf %351, %350 : vector<2x128xf32>
    %353 = math.tanh %352 : vector<2x128xf32>
    %cst_101 = arith.constant 5.000000e-01 : f32
    %354 = vector.broadcast %cst_101 : f32 to vector<2x128xf32>
    %355 = arith.mulf %354, %353 : vector<2x128xf32>
    %cst_102 = arith.constant 5.000000e-01 : f32
    %356 = vector.broadcast %cst_102 : f32 to vector<2x128xf32>
    %357 = arith.addf %355, %356 : vector<2x128xf32>
    %358 = vector.extract_strided_slice %341 {offsets = [0, 256], sizes = [2, 128], strides = [1, 1]} : vector<2x512xf32> to vector<2x128xf32>
    %359 = math.tanh %358 : vector<2x128xf32>
    %360 = vector.extract_strided_slice %341 {offsets = [0, 384], sizes = [2, 128], strides = [1, 1]} : vector<2x512xf32> to vector<2x128xf32>
    %cst_103 = arith.constant 5.000000e-01 : f32
    %361 = vector.broadcast %cst_103 : f32 to vector<2x128xf32>
    %362 = arith.mulf %361, %360 : vector<2x128xf32>
    %363 = math.tanh %362 : vector<2x128xf32>
    %cst_104 = arith.constant 5.000000e-01 : f32
    %364 = vector.broadcast %cst_104 : f32 to vector<2x128xf32>
    %365 = arith.mulf %364, %363 : vector<2x128xf32>
    %cst_105 = arith.constant 5.000000e-01 : f32
    %366 = vector.broadcast %cst_105 : f32 to vector<2x128xf32>
    %367 = arith.addf %365, %366 : vector<2x128xf32>
    %368 = arith.mulf %357, %306 : vector<2x128xf32>
    %369 = arith.mulf %349, %359 : vector<2x128xf32>
    %370 = arith.addf %368, %369 : vector<2x128xf32>
    %371 = math.tanh %370 : vector<2x128xf32>
    %372 = arith.mulf %367, %371 : vector<2x128xf32>
    %373 = arith.truncf %372 : vector<2x128xf32> to vector<2x128xbf16>
    %cst_106 = arith.constant dense<0.000000e+00> : vector<2x4xf32>
    %374 = tpu.matmul %373, %3, %cst_106 {dimension_numbers = #tpu.dot_dimension_numbers<[1], [0], [0], [1], [0, 0, 1, 1], [], []>} : vector<2x128xbf16>, vector<128x4xbf16>, vector<2x4xf32> -> vector<2x4xf32>
    %375 = vector.broadcast %333 : vector<2x1xf32> to vector<2x4xf32>
    %376 = vector.broadcast %4 : vector<1x4xf32> to vector<2x4xf32>
    %377 = arith.mulf %375, %376 : vector<2x4xf32>
    %378 = arith.addf %374, %377 : vector<2x4xf32>
    %379 = vector.broadcast %5 : vector<1x4xf32> to vector<2x4xf32>
    %380 = arith.addf %378, %379 : vector<2x4xf32>
    %cst_107 = arith.constant 5.000000e-01 : f32
    %381 = vector.broadcast %cst_107 : f32 to vector<2x4xf32>
    %382 = arith.mulf %381, %380 : vector<2x4xf32>
    %383 = math.tanh %382 : vector<2x4xf32>
    %cst_108 = arith.constant 5.000000e-01 : f32
    %384 = vector.broadcast %cst_108 : f32 to vector<2x4xf32>
    %385 = arith.mulf %384, %383 : vector<2x4xf32>
    %cst_109 = arith.constant 5.000000e-01 : f32
    %386 = vector.broadcast %cst_109 : f32 to vector<2x4xf32>
    %387 = arith.addf %385, %386 : vector<2x4xf32>
    %388 = vector.extract_strided_slice %380 {offsets = [0, 2], sizes = [2, 1], strides = [1, 1]} : vector<2x4xf32> to vector<2x1xf32>
    %389 = math.tanh %388 : vector<2x1xf32>
    %390 = vector.extract_strided_slice %387 {offsets = [0, 1], sizes = [2, 1], strides = [1, 1]} : vector<2x4xf32> to vector<2x1xf32>
    %391 = arith.mulf %390, %330 : vector<2x1xf32>
    %392 = vector.extract_strided_slice %387 {offsets = [0, 0], sizes = [2, 1], strides = [1, 1]} : vector<2x4xf32> to vector<2x1xf32>
    %393 = arith.mulf %392, %389 : vector<2x1xf32>
    %394 = arith.addf %391, %393 : vector<2x1xf32>
    %395 = vector.extract_strided_slice %387 {offsets = [0, 3], sizes = [2, 1], strides = [1, 1]} : vector<2x4xf32> to vector<2x1xf32>
    %396 = math.tanh %394 : vector<2x1xf32>
    %397 = arith.mulf %395, %396 : vector<2x1xf32>
    %c5_i32 = arith.constant 5 : i32
    %398 = vector.broadcast %c5_i32 : i32 to vector<2x128xi32>
    %399 = arith.cmpi eq, %18, %398 : vector<2x128xi32>
    %400 = vector.shape_cast %397 : vector<2x1xf32> to vector<2x1xf32>
    %401 = vector.broadcast %400 : vector<2x1xf32> to vector<2x128xf32>
    %402 = arith.select %399, %401, %338 : vector<2x128xi1>, vector<2x128xf32>
    %c12 = arith.constant 12 : index
    %c0_110 = arith.constant 0 : index
    %403 = vector.load %arg8[%c12, %c0_110] : memref<16x512xf32, #tpu.memory_space<vmem>>, vector<2x512xf32>
    %cst_111 = arith.constant dense<0.000000e+00> : vector<2x512xf32>
    %404 = tpu.matmul %373, %2, %cst_111 {dimension_numbers = #tpu.dot_dimension_numbers<[1], [0], [0], [1], [0, 0, 1, 1], [], []>} : vector<2x128xbf16>, vector<128x512xbf16>, vector<2x512xf32> -> vector<2x512xf32>
    %405 = arith.addf %403, %404 : vector<2x512xf32>
    %406 = vector.extract_strided_slice %405 {offsets = [0, 0], sizes = [2, 128], strides = [1, 1]} : vector<2x512xf32> to vector<2x128xf32>
    %cst_112 = arith.constant 5.000000e-01 : f32
    %407 = vector.broadcast %cst_112 : f32 to vector<2x128xf32>
    %408 = arith.mulf %407, %406 : vector<2x128xf32>
    %409 = math.tanh %408 : vector<2x128xf32>
    %cst_113 = arith.constant 5.000000e-01 : f32
    %410 = vector.broadcast %cst_113 : f32 to vector<2x128xf32>
    %411 = arith.mulf %410, %409 : vector<2x128xf32>
    %cst_114 = arith.constant 5.000000e-01 : f32
    %412 = vector.broadcast %cst_114 : f32 to vector<2x128xf32>
    %413 = arith.addf %411, %412 : vector<2x128xf32>
    %414 = vector.extract_strided_slice %405 {offsets = [0, 128], sizes = [2, 128], strides = [1, 1]} : vector<2x512xf32> to vector<2x128xf32>
    %cst_115 = arith.constant 5.000000e-01 : f32
    %415 = vector.broadcast %cst_115 : f32 to vector<2x128xf32>
    %416 = arith.mulf %415, %414 : vector<2x128xf32>
    %417 = math.tanh %416 : vector<2x128xf32>
    %cst_116 = arith.constant 5.000000e-01 : f32
    %418 = vector.broadcast %cst_116 : f32 to vector<2x128xf32>
    %419 = arith.mulf %418, %417 : vector<2x128xf32>
    %cst_117 = arith.constant 5.000000e-01 : f32
    %420 = vector.broadcast %cst_117 : f32 to vector<2x128xf32>
    %421 = arith.addf %419, %420 : vector<2x128xf32>
    %422 = vector.extract_strided_slice %405 {offsets = [0, 256], sizes = [2, 128], strides = [1, 1]} : vector<2x512xf32> to vector<2x128xf32>
    %423 = math.tanh %422 : vector<2x128xf32>
    %424 = vector.extract_strided_slice %405 {offsets = [0, 384], sizes = [2, 128], strides = [1, 1]} : vector<2x512xf32> to vector<2x128xf32>
    %cst_118 = arith.constant 5.000000e-01 : f32
    %425 = vector.broadcast %cst_118 : f32 to vector<2x128xf32>
    %426 = arith.mulf %425, %424 : vector<2x128xf32>
    %427 = math.tanh %426 : vector<2x128xf32>
    %cst_119 = arith.constant 5.000000e-01 : f32
    %428 = vector.broadcast %cst_119 : f32 to vector<2x128xf32>
    %429 = arith.mulf %428, %427 : vector<2x128xf32>
    %cst_120 = arith.constant 5.000000e-01 : f32
    %430 = vector.broadcast %cst_120 : f32 to vector<2x128xf32>
    %431 = arith.addf %429, %430 : vector<2x128xf32>
    %432 = arith.mulf %421, %370 : vector<2x128xf32>
    %433 = arith.mulf %413, %423 : vector<2x128xf32>
    %434 = arith.addf %432, %433 : vector<2x128xf32>
    %435 = math.tanh %434 : vector<2x128xf32>
    %436 = arith.mulf %431, %435 : vector<2x128xf32>
    %437 = arith.truncf %436 : vector<2x128xf32> to vector<2x128xbf16>
    %cst_121 = arith.constant dense<0.000000e+00> : vector<2x4xf32>
    %438 = tpu.matmul %437, %3, %cst_121 {dimension_numbers = #tpu.dot_dimension_numbers<[1], [0], [0], [1], [0, 0, 1, 1], [], []>} : vector<2x128xbf16>, vector<128x4xbf16>, vector<2x4xf32> -> vector<2x4xf32>
    %439 = vector.broadcast %397 : vector<2x1xf32> to vector<2x4xf32>
    %440 = vector.broadcast %4 : vector<1x4xf32> to vector<2x4xf32>
    %441 = arith.mulf %439, %440 : vector<2x4xf32>
    %442 = arith.addf %438, %441 : vector<2x4xf32>
    %443 = vector.broadcast %5 : vector<1x4xf32> to vector<2x4xf32>
    %444 = arith.addf %442, %443 : vector<2x4xf32>
    %cst_122 = arith.constant 5.000000e-01 : f32
    %445 = vector.broadcast %cst_122 : f32 to vector<2x4xf32>
    %446 = arith.mulf %445, %444 : vector<2x4xf32>
    %447 = math.tanh %446 : vector<2x4xf32>
    %cst_123 = arith.constant 5.000000e-01 : f32
    %448 = vector.broadcast %cst_123 : f32 to vector<2x4xf32>
    %449 = arith.mulf %448, %447 : vector<2x4xf32>
    %cst_124 = arith.constant 5.000000e-01 : f32
    %450 = vector.broadcast %cst_124 : f32 to vector<2x4xf32>
    %451 = arith.addf %449, %450 : vector<2x4xf32>
    %452 = vector.extract_strided_slice %444 {offsets = [0, 2], sizes = [2, 1], strides = [1, 1]} : vector<2x4xf32> to vector<2x1xf32>
    %453 = math.tanh %452 : vector<2x1xf32>
    %454 = vector.extract_strided_slice %451 {offsets = [0, 1], sizes = [2, 1], strides = [1, 1]} : vector<2x4xf32> to vector<2x1xf32>
    %455 = arith.mulf %454, %394 : vector<2x1xf32>
    %456 = vector.extract_strided_slice %451 {offsets = [0, 0], sizes = [2, 1], strides = [1, 1]} : vector<2x4xf32> to vector<2x1xf32>
    %457 = arith.mulf %456, %453 : vector<2x1xf32>
    %458 = arith.addf %455, %457 : vector<2x1xf32>
    %459 = vector.extract_strided_slice %451 {offsets = [0, 3], sizes = [2, 1], strides = [1, 1]} : vector<2x4xf32> to vector<2x1xf32>
    %460 = math.tanh %458 : vector<2x1xf32>
    %461 = arith.mulf %459, %460 : vector<2x1xf32>
    %c6_i32 = arith.constant 6 : i32
    %462 = vector.broadcast %c6_i32 : i32 to vector<2x128xi32>
    %463 = arith.cmpi eq, %18, %462 : vector<2x128xi32>
    %464 = vector.shape_cast %461 : vector<2x1xf32> to vector<2x1xf32>
    %465 = vector.broadcast %464 : vector<2x1xf32> to vector<2x128xf32>
    %466 = arith.select %463, %465, %402 : vector<2x128xi1>, vector<2x128xf32>
    %c14 = arith.constant 14 : index
    %c0_125 = arith.constant 0 : index
    %467 = vector.load %arg8[%c14, %c0_125] : memref<16x512xf32, #tpu.memory_space<vmem>>, vector<2x512xf32>
    %cst_126 = arith.constant dense<0.000000e+00> : vector<2x512xf32>
    %468 = tpu.matmul %437, %2, %cst_126 {dimension_numbers = #tpu.dot_dimension_numbers<[1], [0], [0], [1], [0, 0, 1, 1], [], []>} : vector<2x128xbf16>, vector<128x512xbf16>, vector<2x512xf32> -> vector<2x512xf32>
    %469 = arith.addf %467, %468 : vector<2x512xf32>
    %470 = vector.extract_strided_slice %469 {offsets = [0, 0], sizes = [2, 128], strides = [1, 1]} : vector<2x512xf32> to vector<2x128xf32>
    %cst_127 = arith.constant 5.000000e-01 : f32
    %471 = vector.broadcast %cst_127 : f32 to vector<2x128xf32>
    %472 = arith.mulf %471, %470 : vector<2x128xf32>
    %473 = math.tanh %472 : vector<2x128xf32>
    %cst_128 = arith.constant 5.000000e-01 : f32
    %474 = vector.broadcast %cst_128 : f32 to vector<2x128xf32>
    %475 = arith.mulf %474, %473 : vector<2x128xf32>
    %cst_129 = arith.constant 5.000000e-01 : f32
    %476 = vector.broadcast %cst_129 : f32 to vector<2x128xf32>
    %477 = arith.addf %475, %476 : vector<2x128xf32>
    %478 = vector.extract_strided_slice %469 {offsets = [0, 128], sizes = [2, 128], strides = [1, 1]} : vector<2x512xf32> to vector<2x128xf32>
    %cst_130 = arith.constant 5.000000e-01 : f32
    %479 = vector.broadcast %cst_130 : f32 to vector<2x128xf32>
    %480 = arith.mulf %479, %478 : vector<2x128xf32>
    %481 = math.tanh %480 : vector<2x128xf32>
    %cst_131 = arith.constant 5.000000e-01 : f32
    %482 = vector.broadcast %cst_131 : f32 to vector<2x128xf32>
    %483 = arith.mulf %482, %481 : vector<2x128xf32>
    %cst_132 = arith.constant 5.000000e-01 : f32
    %484 = vector.broadcast %cst_132 : f32 to vector<2x128xf32>
    %485 = arith.addf %483, %484 : vector<2x128xf32>
    %486 = vector.extract_strided_slice %469 {offsets = [0, 256], sizes = [2, 128], strides = [1, 1]} : vector<2x512xf32> to vector<2x128xf32>
    %487 = math.tanh %486 : vector<2x128xf32>
    %488 = vector.extract_strided_slice %469 {offsets = [0, 384], sizes = [2, 128], strides = [1, 1]} : vector<2x512xf32> to vector<2x128xf32>
    %cst_133 = arith.constant 5.000000e-01 : f32
    %489 = vector.broadcast %cst_133 : f32 to vector<2x128xf32>
    %490 = arith.mulf %489, %488 : vector<2x128xf32>
    %491 = math.tanh %490 : vector<2x128xf32>
    %cst_134 = arith.constant 5.000000e-01 : f32
    %492 = vector.broadcast %cst_134 : f32 to vector<2x128xf32>
    %493 = arith.mulf %492, %491 : vector<2x128xf32>
    %cst_135 = arith.constant 5.000000e-01 : f32
    %494 = vector.broadcast %cst_135 : f32 to vector<2x128xf32>
    %495 = arith.addf %493, %494 : vector<2x128xf32>
    %496 = arith.mulf %485, %434 : vector<2x128xf32>
    %497 = arith.mulf %477, %487 : vector<2x128xf32>
    %498 = arith.addf %496, %497 : vector<2x128xf32>
    %499 = math.tanh %498 : vector<2x128xf32>
    %500 = arith.mulf %495, %499 : vector<2x128xf32>
    %501 = arith.truncf %500 : vector<2x128xf32> to vector<2x128xbf16>
    %cst_136 = arith.constant dense<0.000000e+00> : vector<2x4xf32>
    %502 = tpu.matmul %501, %3, %cst_136 {dimension_numbers = #tpu.dot_dimension_numbers<[1], [0], [0], [1], [0, 0, 1, 1], [], []>} : vector<2x128xbf16>, vector<128x4xbf16>, vector<2x4xf32> -> vector<2x4xf32>
    %503 = vector.broadcast %461 : vector<2x1xf32> to vector<2x4xf32>
    %504 = vector.broadcast %4 : vector<1x4xf32> to vector<2x4xf32>
    %505 = arith.mulf %503, %504 : vector<2x4xf32>
    %506 = arith.addf %502, %505 : vector<2x4xf32>
    %507 = vector.broadcast %5 : vector<1x4xf32> to vector<2x4xf32>
    %508 = arith.addf %506, %507 : vector<2x4xf32>
    %cst_137 = arith.constant 5.000000e-01 : f32
    %509 = vector.broadcast %cst_137 : f32 to vector<2x4xf32>
    %510 = arith.mulf %509, %508 : vector<2x4xf32>
    %511 = math.tanh %510 : vector<2x4xf32>
    %cst_138 = arith.constant 5.000000e-01 : f32
    %512 = vector.broadcast %cst_138 : f32 to vector<2x4xf32>
    %513 = arith.mulf %512, %511 : vector<2x4xf32>
    %cst_139 = arith.constant 5.000000e-01 : f32
    %514 = vector.broadcast %cst_139 : f32 to vector<2x4xf32>
    %515 = arith.addf %513, %514 : vector<2x4xf32>
    %516 = vector.extract_strided_slice %508 {offsets = [0, 2], sizes = [2, 1], strides = [1, 1]} : vector<2x4xf32> to vector<2x1xf32>
    %517 = math.tanh %516 : vector<2x1xf32>
    %518 = vector.extract_strided_slice %515 {offsets = [0, 1], sizes = [2, 1], strides = [1, 1]} : vector<2x4xf32> to vector<2x1xf32>
    %519 = arith.mulf %518, %458 : vector<2x1xf32>
    %520 = vector.extract_strided_slice %515 {offsets = [0, 0], sizes = [2, 1], strides = [1, 1]} : vector<2x4xf32> to vector<2x1xf32>
    %521 = arith.mulf %520, %517 : vector<2x1xf32>
    %522 = arith.addf %519, %521 : vector<2x1xf32>
    %523 = vector.extract_strided_slice %515 {offsets = [0, 3], sizes = [2, 1], strides = [1, 1]} : vector<2x4xf32> to vector<2x1xf32>
    %524 = math.tanh %522 : vector<2x1xf32>
    %525 = arith.mulf %523, %524 : vector<2x1xf32>
    %c7_i32 = arith.constant 7 : i32
    %526 = vector.broadcast %c7_i32 : i32 to vector<2x128xi32>
    %527 = arith.cmpi eq, %18, %526 : vector<2x128xi32>
    %528 = vector.shape_cast %525 : vector<2x1xf32> to vector<2x1xf32>
    %529 = vector.broadcast %528 : vector<2x1xf32> to vector<2x128xf32>
    %530 = arith.select %527, %529, %466 : vector<2x128xi1>, vector<2x128xf32>
    %531 = vector.broadcast %525 : vector<2x1xf32> to vector<2x512xf32>
    %532 = vector.broadcast %0 : vector<1x512xf32> to vector<2x512xf32>
    %533 = arith.mulf %531, %532 : vector<2x512xf32>
    %534 = vector.broadcast %1 : vector<1x512xf32> to vector<2x512xf32>
    %535 = arith.addf %533, %534 : vector<2x512xf32>
    %cst_140 = arith.constant dense<0.000000e+00> : vector<2x512xf32>
    %536 = tpu.matmul %501, %2, %cst_140 {dimension_numbers = #tpu.dot_dimension_numbers<[1], [0], [0], [1], [0, 0, 1, 1], [], []>} : vector<2x128xbf16>, vector<128x512xbf16>, vector<2x512xf32> -> vector<2x512xf32>
    %537 = arith.addf %535, %536 : vector<2x512xf32>
    %538 = vector.extract_strided_slice %537 {offsets = [0, 0], sizes = [2, 128], strides = [1, 1]} : vector<2x512xf32> to vector<2x128xf32>
    %cst_141 = arith.constant 5.000000e-01 : f32
    %539 = vector.broadcast %cst_141 : f32 to vector<2x128xf32>
    %540 = arith.mulf %539, %538 : vector<2x128xf32>
    %541 = math.tanh %540 : vector<2x128xf32>
    %cst_142 = arith.constant 5.000000e-01 : f32
    %542 = vector.broadcast %cst_142 : f32 to vector<2x128xf32>
    %543 = arith.mulf %542, %541 : vector<2x128xf32>
    %cst_143 = arith.constant 5.000000e-01 : f32
    %544 = vector.broadcast %cst_143 : f32 to vector<2x128xf32>
    %545 = arith.addf %543, %544 : vector<2x128xf32>
    %546 = vector.extract_strided_slice %537 {offsets = [0, 128], sizes = [2, 128], strides = [1, 1]} : vector<2x512xf32> to vector<2x128xf32>
    %cst_144 = arith.constant 5.000000e-01 : f32
    %547 = vector.broadcast %cst_144 : f32 to vector<2x128xf32>
    %548 = arith.mulf %547, %546 : vector<2x128xf32>
    %549 = math.tanh %548 : vector<2x128xf32>
    %cst_145 = arith.constant 5.000000e-01 : f32
    %550 = vector.broadcast %cst_145 : f32 to vector<2x128xf32>
    %551 = arith.mulf %550, %549 : vector<2x128xf32>
    %cst_146 = arith.constant 5.000000e-01 : f32
    %552 = vector.broadcast %cst_146 : f32 to vector<2x128xf32>
    %553 = arith.addf %551, %552 : vector<2x128xf32>
    %554 = vector.extract_strided_slice %537 {offsets = [0, 256], sizes = [2, 128], strides = [1, 1]} : vector<2x512xf32> to vector<2x128xf32>
    %555 = math.tanh %554 : vector<2x128xf32>
    %556 = vector.extract_strided_slice %537 {offsets = [0, 384], sizes = [2, 128], strides = [1, 1]} : vector<2x512xf32> to vector<2x128xf32>
    %cst_147 = arith.constant 5.000000e-01 : f32
    %557 = vector.broadcast %cst_147 : f32 to vector<2x128xf32>
    %558 = arith.mulf %557, %556 : vector<2x128xf32>
    %559 = math.tanh %558 : vector<2x128xf32>
    %cst_148 = arith.constant 5.000000e-01 : f32
    %560 = vector.broadcast %cst_148 : f32 to vector<2x128xf32>
    %561 = arith.mulf %560, %559 : vector<2x128xf32>
    %cst_149 = arith.constant 5.000000e-01 : f32
    %562 = vector.broadcast %cst_149 : f32 to vector<2x128xf32>
    %563 = arith.addf %561, %562 : vector<2x128xf32>
    %564 = arith.mulf %553, %498 : vector<2x128xf32>
    %565 = arith.mulf %545, %555 : vector<2x128xf32>
    %566 = arith.addf %564, %565 : vector<2x128xf32>
    %567 = math.tanh %566 : vector<2x128xf32>
    %568 = arith.mulf %563, %567 : vector<2x128xf32>
    %569 = arith.truncf %568 : vector<2x128xf32> to vector<2x128xbf16>
    %cst_150 = arith.constant dense<0.000000e+00> : vector<2x4xf32>
    %570 = tpu.matmul %569, %3, %cst_150 {dimension_numbers = #tpu.dot_dimension_numbers<[1], [0], [0], [1], [0, 0, 1, 1], [], []>} : vector<2x128xbf16>, vector<128x4xbf16>, vector<2x4xf32> -> vector<2x4xf32>
    %571 = vector.broadcast %525 : vector<2x1xf32> to vector<2x4xf32>
    %572 = vector.broadcast %4 : vector<1x4xf32> to vector<2x4xf32>
    %573 = arith.mulf %571, %572 : vector<2x4xf32>
    %574 = arith.addf %570, %573 : vector<2x4xf32>
    %575 = vector.broadcast %5 : vector<1x4xf32> to vector<2x4xf32>
    %576 = arith.addf %574, %575 : vector<2x4xf32>
    %cst_151 = arith.constant 5.000000e-01 : f32
    %577 = vector.broadcast %cst_151 : f32 to vector<2x4xf32>
    %578 = arith.mulf %577, %576 : vector<2x4xf32>
    %579 = math.tanh %578 : vector<2x4xf32>
    %cst_152 = arith.constant 5.000000e-01 : f32
    %580 = vector.broadcast %cst_152 : f32 to vector<2x4xf32>
    %581 = arith.mulf %580, %579 : vector<2x4xf32>
    %cst_153 = arith.constant 5.000000e-01 : f32
    %582 = vector.broadcast %cst_153 : f32 to vector<2x4xf32>
    %583 = arith.addf %581, %582 : vector<2x4xf32>
    %584 = vector.extract_strided_slice %576 {offsets = [0, 2], sizes = [2, 1], strides = [1, 1]} : vector<2x4xf32> to vector<2x1xf32>
    %585 = math.tanh %584 : vector<2x1xf32>
    %586 = vector.extract_strided_slice %583 {offsets = [0, 1], sizes = [2, 1], strides = [1, 1]} : vector<2x4xf32> to vector<2x1xf32>
    %587 = arith.mulf %586, %522 : vector<2x1xf32>
    %588 = vector.extract_strided_slice %583 {offsets = [0, 0], sizes = [2, 1], strides = [1, 1]} : vector<2x4xf32> to vector<2x1xf32>
    %589 = arith.mulf %588, %585 : vector<2x1xf32>
    %590 = arith.addf %587, %589 : vector<2x1xf32>
    %591 = vector.extract_strided_slice %583 {offsets = [0, 3], sizes = [2, 1], strides = [1, 1]} : vector<2x4xf32> to vector<2x1xf32>
    %592 = math.tanh %590 : vector<2x1xf32>
    %593 = arith.mulf %591, %592 : vector<2x1xf32>
    %c8_i32 = arith.constant 8 : i32
    %594 = vector.broadcast %c8_i32 : i32 to vector<2x128xi32>
    %595 = arith.cmpi eq, %18, %594 : vector<2x128xi32>
    %596 = vector.shape_cast %593 : vector<2x1xf32> to vector<2x1xf32>
    %597 = vector.broadcast %596 : vector<2x1xf32> to vector<2x128xf32>
    %598 = arith.select %595, %597, %530 : vector<2x128xi1>, vector<2x128xf32>
    %599 = vector.broadcast %593 : vector<2x1xf32> to vector<2x512xf32>
    %600 = vector.broadcast %0 : vector<1x512xf32> to vector<2x512xf32>
    %601 = arith.mulf %599, %600 : vector<2x512xf32>
    %602 = vector.broadcast %1 : vector<1x512xf32> to vector<2x512xf32>
    %603 = arith.addf %601, %602 : vector<2x512xf32>
    %cst_154 = arith.constant dense<0.000000e+00> : vector<2x512xf32>
    %604 = tpu.matmul %569, %2, %cst_154 {dimension_numbers = #tpu.dot_dimension_numbers<[1], [0], [0], [1], [0, 0, 1, 1], [], []>} : vector<2x128xbf16>, vector<128x512xbf16>, vector<2x512xf32> -> vector<2x512xf32>
    %605 = arith.addf %603, %604 : vector<2x512xf32>
    %606 = vector.extract_strided_slice %605 {offsets = [0, 0], sizes = [2, 128], strides = [1, 1]} : vector<2x512xf32> to vector<2x128xf32>
    %cst_155 = arith.constant 5.000000e-01 : f32
    %607 = vector.broadcast %cst_155 : f32 to vector<2x128xf32>
    %608 = arith.mulf %607, %606 : vector<2x128xf32>
    %609 = math.tanh %608 : vector<2x128xf32>
    %cst_156 = arith.constant 5.000000e-01 : f32
    %610 = vector.broadcast %cst_156 : f32 to vector<2x128xf32>
    %611 = arith.mulf %610, %609 : vector<2x128xf32>
    %cst_157 = arith.constant 5.000000e-01 : f32
    %612 = vector.broadcast %cst_157 : f32 to vector<2x128xf32>
    %613 = arith.addf %611, %612 : vector<2x128xf32>
    %614 = vector.extract_strided_slice %605 {offsets = [0, 128], sizes = [2, 128], strides = [1, 1]} : vector<2x512xf32> to vector<2x128xf32>
    %cst_158 = arith.constant 5.000000e-01 : f32
    %615 = vector.broadcast %cst_158 : f32 to vector<2x128xf32>
    %616 = arith.mulf %615, %614 : vector<2x128xf32>
    %617 = math.tanh %616 : vector<2x128xf32>
    %cst_159 = arith.constant 5.000000e-01 : f32
    %618 = vector.broadcast %cst_159 : f32 to vector<2x128xf32>
    %619 = arith.mulf %618, %617 : vector<2x128xf32>
    %cst_160 = arith.constant 5.000000e-01 : f32
    %620 = vector.broadcast %cst_160 : f32 to vector<2x128xf32>
    %621 = arith.addf %619, %620 : vector<2x128xf32>
    %622 = vector.extract_strided_slice %605 {offsets = [0, 256], sizes = [2, 128], strides = [1, 1]} : vector<2x512xf32> to vector<2x128xf32>
    %623 = math.tanh %622 : vector<2x128xf32>
    %624 = vector.extract_strided_slice %605 {offsets = [0, 384], sizes = [2, 128], strides = [1, 1]} : vector<2x512xf32> to vector<2x128xf32>
    %cst_161 = arith.constant 5.000000e-01 : f32
    %625 = vector.broadcast %cst_161 : f32 to vector<2x128xf32>
    %626 = arith.mulf %625, %624 : vector<2x128xf32>
    %627 = math.tanh %626 : vector<2x128xf32>
    %cst_162 = arith.constant 5.000000e-01 : f32
    %628 = vector.broadcast %cst_162 : f32 to vector<2x128xf32>
    %629 = arith.mulf %628, %627 : vector<2x128xf32>
    %cst_163 = arith.constant 5.000000e-01 : f32
    %630 = vector.broadcast %cst_163 : f32 to vector<2x128xf32>
    %631 = arith.addf %629, %630 : vector<2x128xf32>
    %632 = arith.mulf %621, %566 : vector<2x128xf32>
    %633 = arith.mulf %613, %623 : vector<2x128xf32>
    %634 = arith.addf %632, %633 : vector<2x128xf32>
    %635 = math.tanh %634 : vector<2x128xf32>
    %636 = arith.mulf %631, %635 : vector<2x128xf32>
    %637 = arith.truncf %636 : vector<2x128xf32> to vector<2x128xbf16>
    %cst_164 = arith.constant dense<0.000000e+00> : vector<2x4xf32>
    %638 = tpu.matmul %637, %3, %cst_164 {dimension_numbers = #tpu.dot_dimension_numbers<[1], [0], [0], [1], [0, 0, 1, 1], [], []>} : vector<2x128xbf16>, vector<128x4xbf16>, vector<2x4xf32> -> vector<2x4xf32>
    %639 = vector.broadcast %593 : vector<2x1xf32> to vector<2x4xf32>
    %640 = vector.broadcast %4 : vector<1x4xf32> to vector<2x4xf32>
    %641 = arith.mulf %639, %640 : vector<2x4xf32>
    %642 = arith.addf %638, %641 : vector<2x4xf32>
    %643 = vector.broadcast %5 : vector<1x4xf32> to vector<2x4xf32>
    %644 = arith.addf %642, %643 : vector<2x4xf32>
    %cst_165 = arith.constant 5.000000e-01 : f32
    %645 = vector.broadcast %cst_165 : f32 to vector<2x4xf32>
    %646 = arith.mulf %645, %644 : vector<2x4xf32>
    %647 = math.tanh %646 : vector<2x4xf32>
    %cst_166 = arith.constant 5.000000e-01 : f32
    %648 = vector.broadcast %cst_166 : f32 to vector<2x4xf32>
    %649 = arith.mulf %648, %647 : vector<2x4xf32>
    %cst_167 = arith.constant 5.000000e-01 : f32
    %650 = vector.broadcast %cst_167 : f32 to vector<2x4xf32>
    %651 = arith.addf %649, %650 : vector<2x4xf32>
    %652 = vector.extract_strided_slice %644 {offsets = [0, 2], sizes = [2, 1], strides = [1, 1]} : vector<2x4xf32> to vector<2x1xf32>
    %653 = math.tanh %652 : vector<2x1xf32>
    %654 = vector.extract_strided_slice %651 {offsets = [0, 1], sizes = [2, 1], strides = [1, 1]} : vector<2x4xf32> to vector<2x1xf32>
    %655 = arith.mulf %654, %590 : vector<2x1xf32>
    %656 = vector.extract_strided_slice %651 {offsets = [0, 0], sizes = [2, 1], strides = [1, 1]} : vector<2x4xf32> to vector<2x1xf32>
    %657 = arith.mulf %656, %653 : vector<2x1xf32>
    %658 = arith.addf %655, %657 : vector<2x1xf32>
    %659 = vector.extract_strided_slice %651 {offsets = [0, 3], sizes = [2, 1], strides = [1, 1]} : vector<2x4xf32> to vector<2x1xf32>
    %660 = math.tanh %658 : vector<2x1xf32>
    %661 = arith.mulf %659, %660 : vector<2x1xf32>
    %c9_i32 = arith.constant 9 : i32
    %662 = vector.broadcast %c9_i32 : i32 to vector<2x128xi32>
    %663 = arith.cmpi eq, %18, %662 : vector<2x128xi32>
    %664 = vector.shape_cast %661 : vector<2x1xf32> to vector<2x1xf32>
    %665 = vector.broadcast %664 : vector<2x1xf32> to vector<2x128xf32>
    %666 = arith.select %663, %665, %598 : vector<2x128xi1>, vector<2x128xf32>
    %667 = vector.broadcast %661 : vector<2x1xf32> to vector<2x512xf32>
    %668 = vector.broadcast %0 : vector<1x512xf32> to vector<2x512xf32>
    %669 = arith.mulf %667, %668 : vector<2x512xf32>
    %670 = vector.broadcast %1 : vector<1x512xf32> to vector<2x512xf32>
    %671 = arith.addf %669, %670 : vector<2x512xf32>
    %cst_168 = arith.constant dense<0.000000e+00> : vector<2x512xf32>
    %672 = tpu.matmul %637, %2, %cst_168 {dimension_numbers = #tpu.dot_dimension_numbers<[1], [0], [0], [1], [0, 0, 1, 1], [], []>} : vector<2x128xbf16>, vector<128x512xbf16>, vector<2x512xf32> -> vector<2x512xf32>
    %673 = arith.addf %671, %672 : vector<2x512xf32>
    %674 = vector.extract_strided_slice %673 {offsets = [0, 0], sizes = [2, 128], strides = [1, 1]} : vector<2x512xf32> to vector<2x128xf32>
    %cst_169 = arith.constant 5.000000e-01 : f32
    %675 = vector.broadcast %cst_169 : f32 to vector<2x128xf32>
    %676 = arith.mulf %675, %674 : vector<2x128xf32>
    %677 = math.tanh %676 : vector<2x128xf32>
    %cst_170 = arith.constant 5.000000e-01 : f32
    %678 = vector.broadcast %cst_170 : f32 to vector<2x128xf32>
    %679 = arith.mulf %678, %677 : vector<2x128xf32>
    %cst_171 = arith.constant 5.000000e-01 : f32
    %680 = vector.broadcast %cst_171 : f32 to vector<2x128xf32>
    %681 = arith.addf %679, %680 : vector<2x128xf32>
    %682 = vector.extract_strided_slice %673 {offsets = [0, 128], sizes = [2, 128], strides = [1, 1]} : vector<2x512xf32> to vector<2x128xf32>
    %cst_172 = arith.constant 5.000000e-01 : f32
    %683 = vector.broadcast %cst_172 : f32 to vector<2x128xf32>
    %684 = arith.mulf %683, %682 : vector<2x128xf32>
    %685 = math.tanh %684 : vector<2x128xf32>
    %cst_173 = arith.constant 5.000000e-01 : f32
    %686 = vector.broadcast %cst_173 : f32 to vector<2x128xf32>
    %687 = arith.mulf %686, %685 : vector<2x128xf32>
    %cst_174 = arith.constant 5.000000e-01 : f32
    %688 = vector.broadcast %cst_174 : f32 to vector<2x128xf32>
    %689 = arith.addf %687, %688 : vector<2x128xf32>
    %690 = vector.extract_strided_slice %673 {offsets = [0, 256], sizes = [2, 128], strides = [1, 1]} : vector<2x512xf32> to vector<2x128xf32>
    %691 = math.tanh %690 : vector<2x128xf32>
    %692 = vector.extract_strided_slice %673 {offsets = [0, 384], sizes = [2, 128], strides = [1, 1]} : vector<2x512xf32> to vector<2x128xf32>
    %cst_175 = arith.constant 5.000000e-01 : f32
    %693 = vector.broadcast %cst_175 : f32 to vector<2x128xf32>
    %694 = arith.mulf %693, %692 : vector<2x128xf32>
    %695 = math.tanh %694 : vector<2x128xf32>
    %cst_176 = arith.constant 5.000000e-01 : f32
    %696 = vector.broadcast %cst_176 : f32 to vector<2x128xf32>
    %697 = arith.mulf %696, %695 : vector<2x128xf32>
    %cst_177 = arith.constant 5.000000e-01 : f32
    %698 = vector.broadcast %cst_177 : f32 to vector<2x128xf32>
    %699 = arith.addf %697, %698 : vector<2x128xf32>
    %700 = arith.mulf %689, %634 : vector<2x128xf32>
    %701 = arith.mulf %681, %691 : vector<2x128xf32>
    %702 = arith.addf %700, %701 : vector<2x128xf32>
    %703 = math.tanh %702 : vector<2x128xf32>
    %704 = arith.mulf %699, %703 : vector<2x128xf32>
    %705 = arith.truncf %704 : vector<2x128xf32> to vector<2x128xbf16>
    %cst_178 = arith.constant dense<0.000000e+00> : vector<2x4xf32>
    %706 = tpu.matmul %705, %3, %cst_178 {dimension_numbers = #tpu.dot_dimension_numbers<[1], [0], [0], [1], [0, 0, 1, 1], [], []>} : vector<2x128xbf16>, vector<128x4xbf16>, vector<2x4xf32> -> vector<2x4xf32>
    %707 = vector.broadcast %661 : vector<2x1xf32> to vector<2x4xf32>
    %708 = vector.broadcast %4 : vector<1x4xf32> to vector<2x4xf32>
    %709 = arith.mulf %707, %708 : vector<2x4xf32>
    %710 = arith.addf %706, %709 : vector<2x4xf32>
    %711 = vector.broadcast %5 : vector<1x4xf32> to vector<2x4xf32>
    %712 = arith.addf %710, %711 : vector<2x4xf32>
    %cst_179 = arith.constant 5.000000e-01 : f32
    %713 = vector.broadcast %cst_179 : f32 to vector<2x4xf32>
    %714 = arith.mulf %713, %712 : vector<2x4xf32>
    %715 = math.tanh %714 : vector<2x4xf32>
    %cst_180 = arith.constant 5.000000e-01 : f32
    %716 = vector.broadcast %cst_180 : f32 to vector<2x4xf32>
    %717 = arith.mulf %716, %715 : vector<2x4xf32>
    %cst_181 = arith.constant 5.000000e-01 : f32
    %718 = vector.broadcast %cst_181 : f32 to vector<2x4xf32>
    %719 = arith.addf %717, %718 : vector<2x4xf32>
    %720 = vector.extract_strided_slice %712 {offsets = [0, 2], sizes = [2, 1], strides = [1, 1]} : vector<2x4xf32> to vector<2x1xf32>
    %721 = math.tanh %720 : vector<2x1xf32>
    %722 = vector.extract_strided_slice %719 {offsets = [0, 1], sizes = [2, 1], strides = [1, 1]} : vector<2x4xf32> to vector<2x1xf32>
    %723 = arith.mulf %722, %658 : vector<2x1xf32>
    %724 = vector.extract_strided_slice %719 {offsets = [0, 0], sizes = [2, 1], strides = [1, 1]} : vector<2x4xf32> to vector<2x1xf32>
    %725 = arith.mulf %724, %721 : vector<2x1xf32>
    %726 = arith.addf %723, %725 : vector<2x1xf32>
    %727 = vector.extract_strided_slice %719 {offsets = [0, 3], sizes = [2, 1], strides = [1, 1]} : vector<2x4xf32> to vector<2x1xf32>
    %728 = math.tanh %726 : vector<2x1xf32>
    %729 = arith.mulf %727, %728 : vector<2x1xf32>
    %c10_i32 = arith.constant 10 : i32
    %730 = vector.broadcast %c10_i32 : i32 to vector<2x128xi32>
    %731 = arith.cmpi eq, %18, %730 : vector<2x128xi32>
    %732 = vector.shape_cast %729 : vector<2x1xf32> to vector<2x1xf32>
    %733 = vector.broadcast %732 : vector<2x1xf32> to vector<2x128xf32>
    %734 = arith.select %731, %733, %666 : vector<2x128xi1>, vector<2x128xf32>
    %735 = vector.broadcast %729 : vector<2x1xf32> to vector<2x512xf32>
    %736 = vector.broadcast %0 : vector<1x512xf32> to vector<2x512xf32>
    %737 = arith.mulf %735, %736 : vector<2x512xf32>
    %738 = vector.broadcast %1 : vector<1x512xf32> to vector<2x512xf32>
    %739 = arith.addf %737, %738 : vector<2x512xf32>
    %cst_182 = arith.constant dense<0.000000e+00> : vector<2x512xf32>
    %740 = tpu.matmul %705, %2, %cst_182 {dimension_numbers = #tpu.dot_dimension_numbers<[1], [0], [0], [1], [0, 0, 1, 1], [], []>} : vector<2x128xbf16>, vector<128x512xbf16>, vector<2x512xf32> -> vector<2x512xf32>
    %741 = arith.addf %739, %740 : vector<2x512xf32>
    %742 = vector.extract_strided_slice %741 {offsets = [0, 0], sizes = [2, 128], strides = [1, 1]} : vector<2x512xf32> to vector<2x128xf32>
    %cst_183 = arith.constant 5.000000e-01 : f32
    %743 = vector.broadcast %cst_183 : f32 to vector<2x128xf32>
    %744 = arith.mulf %743, %742 : vector<2x128xf32>
    %745 = math.tanh %744 : vector<2x128xf32>
    %cst_184 = arith.constant 5.000000e-01 : f32
    %746 = vector.broadcast %cst_184 : f32 to vector<2x128xf32>
    %747 = arith.mulf %746, %745 : vector<2x128xf32>
    %cst_185 = arith.constant 5.000000e-01 : f32
    %748 = vector.broadcast %cst_185 : f32 to vector<2x128xf32>
    %749 = arith.addf %747, %748 : vector<2x128xf32>
    %750 = vector.extract_strided_slice %741 {offsets = [0, 128], sizes = [2, 128], strides = [1, 1]} : vector<2x512xf32> to vector<2x128xf32>
    %cst_186 = arith.constant 5.000000e-01 : f32
    %751 = vector.broadcast %cst_186 : f32 to vector<2x128xf32>
    %752 = arith.mulf %751, %750 : vector<2x128xf32>
    %753 = math.tanh %752 : vector<2x128xf32>
    %cst_187 = arith.constant 5.000000e-01 : f32
    %754 = vector.broadcast %cst_187 : f32 to vector<2x128xf32>
    %755 = arith.mulf %754, %753 : vector<2x128xf32>
    %cst_188 = arith.constant 5.000000e-01 : f32
    %756 = vector.broadcast %cst_188 : f32 to vector<2x128xf32>
    %757 = arith.addf %755, %756 : vector<2x128xf32>
    %758 = vector.extract_strided_slice %741 {offsets = [0, 256], sizes = [2, 128], strides = [1, 1]} : vector<2x512xf32> to vector<2x128xf32>
    %759 = math.tanh %758 : vector<2x128xf32>
    %760 = vector.extract_strided_slice %741 {offsets = [0, 384], sizes = [2, 128], strides = [1, 1]} : vector<2x512xf32> to vector<2x128xf32>
    %cst_189 = arith.constant 5.000000e-01 : f32
    %761 = vector.broadcast %cst_189 : f32 to vector<2x128xf32>
    %762 = arith.mulf %761, %760 : vector<2x128xf32>
    %763 = math.tanh %762 : vector<2x128xf32>
    %cst_190 = arith.constant 5.000000e-01 : f32
    %764 = vector.broadcast %cst_190 : f32 to vector<2x128xf32>
    %765 = arith.mulf %764, %763 : vector<2x128xf32>
    %cst_191 = arith.constant 5.000000e-01 : f32
    %766 = vector.broadcast %cst_191 : f32 to vector<2x128xf32>
    %767 = arith.addf %765, %766 : vector<2x128xf32>
    %768 = arith.mulf %757, %702 : vector<2x128xf32>
    %769 = arith.mulf %749, %759 : vector<2x128xf32>
    %770 = arith.addf %768, %769 : vector<2x128xf32>
    %771 = math.tanh %770 : vector<2x128xf32>
    %772 = arith.mulf %767, %771 : vector<2x128xf32>
    %773 = arith.truncf %772 : vector<2x128xf32> to vector<2x128xbf16>
    %cst_192 = arith.constant dense<0.000000e+00> : vector<2x4xf32>
    %774 = tpu.matmul %773, %3, %cst_192 {dimension_numbers = #tpu.dot_dimension_numbers<[1], [0], [0], [1], [0, 0, 1, 1], [], []>} : vector<2x128xbf16>, vector<128x4xbf16>, vector<2x4xf32> -> vector<2x4xf32>
    %775 = vector.broadcast %729 : vector<2x1xf32> to vector<2x4xf32>
    %776 = vector.broadcast %4 : vector<1x4xf32> to vector<2x4xf32>
    %777 = arith.mulf %775, %776 : vector<2x4xf32>
    %778 = arith.addf %774, %777 : vector<2x4xf32>
    %779 = vector.broadcast %5 : vector<1x4xf32> to vector<2x4xf32>
    %780 = arith.addf %778, %779 : vector<2x4xf32>
    %cst_193 = arith.constant 5.000000e-01 : f32
    %781 = vector.broadcast %cst_193 : f32 to vector<2x4xf32>
    %782 = arith.mulf %781, %780 : vector<2x4xf32>
    %783 = math.tanh %782 : vector<2x4xf32>
    %cst_194 = arith.constant 5.000000e-01 : f32
    %784 = vector.broadcast %cst_194 : f32 to vector<2x4xf32>
    %785 = arith.mulf %784, %783 : vector<2x4xf32>
    %cst_195 = arith.constant 5.000000e-01 : f32
    %786 = vector.broadcast %cst_195 : f32 to vector<2x4xf32>
    %787 = arith.addf %785, %786 : vector<2x4xf32>
    %788 = vector.extract_strided_slice %780 {offsets = [0, 2], sizes = [2, 1], strides = [1, 1]} : vector<2x4xf32> to vector<2x1xf32>
    %789 = math.tanh %788 : vector<2x1xf32>
    %790 = vector.extract_strided_slice %787 {offsets = [0, 1], sizes = [2, 1], strides = [1, 1]} : vector<2x4xf32> to vector<2x1xf32>
    %791 = arith.mulf %790, %726 : vector<2x1xf32>
    %792 = vector.extract_strided_slice %787 {offsets = [0, 0], sizes = [2, 1], strides = [1, 1]} : vector<2x4xf32> to vector<2x1xf32>
    %793 = arith.mulf %792, %789 : vector<2x1xf32>
    %794 = arith.addf %791, %793 : vector<2x1xf32>
    %795 = vector.extract_strided_slice %787 {offsets = [0, 3], sizes = [2, 1], strides = [1, 1]} : vector<2x4xf32> to vector<2x1xf32>
    %796 = math.tanh %794 : vector<2x1xf32>
    %797 = arith.mulf %795, %796 : vector<2x1xf32>
    %c11_i32 = arith.constant 11 : i32
    %798 = vector.broadcast %c11_i32 : i32 to vector<2x128xi32>
    %799 = arith.cmpi eq, %18, %798 : vector<2x128xi32>
    %800 = vector.shape_cast %797 : vector<2x1xf32> to vector<2x1xf32>
    %801 = vector.broadcast %800 : vector<2x1xf32> to vector<2x128xf32>
    %802 = arith.select %799, %801, %734 : vector<2x128xi1>, vector<2x128xf32>
    %c0_196 = arith.constant 0 : index
    %c0_197 = arith.constant 0 : index
    %803 = vector.load %arg7[%c0_196, %c0_197] : memref<2x128xf32, #tpu.memory_space<vmem>>, vector<2x128xf32>
    tpu.vector_store %arg7[%c0_196, %c0_197], %802 {strides = array<i32>} : memref<2x128xf32, #tpu.memory_space<vmem>>, vector<2x128xf32>,
    return
  }
}

</mosaic_0001>

<bundles_post_ra>
// kernel: tpu_custom_call.1
= control target key start
LH: loop header
LB: loop body
LE: loop exit
PB: predicated region body
PF: predicated region fallthrough
CT: control target
= control target key end

     0   :  { %12 = vsyncpa [#allocation4], 0  ;;  %s4839_s0 = inlined_call_operand.vmem [shape: f32[16,1], index: 0, kind: input, shape index: {}]   ;;  %s4840_s1 = inlined_call_operand.hbm [shape: bf16[128,512], index: 1, kind: input, shape index: {}]   ;;  %s4841_s2 = inlined_call_operand.vmem [shape: f32[1,512], index: 2, kind: input, shape index: {}]   ;;  %s4842_s3 = inlined_call_operand.vmem [shape: f32[1,512], index: 3, kind: input, shape index: {}]   ;;  %s4843_s4 = inlined_call_operand.vmem [shape: bf16[128,4], index: 4, kind: input, shape index: {}]   ;;  %s4844_s5 = inlined_call_operand.vmem [shape: f32[1,4], index: 5, kind: input, shape index: {}]   ;;  %s4845_s6 = inlined_call_operand.vmem [shape: f32[1,4], index: 6, kind: input, shape index: {}]   ;;  %s4846_s7 = inlined_call_operand.hbm [shape: f32[2,128], index: 7, kind: output, shape index: {}]  }
   0x1   :  { %13 = vsyncpa [#allocation5], 0  ;;  %s3482_s24 = smov [#allocation3]  }
   0x2   :  { %s21_s25 = sshll.u32 %s3482_s24, 4  ;;  %s22_s25 = int_to_ptr.vmem [resolvable:$true] %s21_s25 }
   0x3   :  { %s3446_s26 = scalar_lea.vmem %s22_s25, 4096  ;;  %p3451_p1 = scmp.lt.s32.totalorder %s22_s25, %s22_s25 }
   0x4   :  { %p3447_p0 = scmp.ne.s32.totalorder %s22_s25, %s3446_s26  ;;  %p3452_p2 = scmp.lt.s32.totalorder %s3446_s26, %s3446_s26 }
   0x6   :  { %p3453_p3 = por %p3452_p2, %p3451_p1 }
   0x8   :  { %p3454_p4 = pnand %p3453_p3, %p3447_p0 }
   0xa   :  { %3457 = shalt.err (!%p3454_p4)
}
   0xb   :  { %s3483_s27 = smov 256   ;;  %s3484_s28 = smov 16  }
   0xc   :  { %27 = dma.hbm_to_vmem [thread:$0]  %s4840_s1, 4096, %s22_s25, [#allocation4], %s3483_s27, %s3483_s27, %s3484_s28  }
   0xd   :  { %3478 = dma.done.wait [#allocation4], 4096  }
   0xe   :  { %3479 = vsyncadd [#allocation4], 4294963200  ;;  %v4850_v0 = vmov 0   ;;  %v3539_v1 = vld [vmem:[#allocation3 + $0xe4] ss:$16 sps:$4 sm:$0xff]   ;;  %v3660_v34 = vld [vmem:[%s4843_s4 + $0x38] sm:$0xff]   ;;  %v4847_v39 = vlaneseq }
   0xf   :  { %370 = vmatprep.mubr.bf16.mxu0 %v4850_v0  ;;  %411 = vmatprep.mubr.bf16.mxu1 %v4850_v0  ;;  %v3541_v2 = vld [vmem:[#allocation3 + $0xec] ss:$16 sps:$4 sm:$0xff]   ;;  %v3544_v3 = vld [vmem:[#allocation3 + $0xe0] ss:$16 sps:$4 sm:$0xff]   ;;  %v3546_v4 = vld [vmem:[#allocation3 + $0xe8] ss:$16 sps:$4 sm:$0xff]  }
  0x10   :  { %3101 = vset.pattern.permute.xlu0 %v4850_v0  ;;  %338 = vmatprep.subr.bf16.mxu0 %v3539_v1  ;;  %v3549_v5 = vld [vmem:[#allocation3 + $0xc4] ss:$16 sps:$4 sm:$0xff]   ;;  %v3553_v6 = vld [vmem:[#allocation3 + $0xcc] ss:$16 sps:$4 sm:$0xff]   ;;  %v3555_v7 = vld [vmem:[#allocation3 + $0xc0] ss:$16 sps:$4 sm:$0xff]  }
  0x11   :  { %379 = vmatprep.subr.bf16.mxu1 %v3541_v2  ;;  %339 = vmatpush1.bf16.msra.mxu0 %v3544_v3  ;;  %v3558_v8 = vld [vmem:[#allocation3 + $0xc8] ss:$16 sps:$4 sm:$0xff]   ;;  %v3561_v9 = vld [vmem:[#allocation3 + $0xa4] ss:$16 sps:$4 sm:$0xff]   ;;  %v3563_v10 = vld [vmem:[#allocation3 + $0xac] ss:$16 sps:$4 sm:$0xff]  }
  0x12   :  { %380 = vmatpush1.bf16.msra.mxu1 %v3546_v4  ;;  %340 = vmatprep.subr.bf16.mxu0 %v3549_v5  ;;  %v3565_v11 = vld [vmem:[#allocation3 + $0xa0] ss:$16 sps:$4 sm:$0xff]   ;;  %v3567_v12 = vld [vmem:[#allocation3 + $0xa8] ss:$16 sps:$4 sm:$0xff]   ;;  %v3571_v13 = vld [vmem:[#allocation3 + $0x84] ss:$16 sps:$4 sm:$0xff]  }
  0x13   :  { %381 = vmatprep.subr.bf16.mxu1 %v3553_v6  ;;  %v3575_v14 = vld [vmem:[#allocation3 + $0x8c] ss:$16 sps:$4 sm:$0xff]   ;;  %v3577_v15 = vld [vmem:[#allocation3 + $0x80] ss:$16 sps:$4 sm:$0xff]   ;;  %v3581_v16 = vld [vmem:[#allocation3 + $0x88] ss:$16 sps:$4 sm:$0xff]  }
  0x14   :  { %v3583_v17 = vld [vmem:[#allocation3 + $0x64] ss:$16 sps:$4 sm:$0xff]   ;;  %v3587_v18 = vld [vmem:[#allocation3 + $0x6c] ss:$16 sps:$4 sm:$0xff]   ;;  %v3589_v19 = vld [vmem:[#allocation3 + $0x60] ss:$16 sps:$4 sm:$0xff]  }
  0x15   :  { %341 = vmatpush1.bf16.msra.mxu0 %v3555_v7  ;;  %v3591_v20 = vld [vmem:[#allocation3 + $0x68] ss:$16 sps:$4 sm:$0xff]   ;;  %v3595_v21 = vld [vmem:[#allocation3 + $0x44] ss:$16 sps:$4 sm:$0xff]   ;;  %v3599_v22 = vld [vmem:[#allocation3 + $0x4c] ss:$16 sps:$4 sm:$0xff]  }
  0x16   :  { %382 = vmatpush1.bf16.msra.mxu1 %v3558_v8  ;;  %342 = vmatprep.subr.bf16.mxu0 %v3561_v9  ;;  %v3603_v23 = vld [vmem:[#allocation3 + $0x40] ss:$16 sps:$4 sm:$0xff]   ;;  %v3605_v24 = vld [vmem:[#allocation3 + $0x48] ss:$16 sps:$4 sm:$0xff]   ;;  %v3609_v25 = vld [vmem:[#allocation3 + $0x24] ss:$16 sps:$4 sm:$0xff]  }
  0x17   :  { %383 = vmatprep.subr.bf16.mxu1 %v3563_v10  ;;  %v3611_v26 = vld [vmem:[#allocation3 + $0x2c] ss:$16 sps:$4 sm:$0xff]   ;;  %v94_v27 = vld [vmem:[%s4839_s0] sm:$0xff]  ;;  %v3618_v29 = vld [vmem:[#allocation3 + $0x28] ss:$16 sps:$4 sm:$0xff]   ;;  %v4848_v35 = vmov 0.0  }
  0x18   :  { %v3616_v28 = vld [vmem:[#allocation3 + $0x20] ss:$16 sps:$4 sm:$0xff]   ;;  %98 = vperm.xlu0 %3101, %v94_v27   ;;  %v3620_v30 = vld [vmem:[#allocation3 + $0x4] ss:$16 sps:$4 sm:$0xff]   ;;  %v3622_v31 = vld [vmem:[#allocation3 + $0xc] ss:$16 sps:$4 sm:$0xff]  }
  0x19   :  { %343 = vmatpush1.bf16.msra.mxu0 %v3565_v11  ;;  %v3630_v32 = vld [vmem:[#allocation3] ss:$16 sps:$4 sm:$0xff]   ;;  %v3632_v33 = vld [vmem:[#allocation3 + $0x8] ss:$16 sps:$4 sm:$0xff]   ;;  %v108_v41 = vshrl.u32 %v4847_v39, 7  ;;  %vm3487_vm0 = vmmov 0  }
  0x1a   :  { %384 = vmatpush1.bf16.msra.mxu1 %v3567_v12  ;;  %344 = vmatprep.subr.bf16.mxu0 %v3571_v13  ;;  %v3669_v36 = vld [vmem:[%s4843_s4 + $0x30] sm:$0xff]   ;;  %v3676_v37 = vld [vmem:[%s4843_s4 + $0x28] sm:$0xff]   ;;  %v3683_v38 = vld [vmem:[%s4843_s4 + $0x20] sm:$0xff]   ;;  %s3488_s1 = smov 126   ;;  %s3489_s8 = smov 1  }
  0x1b   :  { %385 = vmatprep.subr.bf16.mxu1 %v3575_v14  ;;  %v3690_v40 = vld [vmem:[%s4843_s4 + $0x18] sm:$0xff]   ;;  %v3698_v42 = vld [vmem:[%s4843_s4 + $0x10] sm:$0xff]   ;;  %v109_v43 = vsub.s32 0, %v108_v41  ;;  %v3705_v44 = vld [vmem:[%s4843_s4 + $0x8] sm:$0xff]   ;;  %v113_v45 = vsub.s32 1, %v108_v41  ;;  %v117_v46 = vsub.s32 2, %v108_v41 }
  0x1c   :  { %v121_v47 = vsub.s32 3, %v108_v41  ;;  %v42_v48 = vld [vmem:[%s4841_s2] sm:$0xf]  ;;  %s3491_s9 = smov 2  }
  0x1d   :  { %345 = vmatpush1.bf16.msra.mxu0 %v3577_v15  ;;  %v43_v49 = vld [vmem:[%s4842_s3] sm:$0xf]  ;;  %v3715_v50 = vrot.slane %v42_v48, %v109_v43  ;;  %v3722_v52 = vrot.slane %v42_v48, %v113_v45  ;;  %v3724_v53 = vrot.slane %v42_v48, %v117_v46 }
  0x1e   :  { %386 = vmatpush1.bf16.msra.mxu1 %v3581_v16  ;;  %346 = vmatprep.subr.bf16.mxu0 %v3583_v17  ;;  %v3720_v51 = vld [vmem:[%s4843_s4] sm:$0xff]   ;;  %v3726_v54 = vrot.slane %v42_v48, %v121_v47  ;;  %v3731_v55 = vrot.slane %v43_v49, %v109_v43  ;;  %v3733_v56 = vrot.slane %v43_v49, %v113_v45 }
  0x1f   :  { %387 = vmatprep.subr.bf16.mxu1 %v3587_v18  ;;  %4903 = vst [vmem:[#allocation9_spill] sm:$0xff] %v3715_v50  ;;  %4904 = vst [vmem:[#allocation10_spill] sm:$0xff] %v3722_v52  ;;  %v3735_v57 = vrot.slane %v43_v49, %v117_v46  ;;  %v3737_v58 = vrot.slane %v43_v49, %v121_v47 }
  0x20   :  { %4905 = vst [vmem:[#allocation11_spill] sm:$0xff] %v3724_v53  ;;  %4906 = vst [vmem:[#allocation12_spill] sm:$0xff] %v3726_v54 }
  0x21   :  { %347 = vmatpush1.bf16.msra.mxu0 %v3589_v19  ;;  %4907 = vst [vmem:[#allocation13_spill] sm:$0xff] %v3731_v55  ;;  %4908 = vst [vmem:[#allocation14_spill] sm:$0xff] %v3733_v56 }
  0x22   :  { %388 = vmatpush1.bf16.msra.mxu1 %v3591_v20  ;;  %348 = vmatprep.subr.bf16.mxu0 %v3595_v21  ;;  %4909 = vst [vmem:[#allocation15_spill] sm:$0xff] %v3735_v57  ;;  %4910 = vst [vmem:[#allocation16_spill] sm:$0xff] %v3737_v58 }
  0x23   :  { %389 = vmatprep.subr.bf16.mxu1 %v3599_v22 }
  0x25   :  { %349 = vmatpush1.bf16.msra.mxu0 %v3603_v23 }
  0x26   :  { %390 = vmatpush1.bf16.msra.mxu1 %v3605_v24  ;;  %350 = vmatprep.subr.bf16.mxu0 %v3609_v25 }
  0x27   :  { %391 = vmatprep.subr.bf16.mxu1 %v3611_v26 }
  0x29   :  { %351 = vmatpush1.bf16.msra.mxu0 %v3616_v28 }
  0x2a   :  { %392 = vmatpush1.bf16.msra.mxu1 %v3618_v29  ;;  %352 = vmatprep.subr.bf16.mxu0 %v3620_v30 }
  0x2b   :  { %393 = vmatprep.subr.bf16.mxu1 %v3622_v31 }
  0x2d   :  { %353 = vmatpush1.bf16.msra.mxu0 %v3630_v32 }
  0x2e   :  { %394 = vmatpush1.bf16.msra.mxu1 %v3632_v33  ;;  %2850 = vmatprep.subr.bf16.mxu0 %v4848_v35 }
  0x2f   :  { %578 = vmatprep.subr.bf16.mxu1 %v3539_v1 }
  0x30   :  { %371 = vmatmul.mubr.bf16.vlgmr.msra.gmra.mxu0 %v4850_v0 }
  0x31   :  { %412 = vmatmul.mubr.bf16.vlgmr.msra.gmra.mxu1 %v4850_v0  ;;  %2851 = vmatpush3.bf16.msra.mxu0 %v3660_v34 }
  0x32   :  { %579 = vmatpush1.bf16.msra.mxu1 %v3544_v3  ;;  %610 = vmatprep.mubr.bf16.mxu1 %v4850_v0 }
  0x33   :  { %580 = vmatprep.subr.bf16.mxu1 %v3549_v5  ;;  %2852 = vmatprep.subr.bf16.mxu0 %v4848_v35 }
  0x34   :  { %2866 = vmatprep.mubr.msk.bf16.mxu0 %vm3487_vm0, %v4848_v35 }
  0x35   :  { %2853 = vmatpush3.bf16.msra.mxu0 %v3669_v36 }
  0x36   :  { %581 = vmatpush1.bf16.msra.mxu1 %v3555_v7  ;;  %2854 = vmatprep.subr.bf16.mxu0 %v4848_v35 }
  0x37   :  { %582 = vmatprep.subr.bf16.mxu1 %v3561_v9 }
  0x39   :  { %2855 = vmatpush3.bf16.msra.mxu0 %v3676_v37 }
  0x3a   :  { %583 = vmatpush1.bf16.msra.mxu1 %v3565_v11  ;;  %2856 = vmatprep.subr.bf16.mxu0 %v4848_v35 }
  0x3b   :  { %584 = vmatprep.subr.bf16.mxu1 %v3571_v13 }
  0x3d   :  { %2857 = vmatpush3.bf16.msra.mxu0 %v3683_v38 }
  0x3e   :  { %585 = vmatpush1.bf16.msra.mxu1 %v3577_v15  ;;  %2858 = vmatprep.subr.bf16.mxu0 %v4848_v35 }
  0x3f   :  { %586 = vmatprep.subr.bf16.mxu1 %v3583_v17 }
  0x41   :  { %2859 = vmatpush3.bf16.msra.mxu0 %v3690_v40 }
  0x42   :  { %587 = vmatpush1.bf16.msra.mxu1 %v3589_v19  ;;  %2860 = vmatprep.subr.bf16.mxu0 %v4848_v35 }
  0x43   :  { %588 = vmatprep.subr.bf16.mxu1 %v3595_v21 }
  0x45   :  { %2861 = vmatpush3.bf16.msra.mxu0 %v3698_v42 }
  0x46   :  { %589 = vmatpush1.bf16.msra.mxu1 %v3603_v23  ;;  %2862 = vmatprep.subr.bf16.mxu0 %v4848_v35 }
  0x47   :  { %590 = vmatprep.subr.bf16.mxu1 %v3609_v25 }
  0x49   :  { %2863 = vmatpush3.bf16.msra.mxu0 %v3705_v44 }
  0x4a   :  { %591 = vmatpush1.bf16.msra.mxu1 %v3616_v28  ;;  %2864 = vmatprep.subr.bf16.mxu0 %v4848_v35 }
  0x4b   :  { %592 = vmatprep.subr.bf16.mxu1 %v3620_v30 }
  0x4d   :  { %2865 = vmatpush3.bf16.msra.mxu0 %v3720_v51 }
  0x4e   :  { %593 = vmatpush1.bf16.msra.mxu1 %v3630_v32  ;;  %619 = vmatprep.subr.bf16.mxu0 %v3541_v2 }
  0x4f   :  { %2870 = vmatprep.subr.bf16.mxu1 %v4848_v35 }
  0x93   :  { %v99_v59 = vpop.permute.xlu0 %98 }
  0x94   :  { %v127_v60 = vmul.f32 %v3715_v50, %v99_v59  ;;  %v128_v61 = vmul.f32 %v3722_v52, %v99_v59  ;;  %v129_v62 = vmul.f32 %v3724_v53, %v99_v59  ;;  %v130_v63 = vmul.f32 %v3726_v54, %v99_v59 }
  0x96   :  { %v156_v27 = vadd.f32 %v3731_v55, %v127_v60  ;;  %v157_v41 = vadd.f32 %v3733_v56, %v128_v61  ;;  %v158_v43 = vadd.f32 %v3735_v57, %v129_v62  ;;  %v159_v45 = vadd.f32 %v3737_v58, %v130_v63 }
  0x98   :  { %164 = vst [vmem:[#allocation2 + $0x30] sm:$0xff] %v156_v27  ;;  %165 = vst [vmem:[#allocation2] sm:$0xff] %v157_v41 }
  0x99   :  { %166 = vst [vmem:[#allocation2 + $0x18] sm:$0xff] %v158_v43  ;;  %167 = vst [vmem:[#allocation2 + $0x10] sm:$0xff] %v159_v45 }
  0x9f   :  { %v174_v46 = vld [vmem:[#allocation2 + $0x30] sm:$0x3]  ;;  %v175_v49 = vld [vmem:[#allocation2] sm:$0x3] }
  0xa0   :  { %v176_v60 = vld [vmem:[#allocation2 + $0x18] sm:$0x3]  ;;  %v177_v41 = vld [vmem:[#allocation2 + $0x10] sm:$0x3] }
  0xf0   :  { %v372_v47 = vpop.f32.mrf.mxu0 }
  0xf1   :  { %v413_v48 = vpop.f32.mrf.mxu1  ;;  %v420_v39 = vadd.f32 %v372_v47, %v174_v46 }
  0xf2   :  { %v374_v35 = vpop.f32.mrf.mxu0  ;;  %v422_v27 = vadd.f32 %v413_v48, %v176_v60 }
  0xf3   :  { %v415_v0 = vpop.f32.mrf.mxu1  ;;  %v424_v59 = vmul.f32 0.5, %v420_v39  ;;  %v421_v54 = vadd.f32 %v374_v35, %v175_v49 }
  0xf4   :  { %v376_v55 = vpop.f32.mrf.mxu0  ;;  %v423_v43 = vadd.f32 %v415_v0, %v177_v41 }
  0xf5   :  { %v417_v61 = vpop.f32.mrf.mxu1  ;;  %3162 = vtanh.f32 %v424_v59  ;;  %v428_v62 = vmul.f32 0.5, %v421_v54 }
  0xf6   :  { %v377_v57 = vpop.f32.mrf.mxu0  ;;  %v433_v45 = vmul.f32 0.5, %v423_v43 }
  0xf7   :  { %v418_v63 = vpop.f32.mrf.mxu1  ;;  %3164 = vtanh.f32 %v428_v62 }
  0xf8   :  { %3166 = vtanh.f32 %v422_v27  ;;  %v3812_v63 = vld [vmem:[%s4845_s6] ss:$0 sm:$0xff] }
  0xf9   :  { %3168 = vtanh.f32 %v433_v45  ;;  %4914 = vst [vmem:[#allocation18_spill] sm:$0xff] %v3812_v63 }
 0x102   :  { %v3163_v58 = vpop.eup %3162 }
 0x103   :  { %v426_v56 = vmul.f32 0.5, %v3163_v58  ;;  %v3806_v58 = vld [vmem:[%s4844_s5] ss:$0 sm:$0xff] }
 0x104   :  { %v3165_v46 = vpop.eup %3164  ;;  %4913 = vst [vmem:[#allocation17_spill] sm:$0xff] %v3806_v58  ;;  %v449_v62 = vmul.f32 0.0, %v3806_v58 }
 0x105   :  { %v427_v47 = vadd.f32 0.5, %v426_v56  ;;  %v430_v53 = vmul.f32 0.5, %v3165_v46  ;;  %v3167_v39 = vpop.eup %3166  ;;  %v4911_v56 = vmov 0  }
 0x106   :  { %v3169_v54 = vpop.eup %3168 }
 0x107   :  { %v431_v35 = vadd.f32 0.5, %v430_v53  ;;  %v438_v49 = vmul.f32 %v3167_v39, %v427_v47  ;;  %v435_v57 = vmul.f32 0.5, %v3169_v54  ;;  %v4912_v53 = vmov 0.0  }
 0x109   :  { %v437_v55 = vmul.f32 0.0, %v431_v35  ;;  %v436_v48 = vadd.f32 0.5, %v435_v57 }
 0x10b   :  { %v3748_v59 = vadd.f32 %v438_v49, %v437_v55 }
 0x10d   :  { %3170 = vtanh.f32 %v3748_v59 }
 0x11a   :  { %v3171_v60 = vpop.eup %3170 }
 0x11b   :  { %v441_v0 = vmul.f32 %v3171_v60, %v436_v48  ;;  %v575_v60 = vld [vmem:[#allocation2] sm:$0xc] }
 0x11d   :  { %v442_v61 = vpack.c.bf16 %v441_v0, %v441_v0 }
 0x11f   :  { %2867 = vmatmul.mubr.bf16.vlgmr.msra.gmra.mxu0 %v442_v61  ;;  %611 = vmatmul.mubr.bf16.vlgmr.msra.gmra.mxu1 %v442_v61 }
 0x120   :  { %620 = vmatpush1.bf16.msra.mxu0 %v3546_v4  ;;  %651 = vmatprep.mubr.bf16.mxu0 %v4911_v56 }
 0x121   :  { %621 = vmatprep.subr.bf16.mxu0 %v3553_v6  ;;  %2871 = vmatpush3.bf16.msra.mxu1 %v3660_v34 }
 0x122   :  { %2872 = vmatprep.subr.bf16.mxu1 %v4912_v53  ;;  %2886 = vmatprep.mubr.msk.bf16.mxu1 %vm3487_vm0, %v4912_v53 }
 0x124   :  { %622 = vmatpush1.bf16.msra.mxu0 %v3558_v8 }
 0x125   :  { %623 = vmatprep.subr.bf16.mxu0 %v3563_v10  ;;  %2873 = vmatpush3.bf16.msra.mxu1 %v3669_v36 }
 0x126   :  { %2874 = vmatprep.subr.bf16.mxu1 %v4912_v53 }
 0x128   :  { %624 = vmatpush1.bf16.msra.mxu0 %v3567_v12 }
 0x129   :  { %625 = vmatprep.subr.bf16.mxu0 %v3575_v14  ;;  %2875 = vmatpush3.bf16.msra.mxu1 %v3676_v37 }
 0x12a   :  { %2876 = vmatprep.subr.bf16.mxu1 %v4912_v53 }
 0x12c   :  { %626 = vmatpush1.bf16.msra.mxu0 %v3581_v16 }
 0x12d   :  { %627 = vmatprep.subr.bf16.mxu0 %v3587_v18  ;;  %2877 = vmatpush3.bf16.msra.mxu1 %v3683_v38 }
 0x12e   :  { %2878 = vmatprep.subr.bf16.mxu1 %v4912_v53 }
 0x130   :  { %628 = vmatpush1.bf16.msra.mxu0 %v3591_v20 }
 0x131   :  { %629 = vmatprep.subr.bf16.mxu0 %v3599_v22  ;;  %2879 = vmatpush3.bf16.msra.mxu1 %v3690_v40 }
 0x132   :  { %2880 = vmatprep.subr.bf16.mxu1 %v4912_v53 }
 0x134   :  { %630 = vmatpush1.bf16.msra.mxu0 %v3605_v24 }
 0x135   :  { %631 = vmatprep.subr.bf16.mxu0 %v3611_v26  ;;  %2881 = vmatpush3.bf16.msra.mxu1 %v3698_v42 }
 0x136   :  { %2882 = vmatprep.subr.bf16.mxu1 %v4912_v53 }
 0x138   :  { %632 = vmatpush1.bf16.msra.mxu0 %v3618_v29 }
 0x139   :  { %633 = vmatprep.subr.bf16.mxu0 %v3622_v31  ;;  %2883 = vmatpush3.bf16.msra.mxu1 %v3705_v44 }
 0x13a   :  { %2884 = vmatprep.subr.bf16.mxu1 %v4912_v53 }
 0x13c   :  { %634 = vmatpush1.bf16.msra.mxu0 %v3632_v33 }
 0x13d   :  { %776 = vmatprep.subr.bf16.mxu0 %v3539_v1  ;;  %2885 = vmatpush3.bf16.msra.mxu1 %v3720_v51 }
 0x13e   :  { %817 = vmatprep.subr.bf16.mxu1 %v3541_v2 }
 0x13f   :  { %652 = vmatmul.mubr.bf16.vlgmr.msra.gmra.mxu0 %v442_v61  ;;  %v574_v61 = vld [vmem:[#allocation2 + $0x30] sm:$0xc] }
 0x140   :  { %777 = vmatpush1.bf16.msra.mxu0 %v3544_v3  ;;  %808 = vmatprep.mubr.bf16.mxu0 %v4911_v56 }
 0x141   :  { %778 = vmatprep.subr.bf16.mxu0 %v3549_v5 }
 0x144   :  { %779 = vmatpush1.bf16.msra.mxu0 %v3555_v7 }
 0x145   :  { %780 = vmatprep.subr.bf16.mxu0 %v3561_v9 }
 0x148   :  { %781 = vmatpush1.bf16.msra.mxu0 %v3565_v11 }
 0x149   :  { %782 = vmatprep.subr.bf16.mxu0 %v3571_v13 }
 0x14c   :  { %783 = vmatpush1.bf16.msra.mxu0 %v3577_v15 }
 0x14d   :  { %784 = vmatprep.subr.bf16.mxu0 %v3583_v17 }
 0x150   :  { %785 = vmatpush1.bf16.msra.mxu0 %v3589_v19 }
 0x151   :  { %786 = vmatprep.subr.bf16.mxu0 %v3595_v21 }
 0x154   :  { %787 = vmatpush1.bf16.msra.mxu0 %v3603_v23 }
 0x155   :  { %788 = vmatprep.subr.bf16.mxu0 %v3609_v25 }
 0x158   :  { %789 = vmatpush1.bf16.msra.mxu0 %v3616_v28 }
 0x159   :  { %790 = vmatprep.subr.bf16.mxu0 %v3620_v30 }
 0x15c   :  { %791 = vmatpush1.bf16.msra.mxu0 %v3630_v32 }
 0x15d   :  { %2890 = vmatprep.subr.bf16.mxu0 %v4912_v53 }
 0x1df   :  { %v532_v27 = vpop.f32.mrf.mxu0  ;;  %v612_v41 = vpop.f32.mrf.mxu1 }
 0x1e0   :  { %v533_v43 = vadd.f32 %v532_v27, %v449_v62  ;;  %v664_v57 = vrot.slane %v612_v41, 6  ;;  %v577_v41 = vld [vmem:[#allocation2 + $0x10] sm:$0xc] }
 0x1e1   :  { %v2868_v45 = vpop.f32.mrf.mxu0  ;;  %v614_v46 = vpop.f32.mrf.mxu1 }
 0x1e2   :  { %v3815_v47 = vadd.f32 %v3812_v63, %v533_v43  ;;  %v665_v54 = vrot.slane %v614_v46, 6  ;;  %v672_v62 = vadd.f32 %v664_v57, %v574_v61  ;;  %v690_v61 = vrot.slane %v3748_v59, 6 }
 0x1e3   :  { %v535_v35 = vpop.f32.mrf.mxu0  ;;  %v616_v39 = vpop.f32.mrf.mxu1 }
 0x1e4   :  { %3172 = vtanh.f32 %v3815_v47  ;;  %v673_v0 = vadd.f32 %v665_v54, %v575_v60  ;;  %v676_v45 = vmul.f32 0.5, %v672_v62  ;;  %v576_v39 = vld [vmem:[#allocation2 + $0x18] sm:$0xc]  ;;  %v545_v59 = vmul.f32 0.5, %v3815_v47 }
 0x1e5   :  { %v2869_v55 = vpop.f32.mrf.mxu0  ;;  %v617_v49 = vpop.f32.mrf.mxu1 }
 0x1e6   :  { %v680_v27 = vmul.f32 0.5, %v673_v0 }
 0x1e8   :  { %3174 = vtanh.f32 %v680_v27 }
 0x1e9   :  { %3176 = vtanh.f32 %v676_v45 }
 0x1f1   :  { %v3173_v48 = vpop.eup %3172 }
 0x1f2   :  { %552 = vrot.lane.b32.xlu0 %v3173_v48, %s3488_s1 }
 0x1f5   :  { %v3175_v60 = vpop.eup %3174 }
 0x1f6   :  { %v3177_v63 = vpop.eup %3176  ;;  %v682_v48 = vmul.f32 0.5, %v3175_v60 }
 0x1f7   :  { %v678_v57 = vmul.f32 0.5, %v3177_v63 }
 0x1f8   :  { %v683_v0 = vadd.f32 0.5, %v682_v48 }
 0x1f9   :  { %v679_v62 = vadd.f32 0.5, %v678_v57 }
 0x1fa   :  { %v692_v45 = vmul.f32 %v690_v61, %v683_v0  ;;  %v4872_v61 = vmov 3  }
 0x1fb   :  { %3102 = vset.pattern.permute.xlu0 %v4872_v61  ;;  %3103 = vset.pattern.permute.xlu1 %v4872_v61 }
 0x1ff   :  { %v653_v43 = vpop.f32.mrf.mxu0 }
 0x200   :  { %v666_v35 = vrot.slane %v653_v43, 6 }
 0x201   :  { %v655_v52 = vpop.f32.mrf.mxu0 }
 0x202   :  { %v674_v55 = vadd.f32 %v666_v35, %v576_v39  ;;  %v667_v49 = vrot.slane %v655_v52, 6 }
 0x203   :  { %v657_v46 = vpop.f32.mrf.mxu0 }
 0x204   :  { %3178 = vtanh.f32 %v674_v55  ;;  %v675_v54 = vadd.f32 %v667_v49, %v577_v41 }
 0x205   :  { %v658_v50 = vpop.f32.mrf.mxu0 }
 0x206   :  { %v685_v58 = vmul.f32 0.5, %v675_v54 }
 0x208   :  { %3180 = vtanh.f32 %v685_v58 }
 0x211   :  { %v3179_v27 = vpop.eup %3178 }
 0x212   :  { %v693_v43 = vmul.f32 %v3179_v27, %v679_v62 }
 0x214   :  { %v3820_v35 = vadd.f32 %v693_v43, %v692_v45 }
 0x215   :  { %v3181_v52 = vpop.eup %3180 }
 0x216   :  { %3182 = vtanh.f32 %v3820_v35  ;;  %v687_v50 = vmul.f32 0.5, %v3181_v52 }
 0x217   :  { %3184 = vtanh.f32 %v545_v59  ;;  %v773_v59 = vld [vmem:[#allocation2] sm:$0x30] }
 0x218   :  { %v688_v39 = vadd.f32 0.5, %v687_v50 }
 0x223   :  { %v3183_v55 = vpop.eup %3182 }
 0x224   :  { %v696_v49 = vmul.f32 %v3183_v55, %v688_v39  ;;  %v3185_v58 = vpop.eup %3184 }
 0x225   :  { %v547_v63 = vmul.f32 0.5, %v3185_v58 }
 0x226   :  { %v697_v46 = vpack.c.bf16 %v696_v49, %v696_v49 }
 0x227   :  { %v3872_v47 = vadd.f32 0.5, %v547_v63  ;;  %v772_v63 = vld [vmem:[#allocation2 + $0x30] sm:$0x30] }
 0x228   :  { %v700_v41 = vrot.slane %v697_v46, 1 }
 0x229   :  { %v550_v48 = vmul.f32 0.0, %v3872_v47 }
 0x22a   :  { %2887 = vmatmul.mubr.bf16.vlgmr.msra.gmra.mxu1 %v700_v41  ;;  %809 = vmatmul.mubr.bf16.vlgmr.msra.gmra.mxu0 %v700_v41 }
 0x22b   :  { %818 = vmatpush1.bf16.msra.mxu1 %v3546_v4  ;;  %849 = vmatprep.mubr.bf16.mxu1 %v4911_v56 }
 0x22c   :  { %819 = vmatprep.subr.bf16.mxu1 %v3553_v6  ;;  %2891 = vmatpush3.bf16.msra.mxu0 %v3660_v34 }
 0x22d   :  { %2892 = vmatprep.subr.bf16.mxu0 %v4912_v53  ;;  %2906 = vmatprep.mubr.msk.bf16.mxu0 %vm3487_vm0, %v4912_v53 }
 0x22f   :  { %820 = vmatpush1.bf16.msra.mxu1 %v3558_v8 }
 0x230   :  { %821 = vmatprep.subr.bf16.mxu1 %v3563_v10  ;;  %2893 = vmatpush3.bf16.msra.mxu0 %v3669_v36 }
 0x231   :  { %2894 = vmatprep.subr.bf16.mxu0 %v4912_v53 }
 0x233   :  { %822 = vmatpush1.bf16.msra.mxu1 %v3567_v12 }
 0x234   :  { %823 = vmatprep.subr.bf16.mxu1 %v3575_v14  ;;  %2895 = vmatpush3.bf16.msra.mxu0 %v3676_v37 }
 0x235   :  { %2896 = vmatprep.subr.bf16.mxu0 %v4912_v53 }
 0x237   :  { %824 = vmatpush1.bf16.msra.mxu1 %v3581_v16 }
 0x238   :  { %825 = vmatprep.subr.bf16.mxu1 %v3587_v18  ;;  %2897 = vmatpush3.bf16.msra.mxu0 %v3683_v38 }
 0x239   :  { %2898 = vmatprep.subr.bf16.mxu0 %v4912_v53 }
 0x23b   :  { %826 = vmatpush1.bf16.msra.mxu1 %v3591_v20 }
 0x23c   :  { %827 = vmatprep.subr.bf16.mxu1 %v3599_v22  ;;  %2899 = vmatpush3.bf16.msra.mxu0 %v3690_v40 }
 0x23d   :  { %2900 = vmatprep.subr.bf16.mxu0 %v4912_v53 }
 0x23f   :  { %828 = vmatpush1.bf16.msra.mxu1 %v3605_v24 }
 0x240   :  { %829 = vmatprep.subr.bf16.mxu1 %v3611_v26  ;;  %2901 = vmatpush3.bf16.msra.mxu0 %v3698_v42 }
 0x241   :  { %2902 = vmatprep.subr.bf16.mxu0 %v4912_v53 }
 0x243   :  { %830 = vmatpush1.bf16.msra.mxu1 %v3618_v29 }
 0x244   :  { %831 = vmatprep.subr.bf16.mxu1 %v3622_v31  ;;  %2903 = vmatpush3.bf16.msra.mxu0 %v3705_v44 }
 0x245   :  { %2904 = vmatprep.subr.bf16.mxu0 %v4912_v53 }
 0x247   :  { %832 = vmatpush1.bf16.msra.mxu1 %v3632_v33 }
 0x248   :  { %974 = vmatprep.subr.bf16.mxu1 %v3539_v1  ;;  %2905 = vmatpush3.bf16.msra.mxu0 %v3720_v51 }
 0x249   :  { %1015 = vmatprep.subr.bf16.mxu0 %v3541_v2 }
 0x24a   :  { %850 = vmatmul.mubr.bf16.vlgmr.msra.gmra.mxu1 %v700_v41 }
 0x24b   :  { %975 = vmatpush1.bf16.msra.mxu1 %v3544_v3  ;;  %1006 = vmatprep.mubr.bf16.mxu1 %v4911_v56 }
 0x24c   :  { %976 = vmatprep.subr.bf16.mxu1 %v3549_v5 }
 0x24f   :  { %977 = vmatpush1.bf16.msra.mxu1 %v3555_v7 }
 0x250   :  { %978 = vmatprep.subr.bf16.mxu1 %v3561_v9 }
 0x253   :  { %979 = vmatpush1.bf16.msra.mxu1 %v3565_v11 }
 0x254   :  { %980 = vmatprep.subr.bf16.mxu1 %v3571_v13 }
 0x257   :  { %981 = vmatpush1.bf16.msra.mxu1 %v3577_v15 }
 0x258   :  { %982 = vmatprep.subr.bf16.mxu1 %v3583_v17 }
 0x25b   :  { %983 = vmatpush1.bf16.msra.mxu1 %v3589_v19 }
 0x25c   :  { %984 = vmatprep.subr.bf16.mxu1 %v3595_v21 }
 0x25f   :  { %985 = vmatpush1.bf16.msra.mxu1 %v3603_v23 }
 0x260   :  { %986 = vmatprep.subr.bf16.mxu1 %v3609_v25 }
 0x263   :  { %987 = vmatpush1.bf16.msra.mxu1 %v3616_v28 }
 0x264   :  { %v553_v54 = vpop.permute.xlu0 %552  ;;  %988 = vmatprep.subr.bf16.mxu1 %v3620_v30 }
 0x265   :  { %v555_v60 = vmul.f32 %v553_v54, %v3872_v47 }
 0x267   :  { %557 = vrot.lane.b32.xlu1 %v555_v60, %s3489_s8  ;;  %989 = vmatpush1.bf16.msra.mxu1 %v3630_v32 }
 0x268   :  { %2910 = vmatprep.subr.bf16.mxu1 %v4912_v53 }
 0x2d9   :  { %v558_v57 = vpop.permute.xlu1 %557 }
 0x2da   :  { %v3881_v0 = vadd.f32 %v558_v57, %v550_v48 }
 0x2dc   :  { %4915 = vst [vmem:[#allocation19_spill] sm:$0xff] %v3881_v0  ;;  %3186 = vtanh.f32 %v3881_v0  ;;  %v774_v0 = vld [vmem:[#allocation2 + $0x18] sm:$0x30] }
 0x2e9   :  { %v3187_v62 = vpop.eup %3186 }
 0x2ea   :  { %v3886_v27 = vpop.f32.mrf.mxu1  ;;  %v810_v45 = vpop.f32.mrf.mxu0  ;;  %563 = vrot.lane.b32.xlu1 %v3187_v62, %s3491_s9 }
 0x2eb   :  { %4916 = vst [vmem:[#allocation20_spill] sm:$0xff] %v3886_v27  ;;  %v862_v41 = vrot.slane %v810_v45, 4 }
 0x2ec   :  { %v2888_v43 = vpop.f32.mrf.mxu1  ;;  %v812_v52 = vpop.f32.mrf.mxu0 }
 0x2ed   :  { %v863_v46 = vrot.slane %v812_v52, 4  ;;  %v870_v54 = vadd.f32 %v862_v41, %v772_v63 }
 0x2ee   :  { %v739_v50 = vpop.f32.mrf.mxu1  ;;  %v814_v39 = vpop.f32.mrf.mxu0 }
 0x2ef   :  { %v871_v58 = vadd.f32 %v863_v46, %v773_v59  ;;  %v874_v48 = vmul.f32 0.5, %v870_v54  ;;  %v775_v39 = vld [vmem:[#allocation2 + $0x10] sm:$0x30]  ;;  %v888_v54 = vrot.slane %v3820_v35, 6 }
 0x2f0   :  { %v2889_v55 = vpop.f32.mrf.mxu1  ;;  %v815_v49 = vpop.f32.mrf.mxu0 }
 0x2f1   :  { %v878_v60 = vmul.f32 0.5, %v871_v58 }
 0x2f3   :  { %3188 = vtanh.f32 %v878_v60 }
 0x2f4   :  { %3190 = vtanh.f32 %v874_v48 }
 0x300   :  { %v3189_v45 = vpop.eup %3188 }
 0x301   :  { %v3191_v49 = vpop.eup %3190  ;;  %v880_v46 = vmul.f32 0.5, %v3189_v45 }
 0x302   :  { %v876_v41 = vmul.f32 0.5, %v3191_v49 }
 0x303   :  { %v881_v58 = vadd.f32 0.5, %v880_v46 }
 0x304   :  { %v877_v63 = vadd.f32 0.5, %v876_v41 }
 0x305   :  { %v890_v48 = vmul.f32 %v888_v54, %v881_v58 }
 0x30a   :  { %v851_v57 = vpop.f32.mrf.mxu1 }
 0x30b   :  { %v864_v61 = vrot.slane %v851_v57, 4 }
 0x30c   :  { %v853_v62 = vpop.f32.mrf.mxu1 }
 0x30d   :  { %v872_v43 = vadd.f32 %v864_v61, %v774_v0  ;;  %v865_v27 = vrot.slane %v853_v62, 4 }
 0x30e   :  { %v855_v50 = vpop.f32.mrf.mxu1 }
 0x30f   :  { %3192 = vtanh.f32 %v872_v43  ;;  %v873_v52 = vadd.f32 %v865_v27, %v775_v39 }
 0x310   :  { %v856_v55 = vpop.f32.mrf.mxu1 }
 0x311   :  { %v883_v59 = vmul.f32 0.5, %v873_v52  ;;  %v973_v52 = vld [vmem:[#allocation2 + $0x10] sm:$0xc0] }
 0x313   :  { %3194 = vtanh.f32 %v883_v59 }
 0x31c   :  { %v3193_v60 = vpop.eup %3192 }
 0x31d   :  { %v891_v57 = vmul.f32 %v3193_v60, %v877_v63 }
 0x31f   :  { %v3890_v0 = vadd.f32 %v891_v57, %v890_v48 }
 0x320   :  { %v3195_v61 = vpop.eup %3194 }
 0x321   :  { %3196 = vtanh.f32 %v3890_v0  ;;  %v885_v62 = vmul.f32 0.5, %v3195_v61  ;;  %v1086_v48 = vrot.slane %v3890_v0, 6  ;;  %v3967_v0 = vld [vmem:[#allocation3 + $0xcc] ss:$16 sps:$4 sm:$0xff]  }
 0x323   :  { %v886_v27 = vadd.f32 0.5, %v885_v62 }
 0x32e   :  { %v3197_v43 = vpop.eup %3196 }
 0x32f   :  { %v894_v50 = vmul.f32 %v3197_v43, %v886_v27 }
 0x331   :  { %v895_v39 = vpack.c.bf16 %v894_v50, %v894_v50 }
 0x333   :  { %v898_v55 = vrot.slane %v895_v39, 2 }
 0x335   :  { %2907 = vmatmul.mubr.bf16.vlgmr.msra.gmra.mxu0 %v898_v55  ;;  %1007 = vmatmul.mubr.bf16.vlgmr.msra.gmra.mxu1 %v898_v55 }
 0x336   :  { %1016 = vmatpush1.bf16.msra.mxu0 %v3546_v4  ;;  %1047 = vmatprep.mubr.bf16.mxu0 %v4911_v56 }
 0x337   :  { %1017 = vmatprep.subr.bf16.mxu0 %v3553_v6  ;;  %2911 = vmatpush3.bf16.msra.mxu1 %v3660_v34 }
 0x338   :  { %2912 = vmatprep.subr.bf16.mxu1 %v4912_v53  ;;  %2926 = vmatprep.mubr.msk.bf16.mxu1 %vm3487_vm0, %v4912_v53 }
 0x33a   :  { %1018 = vmatpush1.bf16.msra.mxu0 %v3558_v8  ;;  %v4920_v8 = vld [vmem:[#allocation18_spill] sm:$0xff] }
 0x33b   :  { %1019 = vmatprep.subr.bf16.mxu0 %v3563_v10  ;;  %2913 = vmatpush3.bf16.msra.mxu1 %v3669_v36 }
 0x33c   :  { %2914 = vmatprep.subr.bf16.mxu1 %v4912_v53 }
 0x33e   :  { %1020 = vmatpush1.bf16.msra.mxu0 %v3567_v12 }
 0x33f   :  { %1021 = vmatprep.subr.bf16.mxu0 %v3575_v14  ;;  %2915 = vmatpush3.bf16.msra.mxu1 %v3676_v37 }
 0x340   :  { %2916 = vmatprep.subr.bf16.mxu1 %v4912_v53 }
 0x342   :  { %1022 = vmatpush1.bf16.msra.mxu0 %v3581_v16 }
 0x343   :  { %1023 = vmatprep.subr.bf16.mxu0 %v3587_v18  ;;  %2917 = vmatpush3.bf16.msra.mxu1 %v3683_v38 }
 0x344   :  { %2918 = vmatprep.subr.bf16.mxu1 %v4912_v53 }
 0x346   :  { %1024 = vmatpush1.bf16.msra.mxu0 %v3591_v20 }
 0x347   :  { %1025 = vmatprep.subr.bf16.mxu0 %v3599_v22  ;;  %2919 = vmatpush3.bf16.msra.mxu1 %v3690_v40 }
 0x348   :  { %2920 = vmatprep.subr.bf16.mxu1 %v4912_v53 }
 0x34a   :  { %1026 = vmatpush1.bf16.msra.mxu0 %v3605_v24 }
 0x34b   :  { %1027 = vmatprep.subr.bf16.mxu0 %v3611_v26  ;;  %2921 = vmatpush3.bf16.msra.mxu1 %v3698_v42 }
 0x34c   :  { %2922 = vmatprep.subr.bf16.mxu1 %v4912_v53 }
 0x34e   :  { %1028 = vmatpush1.bf16.msra.mxu0 %v3618_v29 }
 0x34f   :  { %1029 = vmatprep.subr.bf16.mxu0 %v3622_v31  ;;  %2923 = vmatpush3.bf16.msra.mxu1 %v3705_v44 }
 0x350   :  { %2924 = vmatprep.subr.bf16.mxu1 %v4912_v53 }
 0x352   :  { %1030 = vmatpush1.bf16.msra.mxu0 %v3632_v33 }
 0x353   :  { %1172 = vmatprep.subr.bf16.mxu0 %v3539_v1  ;;  %2925 = vmatpush3.bf16.msra.mxu1 %v3720_v51 }
 0x354   :  { %1213 = vmatprep.subr.bf16.mxu1 %v3541_v2  ;;  %v4918_v2 = vld [vmem:[#allocation17_spill] sm:$0xff] }
 0x355   :  { %1048 = vmatmul.mubr.bf16.vlgmr.msra.gmra.mxu0 %v898_v55 }
 0x356   :  { %1173 = vmatpush1.bf16.msra.mxu0 %v3544_v3  ;;  %1204 = vmatprep.mubr.bf16.mxu0 %v4911_v56 }
 0x357   :  { %1174 = vmatprep.subr.bf16.mxu0 %v3549_v5  ;;  %v4919_v5 = vld [vmem:[#allocation20_spill] sm:$0xff] }
 0x35a   :  { %1175 = vmatpush1.bf16.msra.mxu0 %v3555_v7 }
 0x35b   :  { %1176 = vmatprep.subr.bf16.mxu0 %v3561_v9 }
 0x35c   :  { %v564_v4 = vpop.permute.xlu1 %563 }
 0x35d   :  { %v566_v6 = vmul.f32 %v564_v4, %v3872_v47 }
 0x35e   :  { %1177 = vmatpush1.bf16.msra.mxu0 %v3565_v11 }
 0x35f   :  { %570 = vperm.xlu0 %3102, %v566_v6   ;;  %1178 = vmatprep.subr.bf16.mxu0 %v3571_v13 }
 0x362   :  { %1179 = vmatpush1.bf16.msra.mxu0 %v3577_v15 }
 0x363   :  { %1180 = vmatprep.subr.bf16.mxu0 %v3583_v17  ;;  %3104 = vset.pattern.permute.xlu0 %v4911_v56 }
 0x366   :  { %1181 = vmatpush1.bf16.msra.mxu0 %v3589_v19 }
 0x367   :  { %1182 = vmatprep.subr.bf16.mxu0 %v3595_v21  ;;  %v971_v21 = vld [vmem:[#allocation2] sm:$0xc0] }
 0x36a   :  { %1183 = vmatpush1.bf16.msra.mxu0 %v3603_v23  ;;  %v970_v23 = vld [vmem:[#allocation2 + $0x30] sm:$0xc0] }
 0x36b   :  { %1184 = vmatprep.subr.bf16.mxu0 %v3609_v25 }
 0x36e   :  { %1185 = vmatpush1.bf16.msra.mxu0 %v3616_v28 }
 0x36f   :  { %1186 = vmatprep.subr.bf16.mxu0 %v3620_v30  ;;  %v972_v30 = vld [vmem:[#allocation2 + $0x18] sm:$0xc0] }
 0x372   :  { %1187 = vmatpush1.bf16.msra.mxu0 %v3630_v32 }
 0x373   :  { %2930 = vmatprep.subr.bf16.mxu0 %v4912_v53 }
 0x3da   :  { %v3947_v1 = vpop.permute.xlu0 %570 }
 0x3db   :  { %4917 = vst [vmem:[#allocation21_spill] sm:$0xff] %v3947_v1  ;;  %v698_v3 = vmul.f32 %v4918_v2, %v3947_v1 }
 0x3dd   :  { %v737_v7 = vadd.f32 %v4919_v5, %v698_v3  ;;  %v3963_v5 = vld [vmem:[#allocation3 + $0xe8] ss:$16 sps:$4 sm:$0xff]  }
 0x3df   :  { %v3953_v9 = vadd.f32 %v4920_v8, %v737_v7  ;;  %v3974_v7 = vld [vmem:[#allocation3 + $0xc8] ss:$16 sps:$4 sm:$0xff]  }
 0x3e1   :  { %3198 = vtanh.f32 %v3953_v9 }
 0x3ee   :  { %v3199_v10 = vpop.eup %3198 }
 0x3ef   :  { %750 = vrot.lane.b32.xlu1 %v3199_v10, %s3488_s1  ;;  %v3977_v10 = vld [vmem:[#allocation3 + $0xac] ss:$16 sps:$4 sm:$0xff]  }
 0x3f5   :  { %v3957_v11 = vpop.f32.mrf.mxu0  ;;  %v1008_v12 = vpop.f32.mrf.mxu1 }
 0x3f6   :  { %v1060_v20 = vrot.slane %v1008_v12, 2  ;;  %v743_v12 = vmul.f32 0.5, %v3953_v9  ;;  %v3999_v9 = vld [vmem:[#allocation3 + $0x68] ss:$16 sps:$4 sm:$0xff]  }
 0x3f7   :  { %v2908_v13 = vpop.f32.mrf.mxu0  ;;  %v1010_v14 = vpop.f32.mrf.mxu1 }
 0x3f8   :  { %v1061_v19 = vrot.slane %v1010_v14, 2  ;;  %v1068_v24 = vadd.f32 %v1060_v20, %v970_v23  ;;  %v3986_v13 = vld [vmem:[#allocation3 + $0x8c] ss:$16 sps:$4 sm:$0xff]   ;;  %v3991_v14 = vld [vmem:[#allocation3 + $0x88] ss:$16 sps:$4 sm:$0xff]  }
 0x3f9   :  { %v937_v15 = vpop.f32.mrf.mxu0  ;;  %v1012_v16 = vpop.f32.mrf.mxu1  ;;  %v4042_v23 = vld [vmem:[#allocation3 + $0xa4] ss:$16 sps:$4 sm:$0xff]  }
 0x3fa   :  { %v1069_v22 = vadd.f32 %v1061_v19, %v971_v21  ;;  %v1072_v26 = vmul.f32 0.5, %v1068_v24  ;;  %v4007_v15 = vld [vmem:[#allocation3 + $0x48] ss:$16 sps:$4 sm:$0xff]   ;;  %v4010_v16 = vld [vmem:[#allocation3 + $0x2c] ss:$16 sps:$4 sm:$0xff]  }
 0x3fb   :  { %v2909_v17 = vpop.f32.mrf.mxu0  ;;  %v1013_v18 = vpop.f32.mrf.mxu1  ;;  %v4024_v19 = vld [vmem:[#allocation3 + $0xe4] ss:$16 sps:$4 sm:$0xff]   ;;  %v4045_v24 = vld [vmem:[#allocation3 + $0xa0] ss:$16 sps:$4 sm:$0xff]  }
 0x3fc   :  { %v1076_v25 = vmul.f32 0.5, %v1069_v22  ;;  %v4015_v17 = vld [vmem:[#allocation3 + $0x28] ss:$16 sps:$4 sm:$0xff]   ;;  %v4031_v22 = vld [vmem:[#allocation3 + $0xe0] ss:$16 sps:$4 sm:$0xff]  }
 0x3fe   :  { %3200 = vtanh.f32 %v1076_v25  ;;  %v4048_v25 = vld [vmem:[#allocation3 + $0x84] ss:$16 sps:$4 sm:$0xff]  }
 0x3ff   :  { %3202 = vtanh.f32 %v1072_v26  ;;  %v4051_v26 = vld [vmem:[#allocation3 + $0x80] ss:$16 sps:$4 sm:$0xff]  }
 0x40b   :  { %v3201_v46 = vpop.eup %3200 }
 0x40c   :  { %v3203_v59 = vpop.eup %3202  ;;  %v1078_v41 = vmul.f32 0.5, %v3201_v46 }
 0x40d   :  { %v1074_v63 = vmul.f32 0.5, %v3203_v59 }
 0x40e   :  { %v1079_v54 = vadd.f32 0.5, %v1078_v41 }
 0x40f   :  { %v1075_v60 = vadd.f32 0.5, %v1074_v63 }
 0x410   :  { %v1088_v61 = vmul.f32 %v1086_v48, %v1079_v54 }
 0x415   :  { %v1049_v28 = vpop.f32.mrf.mxu0 }
 0x416   :  { %v1062_v29 = vrot.slane %v1049_v28, 2  ;;  %v4054_v28 = vld [vmem:[#allocation3 + $0x64] ss:$16 sps:$4 sm:$0xff]  }
 0x417   :  { %v1051_v31 = vpop.f32.mrf.mxu0 }
 0x418   :  { %v1070_v32 = vadd.f32 %v1062_v29, %v972_v30  ;;  %v1063_v35 = vrot.slane %v1051_v31, 2  ;;  %v4057_v29 = vld [vmem:[#allocation3 + $0x60] ss:$16 sps:$4 sm:$0xff]   ;;  %v4060_v30 = vld [vmem:[#allocation3 + $0x44] ss:$16 sps:$4 sm:$0xff]  }
 0x419   :  { %v1053_v47 = vpop.f32.mrf.mxu0  ;;  %v4063_v31 = vld [vmem:[#allocation3 + $0x40] ss:$16 sps:$4 sm:$0xff]  }
 0x41a   :  { %3204 = vtanh.f32 %v1070_v32  ;;  %v1071_v49 = vadd.f32 %v1063_v35, %v973_v52  ;;  %v4066_v32 = vld [vmem:[#allocation3 + $0x24] ss:$16 sps:$4 sm:$0xff]   ;;  %v4069_v35 = vld [vmem:[#allocation3 + $0x20] ss:$16 sps:$4 sm:$0xff]  }
 0x41b   :  { %v1054_v45 = vpop.f32.mrf.mxu0  ;;  %v4072_v47 = vld [vmem:[#allocation3 + $0x4] ss:$16 sps:$4 sm:$0xff]   ;;  %v4075_v52 = vld [vmem:[#allocation3] ss:$16 sps:$4 sm:$0xff]  }
 0x41c   :  { %v1081_v58 = vmul.f32 0.5, %v1071_v49  ;;  %4921 = vst [vmem:[#allocation17_spill] sm:$0xff] %v4072_v47  ;;  %4922 = vst [vmem:[#allocation20_spill] sm:$0xff] %v4075_v52  ;;  %v4923_v45 = vld [vmem:[#allocation19_spill] sm:$0xff] }
 0x41e   :  { %3206 = vtanh.f32 %v1081_v58 }
 0x427   :  { %v3205_v57 = vpop.eup %3204 }
 0x428   :  { %v1089_v62 = vmul.f32 %v3205_v57, %v1075_v60 }
 0x42a   :  { %v3960_v27 = vadd.f32 %v1089_v62, %v1088_v61 }
 0x42b   :  { %v3207_v43 = vpop.eup %3206 }
 0x42c   :  { %3208 = vtanh.f32 %v3960_v27  ;;  %v1083_v50 = vmul.f32 0.5, %v3207_v43 }
 0x42d   :  { %3210 = vtanh.f32 %v743_v12 }
 0x42e   :  { %v1084_v39 = vadd.f32 0.5, %v1083_v50 }
 0x439   :  { %v3209_v55 = vpop.eup %3208 }
 0x43a   :  { %v1092_v4 = vmul.f32 %v3209_v55, %v1084_v39 }
 0x43c   :  { %v1093_v6 = vpack.c.bf16 %v1092_v4, %v1092_v4 }
 0x43e   :  { %v1096_v3 = vrot.slane %v1093_v6, 3 }
 0x440   :  { %2927 = vmatmul.mubr.bf16.vlgmr.msra.gmra.mxu1 %v1096_v3  ;;  %1205 = vmatmul.mubr.bf16.vlgmr.msra.gmra.mxu0 %v1096_v3 }
 0x441   :  { %1214 = vmatpush1.bf16.msra.mxu1 %v3963_v5  ;;  %1245 = vmatprep.mubr.bf16.mxu1 %v4911_v56 }
 0x442   :  { %1215 = vmatprep.subr.bf16.mxu1 %v3967_v0  ;;  %2931 = vmatpush3.bf16.msra.mxu0 %v3660_v34  ;;  %v3983_v34 = vld [vmem:[#allocation3 + $0xa8] ss:$16 sps:$4 sm:$0xff]  }
 0x443   :  { %2932 = vmatprep.subr.bf16.mxu0 %v4912_v53  ;;  %2946 = vmatprep.mubr.msk.bf16.mxu0 %vm3487_vm0, %v4912_v53 }
 0x445   :  { %1216 = vmatpush1.bf16.msra.mxu1 %v3974_v7 }
 0x446   :  { %1217 = vmatprep.subr.bf16.mxu1 %v3977_v10  ;;  %2933 = vmatpush3.bf16.msra.mxu0 %v3669_v36  ;;  %v3994_v36 = vld [vmem:[#allocation3 + $0x6c] ss:$16 sps:$4 sm:$0xff]  }
 0x447   :  { %2934 = vmatprep.subr.bf16.mxu0 %v4912_v53 }
 0x449   :  { %1218 = vmatpush1.bf16.msra.mxu1 %v3983_v34 }
 0x44a   :  { %1219 = vmatprep.subr.bf16.mxu1 %v3986_v13  ;;  %2935 = vmatpush3.bf16.msra.mxu0 %v3676_v37  ;;  %v4002_v37 = vld [vmem:[#allocation3 + $0x4c] ss:$16 sps:$4 sm:$0xff]  }
 0x44b   :  { %2936 = vmatprep.subr.bf16.mxu0 %v4912_v53 }
 0x44d   :  { %1220 = vmatpush1.bf16.msra.mxu1 %v3991_v14 }
 0x44e   :  { %1221 = vmatprep.subr.bf16.mxu1 %v3994_v36  ;;  %2937 = vmatpush3.bf16.msra.mxu0 %v3683_v38  ;;  %v3211_v38 = vpop.eup %3210 }
 0x44f   :  { %2938 = vmatprep.subr.bf16.mxu0 %v4912_v53  ;;  %v745_v18 = vmul.f32 0.5, %v3211_v38 }
 0x451   :  { %1222 = vmatpush1.bf16.msra.mxu1 %v3999_v9  ;;  %v746_v20 = vadd.f32 0.5, %v745_v18 }
 0x452   :  { %1223 = vmatprep.subr.bf16.mxu1 %v4002_v37  ;;  %2939 = vmatpush3.bf16.msra.mxu0 %v3690_v40  ;;  %v4018_v40 = vld [vmem:[#allocation3 + $0xc] ss:$16 sps:$4 sm:$0xff]  }
 0x453   :  { %2940 = vmatprep.subr.bf16.mxu0 %v4912_v53  ;;  %v748_v49 = vmul.f32 %v746_v20, %v4923_v45 }
 0x455   :  { %1224 = vmatpush1.bf16.msra.mxu1 %v4007_v15 }
 0x456   :  { %1225 = vmatprep.subr.bf16.mxu1 %v4010_v16  ;;  %2941 = vmatpush3.bf16.msra.mxu0 %v3698_v42  ;;  %v4028_v42 = vld [vmem:[#allocation3 + $0xec] ss:$16 sps:$4 sm:$0xff]  }
 0x457   :  { %2942 = vmatprep.subr.bf16.mxu0 %v4912_v53 }
 0x459   :  { %1226 = vmatpush1.bf16.msra.mxu1 %v4015_v17 }
 0x45a   :  { %1227 = vmatprep.subr.bf16.mxu1 %v4018_v40  ;;  %2943 = vmatpush3.bf16.msra.mxu0 %v3705_v44  ;;  %v4035_v44 = vld [vmem:[#allocation3 + $0xc4] ss:$16 sps:$4 sm:$0xff]  }
 0x45b   :  { %2944 = vmatprep.subr.bf16.mxu0 %v4912_v53 }
 0x45d   :  { %1228 = vmatpush1.bf16.msra.mxu1 %v3632_v33 }
 0x45e   :  { %1355 = vmatprep.subr.bf16.mxu1 %v4024_v19  ;;  %2945 = vmatpush3.bf16.msra.mxu0 %v3720_v51  ;;  %v4039_v51 = vld [vmem:[#allocation3 + $0xc0] ss:$16 sps:$4 sm:$0xff]  }
 0x45f   :  { %1396 = vmatprep.subr.bf16.mxu0 %v4028_v42 }
 0x460   :  { %1246 = vmatmul.mubr.bf16.vlgmr.msra.gmra.mxu1 %v1096_v3 }
 0x461   :  { %v751_v21 = vpop.permute.xlu1 %750  ;;  %1356 = vmatpush1.bf16.msra.mxu1 %v4031_v22  ;;  %1387 = vmatprep.mubr.bf16.mxu1 %v4911_v56 }
 0x462   :  { %v753_v33 = vmul.f32 %v751_v21, %v746_v20  ;;  %1357 = vmatprep.subr.bf16.mxu1 %v4035_v44 }
 0x464   :  { %755 = vrot.lane.b32.xlu1 %v753_v33, %s3489_s8 }
 0x465   :  { %1358 = vmatpush1.bf16.msra.mxu1 %v4039_v51 }
 0x466   :  { %1359 = vmatprep.subr.bf16.mxu1 %v4042_v23 }
 0x469   :  { %1360 = vmatpush1.bf16.msra.mxu1 %v4045_v24 }
 0x46a   :  { %1361 = vmatprep.subr.bf16.mxu1 %v4048_v25 }
 0x46d   :  { %1362 = vmatpush1.bf16.msra.mxu1 %v4051_v26 }
 0x46e   :  { %1363 = vmatprep.subr.bf16.mxu1 %v4054_v28 }
 0x471   :  { %1364 = vmatpush1.bf16.msra.mxu1 %v4057_v29 }
 0x472   :  { %1365 = vmatprep.subr.bf16.mxu1 %v4060_v30 }
 0x475   :  { %1366 = vmatpush1.bf16.msra.mxu1 %v4063_v31 }
 0x476   :  { %1367 = vmatprep.subr.bf16.mxu1 %v4066_v32 }
 0x479   :  { %1368 = vmatpush1.bf16.msra.mxu1 %v4069_v35 }
 0x47a   :  { %1369 = vmatprep.subr.bf16.mxu1 %v4072_v47 }
 0x47d   :  { %1370 = vmatpush1.bf16.msra.mxu1 %v4075_v52 }
 0x47e   :  { %2950 = vmatprep.subr.bf16.mxu1 %v4912_v53 }
 0x4d6   :  { %v756_v46 = vpop.permute.xlu1 %755 }
 0x4d7   :  { %v758_v59 = vadd.f32 %v756_v46, %v748_v49 }
 0x4d9   :  { %3212 = vtanh.f32 %v758_v59 }
 0x4e6   :  { %v3213_v41 = vpop.eup %3212 }
 0x4e7   :  { %761 = vrot.lane.b32.xlu0 %v3213_v41, %s3491_s9 }
 0x500   :  { %v4081_v58 = vpop.f32.mrf.mxu1  ;;  %v1206_v63 = vpop.f32.mrf.mxu0 }
 0x502   :  { %v2928_v54 = vpop.f32.mrf.mxu1  ;;  %v1208_v60 = vpop.f32.mrf.mxu0 }
 0x504   :  { %v1135_v48 = vpop.f32.mrf.mxu1  ;;  %v1210_v57 = vpop.f32.mrf.mxu0 }
 0x506   :  { %v2929_v61 = vpop.f32.mrf.mxu1  ;;  %v1211_v62 = vpop.f32.mrf.mxu0 }
 0x507   :  { %v95_v61 = vld [vmem:[%s4839_s0 + $0x8] sm:$0xff]  ;;  %v4925_v62 = vmov 3  }
 0x520   :  { %v1247_v43 = vpop.f32.mrf.mxu1 }
 0x522   :  { %v1249_v50 = vpop.f32.mrf.mxu1 }
 0x524   :  { %v1251_v39 = vpop.f32.mrf.mxu1 }
 0x526   :  { %v1252_v55 = vpop.f32.mrf.mxu1 }
 0x559   :  { %v762_v4 = vpop.permute.xlu0 %761 }
 0x55a   :  { %v764_v6 = vmul.f32 %v762_v4, %v746_v20 }
 0x55c   :  { %768 = vperm.xlu1 %3103, %v764_v6  }
 0x5d7   :  { %v4083_v3 = vpop.permute.xlu1 %768 }
 0x5d8   :  { %4924 = vst [vmem:[#allocation18_spill] sm:$0xff] %v4083_v3  ;;  %v896_v12 = vmul.f32 %v4918_v2, %v4083_v3 }
 0x5da   :  { %v935_v38 = vadd.f32 %v3957_v11, %v896_v12  ;;  %v4927_v12 = vld [vmem:[#allocation10_spill] sm:$0xff] }
 0x5dc   :  { %v940_v18 = vadd.f32 %v4920_v8, %v935_v38 }
 0x5de   :  { %3214 = vtanh.f32 %v940_v18  ;;  %v941_v33 = vmul.f32 0.5, %v940_v18  ;;  %v4928_v18 = vld [vmem:[#allocation11_spill] sm:$0xff] }
 0x5e0   :  { %3216 = vtanh.f32 %v941_v33  ;;  %v4929_v33 = vld [vmem:[#allocation12_spill] sm:$0xff] }
 0x5eb   :  { %v3215_v21 = vpop.eup %3214 }
 0x5ec   :  { %948 = vrot.lane.b32.xlu0 %v3215_v21, %s3488_s1 }
 0x5ed   :  { %v3217_v45 = vpop.eup %3216 }
 0x5ee   :  { %v943_v49 = vmul.f32 0.5, %v3217_v45 }
 0x5f0   :  { %v944_v46 = vadd.f32 0.5, %v943_v49  ;;  %v4930_v49 = vld [vmem:[#allocation13_spill] sm:$0xff] }
 0x5f2   :  { %v946_v54 = vmul.f32 %v944_v46, %v758_v59  ;;  %v4926_v59 = vld [vmem:[#allocation9_spill] sm:$0xff] }
 0x65e   :  { %v949_v20 = vpop.permute.xlu0 %948 }
 0x65f   :  { %v951_v41 = vmul.f32 %v949_v20, %v944_v46 }
 0x661   :  { %953 = vrot.lane.b32.xlu1 %v951_v41, %s3489_s8  ;;  %v4931_v41 = vld [vmem:[#allocation14_spill] sm:$0xff] }
 0x6d3   :  { %v954_v48 = vpop.permute.xlu1 %953 }
 0x6d4   :  { %v4091_v57 = vadd.f32 %v954_v48, %v946_v54  ;;  %v4932_v48 = vld [vmem:[#allocation15_spill] sm:$0xff] }
 0x6d6   :  { %3218 = vtanh.f32 %v4091_v57 }
 0x6e3   :  { %v3219_v11 = vpop.eup %3218 }
 0x6e4   :  { %959 = vrot.lane.b32.xlu0 %v3219_v11, %s3491_s9 }
 0x6e8   :  { %103 = vperm.xlu0 %3104, %v95_v61   ;;  %v4933_v61 = vld [vmem:[#allocation16_spill] sm:$0xff] }
 0x6ec   :  { %3105 = vset.pattern.permute.xlu0 %v4925_v62 }
 0x756   :  { %v960_v39 = vpop.permute.xlu0 %959 }
 0x757   :  { %v962_v55 = vmul.f32 %v960_v39, %v944_v46 }
 0x759   :  { %966 = vperm.xlu1 %3103, %v962_v55  }
 0x763   :  { %v104_v4 = vpop.permute.xlu0 %103 }
 0x764   :  { %v131_v6 = vmul.f32 %v4926_v59, %v104_v4  ;;  %v132_v38 = vmul.f32 %v4927_v12, %v104_v4  ;;  %v133_v21 = vmul.f32 %v4928_v18, %v104_v4  ;;  %v134_v45 = vmul.f32 %v4929_v33, %v104_v4 }
 0x766   :  { %v160_v20 = vadd.f32 %v4930_v49, %v131_v6  ;;  %v161_v54 = vadd.f32 %v4931_v41, %v132_v38  ;;  %v162_v11 = vadd.f32 %v4932_v48, %v133_v21  ;;  %v163_v62 = vadd.f32 %v4933_v61, %v134_v45 }
 0x768   :  { %168 = vst [vmem:[#allocation2 + $0x8] sm:$0xff] %v160_v20  ;;  %169 = vst [vmem:[#allocation2 + $0x20] sm:$0xff] %v161_v54 }
 0x769   :  { %170 = vst [vmem:[#allocation2 + $0x28] sm:$0xff] %v162_v11  ;;  %171 = vst [vmem:[#allocation2 + $0x38] sm:$0xff] %v163_v62 }
 0x76f   :  { %v1168_v46 = vld [vmem:[#allocation2 + $0x8] sm:$0x3]  ;;  %v1169_v39 = vld [vmem:[#allocation2 + $0x20] sm:$0x3] }
 0x770   :  { %v1254_v55 = vadd.f32 %v1206_v63, %v1168_v46  ;;  %v1255_v3 = vadd.f32 %v1208_v60, %v1169_v39  ;;  %v1170_v1 = vld [vmem:[#allocation2 + $0x28] sm:$0x3]  ;;  %v1171_v6 = vld [vmem:[#allocation2 + $0x38] sm:$0x3]  ;;  %v1272_v63 = vrot.slane %v3960_v27, 6 }
 0x771   :  { %v1256_v4 = vadd.f32 %v1247_v43, %v1170_v1  ;;  %v1257_v38 = vadd.f32 %v1249_v50, %v1171_v6  ;;  %v4117_v27 = vld [vmem:[%s4843_s4 + $0x38] sm:$0xff]   ;;  %v4146_v6 = vld [vmem:[%s4843_s4 + $0x20] sm:$0xff]  }
 0x772   :  { %v1258_v18 = vmul.f32 0.5, %v1254_v55  ;;  %v1262_v12 = vmul.f32 0.5, %v1255_v3 }
 0x773   :  { %v1267_v21 = vmul.f32 0.5, %v1257_v38  ;;  %v4155_v38 = vld [vmem:[%s4843_s4 + $0x18] sm:$0xff]  }
 0x774   :  { %3220 = vtanh.f32 %v1258_v18 }
 0x775   :  { %3222 = vtanh.f32 %v1262_v12 }
 0x776   :  { %3224 = vtanh.f32 %v1256_v4  ;;  %v4137_v4 = vld [vmem:[%s4843_s4 + $0x28] sm:$0xff]  }
 0x777   :  { %3226 = vtanh.f32 %v1267_v21  ;;  %v4164_v21 = vld [vmem:[%s4843_s4 + $0x10] sm:$0xff]  }
 0x781   :  { %v3221_v33 = vpop.eup %3220 }
 0x782   :  { %v3223_v45 = vpop.eup %3222  ;;  %v1260_v20 = vmul.f32 0.5, %v3221_v33  ;;  %v4128_v33 = vld [vmem:[%s4843_s4 + $0x30] sm:$0xff]  }
 0x783   :  { %v1264_v54 = vmul.f32 0.5, %v3223_v45  ;;  %v3225_v62 = vpop.eup %3224  ;;  %v4173_v45 = vld [vmem:[%s4843_s4 + $0x8] sm:$0xff]  }
 0x784   :  { %v1261_v11 = vadd.f32 0.5, %v1260_v20  ;;  %v3227_v1 = vpop.eup %3226  ;;  %v4177_v20 = vld [vmem:[#allocation3 + $0x8] ss:$16 sps:$4 sm:$0xff]  }
 0x785   :  { %v1265_v60 = vadd.f32 0.5, %v1264_v54  ;;  %v1269_v43 = vmul.f32 0.5, %v3227_v1  ;;  %v4184_v54 = vld [vmem:[%s4843_s4] sm:$0xff]  }
 0x786   :  { %v1275_v46 = vmul.f32 %v3225_v62, %v1261_v11 }
 0x787   :  { %v1274_v39 = vmul.f32 %v1272_v63, %v1265_v60  ;;  %v1270_v50 = vadd.f32 0.5, %v1269_v43 }
 0x789   :  { %v4108_v3 = vadd.f32 %v1275_v46, %v1274_v39 }
 0x78b   :  { %3228 = vtanh.f32 %v4108_v3 }
 0x798   :  { %v3229_v12 = vpop.eup %3228 }
 0x799   :  { %v1278_v18 = vmul.f32 %v3229_v12, %v1270_v50 }
 0x79b   :  { %v1279_v55 = vpack.c.bf16 %v1278_v18, %v1278_v18 }
 0x79d   :  { %2947 = vmatmul.mubr.bf16.vlgmr.msra.gmra.mxu0 %v1279_v55  ;;  %1388 = vmatmul.mubr.bf16.vlgmr.msra.gmra.mxu1 %v1279_v55 }
 0x79e   :  { %1397 = vmatpush1.bf16.msra.mxu0 %v3963_v5  ;;  %1428 = vmatprep.mubr.bf16.mxu0 %v4911_v56 }
 0x79f   :  { %1398 = vmatprep.subr.bf16.mxu0 %v3967_v0  ;;  %2951 = vmatpush3.bf16.msra.mxu1 %v4117_v27 }
 0x7a0   :  { %2952 = vmatprep.subr.bf16.mxu1 %v4912_v53  ;;  %2966 = vmatprep.mubr.msk.bf16.mxu1 %vm3487_vm0, %v4912_v53 }
 0x7a2   :  { %1399 = vmatpush1.bf16.msra.mxu0 %v3974_v7 }
 0x7a3   :  { %1400 = vmatprep.subr.bf16.mxu0 %v3977_v10  ;;  %2953 = vmatpush3.bf16.msra.mxu1 %v4128_v33 }
 0x7a4   :  { %2954 = vmatprep.subr.bf16.mxu1 %v4912_v53 }
 0x7a6   :  { %1401 = vmatpush1.bf16.msra.mxu0 %v3983_v34 }
 0x7a7   :  { %1402 = vmatprep.subr.bf16.mxu0 %v3986_v13  ;;  %2955 = vmatpush3.bf16.msra.mxu1 %v4137_v4 }
 0x7a8   :  { %2956 = vmatprep.subr.bf16.mxu1 %v4912_v53 }
 0x7aa   :  { %1403 = vmatpush1.bf16.msra.mxu0 %v3991_v14 }
 0x7ab   :  { %1404 = vmatprep.subr.bf16.mxu0 %v3994_v36  ;;  %2957 = vmatpush3.bf16.msra.mxu1 %v4146_v6 }
 0x7ac   :  { %2958 = vmatprep.subr.bf16.mxu1 %v4912_v53 }
 0x7ae   :  { %1405 = vmatpush1.bf16.msra.mxu0 %v3999_v9 }
 0x7af   :  { %1406 = vmatprep.subr.bf16.mxu0 %v4002_v37  ;;  %2959 = vmatpush3.bf16.msra.mxu1 %v4155_v38 }
 0x7b0   :  { %2960 = vmatprep.subr.bf16.mxu1 %v4912_v53 }
 0x7b2   :  { %1407 = vmatpush1.bf16.msra.mxu0 %v4007_v15 }
 0x7b3   :  { %1408 = vmatprep.subr.bf16.mxu0 %v4010_v16  ;;  %2961 = vmatpush3.bf16.msra.mxu1 %v4164_v21 }
 0x7b4   :  { %2962 = vmatprep.subr.bf16.mxu1 %v4912_v53 }
 0x7b6   :  { %1409 = vmatpush1.bf16.msra.mxu0 %v4015_v17 }
 0x7b7   :  { %1410 = vmatprep.subr.bf16.mxu0 %v4018_v40  ;;  %2963 = vmatpush3.bf16.msra.mxu1 %v4173_v45 }
 0x7b8   :  { %2964 = vmatprep.subr.bf16.mxu1 %v4912_v53 }
 0x7ba   :  { %1411 = vmatpush1.bf16.msra.mxu0 %v4177_v20 }
 0x7bb   :  { %1553 = vmatprep.subr.bf16.mxu0 %v4024_v19  ;;  %2965 = vmatpush3.bf16.msra.mxu1 %v4184_v54 }
 0x7bc   :  { %1594 = vmatprep.subr.bf16.mxu1 %v4028_v42 }
 0x7bd   :  { %1429 = vmatmul.mubr.bf16.vlgmr.msra.gmra.mxu0 %v1279_v55 }
 0x7be   :  { %1554 = vmatpush1.bf16.msra.mxu0 %v4031_v22  ;;  %1585 = vmatprep.mubr.bf16.mxu0 %v4911_v56 }
 0x7bf   :  { %1555 = vmatprep.subr.bf16.mxu0 %v4035_v44 }
 0x7c2   :  { %1556 = vmatpush1.bf16.msra.mxu0 %v4039_v51 }
 0x7c3   :  { %1557 = vmatprep.subr.bf16.mxu0 %v4042_v23 }
 0x7c6   :  { %1558 = vmatpush1.bf16.msra.mxu0 %v4045_v24 }
 0x7c7   :  { %1559 = vmatprep.subr.bf16.mxu0 %v4048_v25 }
 0x7ca   :  { %1560 = vmatpush1.bf16.msra.mxu0 %v4051_v26 }
 0x7cb   :  { %1561 = vmatprep.subr.bf16.mxu0 %v4054_v28 }
 0x7ce   :  { %1562 = vmatpush1.bf16.msra.mxu0 %v4057_v29 }
 0x7cf   :  { %1563 = vmatprep.subr.bf16.mxu0 %v4060_v30 }
 0x7d2   :  { %1564 = vmatpush1.bf16.msra.mxu0 %v4063_v31 }
 0x7d3   :  { %1565 = vmatprep.subr.bf16.mxu0 %v4066_v32 }
 0x7d4   :  { %v4201_v11 = vpop.permute.xlu1 %966 }
 0x7d5   :  { %4934 = vst [vmem:[#allocation19_spill] sm:$0xff] %v4201_v11  ;;  %v1094_v62 = vmul.f32 %v4918_v2, %v4201_v11 }
 0x7d6   :  { %1566 = vmatpush1.bf16.msra.mxu0 %v4069_v35 }
 0x7d7   :  { %v1133_v63 = vadd.f32 %v4081_v58, %v1094_v62  ;;  %1567 = vmatprep.subr.bf16.mxu0 %v4072_v47 }
 0x7d9   :  { %v1138_v60 = vadd.f32 %v4920_v8, %v1133_v63 }
 0x7da   :  { %1568 = vmatpush1.bf16.msra.mxu0 %v4075_v52 }
 0x7db   :  { %3230 = vtanh.f32 %v1138_v60  ;;  %2970 = vmatprep.subr.bf16.mxu0 %v4912_v53  ;;  %v1139_v39 = vmul.f32 0.5, %v1138_v60 }
 0x7dd   :  { %3232 = vtanh.f32 %v1139_v39  ;;  %v1352_v39 = vld [vmem:[#allocation2 + $0x20] sm:$0xc] }
 0x7e8   :  { %v3231_v46 = vpop.eup %3230 }
 0x7e9   :  { %1146 = vrot.lane.b32.xlu1 %v3231_v46, %s3488_s1 }
 0x7ea   :  { %v3233_v1 = vpop.eup %3232 }
 0x7eb   :  { %v1141_v2 = vmul.f32 0.5, %v3233_v1  ;;  %v1351_v1 = vld [vmem:[#allocation2 + $0x8] sm:$0xc] }
 0x7ed   :  { %v4212_v43 = vadd.f32 0.5, %v1141_v2 }
 0x85b   :  { %v1147_v50 = vpop.permute.xlu1 %1146 }
 0x85c   :  { %v1149_v58 = vmul.f32 %v1147_v50, %v4212_v43  ;;  %v1353_v50 = vld [vmem:[#allocation2 + $0x28] sm:$0xc] }
 0x85d   :  { %v4215_v12 = vpop.f32.mrf.mxu0  ;;  %v1389_v8 = vpop.f32.mrf.mxu1 }
 0x85e   :  { %4935 = vst [vmem:[#allocation22_spill] sm:$0xff] %v4215_v12  ;;  %1151 = vrot.lane.b32.xlu1 %v1149_v58, %s3489_s8  ;;  %v1441_v61 = vrot.slane %v1389_v8, 6 }
 0x85f   :  { %v2948_v18 = vpop.f32.mrf.mxu0  ;;  %v1391_v55 = vpop.f32.mrf.mxu1 }
 0x860   :  { %v1442_v60 = vrot.slane %v1391_v55, 6  ;;  %v1449_v48 = vadd.f32 %v1441_v61, %v1351_v1 }
 0x861   :  { %v1318_v62 = vpop.f32.mrf.mxu0  ;;  %v1393_v63 = vpop.f32.mrf.mxu1 }
 0x862   :  { %v1450_v2 = vadd.f32 %v1442_v60, %v1352_v39  ;;  %v1453_v49 = vmul.f32 0.5, %v1449_v48  ;;  %v1354_v62 = vld [vmem:[#allocation2 + $0x38] sm:$0xc] }
 0x863   :  { %v2949_v11 = vpop.f32.mrf.mxu0  ;;  %v1394_v46 = vpop.f32.mrf.mxu1 }
 0x864   :  { %v1457_v41 = vmul.f32 0.5, %v1450_v2 }
 0x866   :  { %3234 = vtanh.f32 %v1457_v41 }
 0x867   :  { %3236 = vtanh.f32 %v1453_v49  ;;  %v1467_v49 = vrot.slane %v4108_v3, 6 }
 0x873   :  { %v3235_v46 = vpop.eup %3234 }
 0x874   :  { %v3237_v8 = vpop.eup %3236  ;;  %v1459_v47 = vmul.f32 0.5, %v3235_v46  ;;  %v4937_v46 = vld [vmem:[#allocation20_spill] sm:$0xff] }
 0x875   :  { %v1455_v61 = vmul.f32 0.5, %v3237_v8 }
 0x876   :  { %v1460_v39 = vadd.f32 0.5, %v1459_v47  ;;  %v1144_v47 = vmul.f32 %v4212_v43, %v4091_v57 }
 0x877   :  { %v1456_v41 = vadd.f32 0.5, %v1455_v61 }
 0x87d   :  { %v1430_v59 = vpop.f32.mrf.mxu0 }
 0x87e   :  { %v1443_v12 = vrot.slane %v1430_v59, 6  ;;  %v1469_v59 = vmul.f32 %v1467_v49, %v1460_v39 }
 0x87f   :  { %v1432_v58 = vpop.f32.mrf.mxu0 }
 0x880   :  { %v1451_v18 = vadd.f32 %v1443_v12, %v1353_v50  ;;  %v1444_v52 = vrot.slane %v1432_v58, 6 }
 0x881   :  { %v1434_v63 = vpop.f32.mrf.mxu0 }
 0x882   :  { %3238 = vtanh.f32 %v1451_v18  ;;  %v1452_v55 = vadd.f32 %v1444_v52, %v1354_v62 }
 0x883   :  { %v1435_v11 = vpop.f32.mrf.mxu0 }
 0x884   :  { %v1462_v60 = vmul.f32 0.5, %v1452_v55  ;;  %v4936_v55 = vld [vmem:[#allocation17_spill] sm:$0xff] }
 0x886   :  { %3240 = vtanh.f32 %v1462_v60 }
 0x88f   :  { %v3239_v48 = vpop.eup %3238 }
 0x890   :  { %v1470_v1 = vmul.f32 %v3239_v48, %v1456_v41 }
 0x892   :  { %v4219_v12 = vadd.f32 %v1470_v1, %v1469_v59 }
 0x893   :  { %v3241_v2 = vpop.eup %3240 }
 0x894   :  { %3242 = vtanh.f32 %v4219_v12  ;;  %v1464_v50 = vmul.f32 0.5, %v3241_v2 }
 0x896   :  { %v1465_v52 = vadd.f32 0.5, %v1464_v50 }
 0x8a1   :  { %v3243_v58 = vpop.eup %3242 }
 0x8a2   :  { %v1473_v18 = vmul.f32 %v3243_v58, %v1465_v52  ;;  %v1550_v58 = vld [vmem:[#allocation2 + $0x20] sm:$0x30] }
 0x8a4   :  { %v1474_v62 = vpack.c.bf16 %v1473_v18, %v1473_v18 }
 0x8a6   :  { %v1477_v63 = vrot.slane %v1474_v62, 1  ;;  %v1549_v62 = vld [vmem:[#allocation2 + $0x8] sm:$0x30] }
 0x8a8   :  { %2967 = vmatmul.mubr.bf16.vlgmr.msra.gmra.mxu1 %v1477_v63  ;;  %1586 = vmatmul.mubr.bf16.vlgmr.msra.gmra.mxu0 %v1477_v63 }
 0x8a9   :  { %1595 = vmatpush1.bf16.msra.mxu1 %v3963_v5  ;;  %1626 = vmatprep.mubr.bf16.mxu1 %v4911_v56 }
 0x8aa   :  { %1596 = vmatprep.subr.bf16.mxu1 %v3967_v0  ;;  %2971 = vmatpush3.bf16.msra.mxu0 %v4117_v27 }
 0x8ab   :  { %2972 = vmatprep.subr.bf16.mxu0 %v4912_v53  ;;  %2986 = vmatprep.mubr.msk.bf16.mxu0 %vm3487_vm0, %v4912_v53 }
 0x8ad   :  { %1597 = vmatpush1.bf16.msra.mxu1 %v3974_v7 }
 0x8ae   :  { %1598 = vmatprep.subr.bf16.mxu1 %v3977_v10  ;;  %2973 = vmatpush3.bf16.msra.mxu0 %v4128_v33 }
 0x8af   :  { %2974 = vmatprep.subr.bf16.mxu0 %v4912_v53 }
 0x8b1   :  { %1599 = vmatpush1.bf16.msra.mxu1 %v3983_v34 }
 0x8b2   :  { %1600 = vmatprep.subr.bf16.mxu1 %v3986_v13  ;;  %2975 = vmatpush3.bf16.msra.mxu0 %v4137_v4 }
 0x8b3   :  { %2976 = vmatprep.subr.bf16.mxu0 %v4912_v53 }
 0x8b5   :  { %1601 = vmatpush1.bf16.msra.mxu1 %v3991_v14 }
 0x8b6   :  { %1602 = vmatprep.subr.bf16.mxu1 %v3994_v36  ;;  %2977 = vmatpush3.bf16.msra.mxu0 %v4146_v6 }
 0x8b7   :  { %2978 = vmatprep.subr.bf16.mxu0 %v4912_v53 }
 0x8b9   :  { %1603 = vmatpush1.bf16.msra.mxu1 %v3999_v9 }
 0x8ba   :  { %1604 = vmatprep.subr.bf16.mxu1 %v4002_v37  ;;  %2979 = vmatpush3.bf16.msra.mxu0 %v4155_v38 }
 0x8bb   :  { %2980 = vmatprep.subr.bf16.mxu0 %v4912_v53 }
 0x8bd   :  { %1605 = vmatpush1.bf16.msra.mxu1 %v4007_v15 }
 0x8be   :  { %1606 = vmatprep.subr.bf16.mxu1 %v4010_v16  ;;  %2981 = vmatpush3.bf16.msra.mxu0 %v4164_v21 }
 0x8bf   :  { %2982 = vmatprep.subr.bf16.mxu0 %v4912_v53 }
 0x8c1   :  { %1607 = vmatpush1.bf16.msra.mxu1 %v4015_v17 }
 0x8c2   :  { %1608 = vmatprep.subr.bf16.mxu1 %v4018_v40  ;;  %2983 = vmatpush3.bf16.msra.mxu0 %v4173_v45 }
 0x8c3   :  { %2984 = vmatprep.subr.bf16.mxu0 %v4912_v53 }
 0x8c5   :  { %1609 = vmatpush1.bf16.msra.mxu1 %v4177_v20 }
 0x8c6   :  { %1751 = vmatprep.subr.bf16.mxu1 %v4024_v19  ;;  %2985 = vmatpush3.bf16.msra.mxu0 %v4184_v54 }
 0x8c7   :  { %1792 = vmatprep.subr.bf16.mxu0 %v4028_v42 }
 0x8c8   :  { %1627 = vmatmul.mubr.bf16.vlgmr.msra.gmra.mxu1 %v1477_v63 }
 0x8c9   :  { %1752 = vmatpush1.bf16.msra.mxu1 %v4031_v22  ;;  %1783 = vmatprep.mubr.bf16.mxu1 %v4911_v56 }
 0x8ca   :  { %1753 = vmatprep.subr.bf16.mxu1 %v4035_v44 }
 0x8cd   :  { %1754 = vmatpush1.bf16.msra.mxu1 %v4039_v51 }
 0x8ce   :  { %1755 = vmatprep.subr.bf16.mxu1 %v4042_v23 }
 0x8d0   :  { %v1152_v3 = vpop.permute.xlu1 %1151 }
 0x8d1   :  { %v4264_v11 = vadd.f32 %v1152_v3, %v1144_v47  ;;  %1756 = vmatpush1.bf16.msra.mxu1 %v4045_v24 }
 0x8d2   :  { %1757 = vmatprep.subr.bf16.mxu1 %v4048_v25 }
 0x8d3   :  { %3244 = vtanh.f32 %v4264_v11 }
 0x8d5   :  { %1758 = vmatpush1.bf16.msra.mxu1 %v4051_v26 }
 0x8d6   :  { %1759 = vmatprep.subr.bf16.mxu1 %v4054_v28 }
 0x8d9   :  { %1760 = vmatpush1.bf16.msra.mxu1 %v4057_v29 }
 0x8da   :  { %1761 = vmatprep.subr.bf16.mxu1 %v4060_v30 }
 0x8dd   :  { %1762 = vmatpush1.bf16.msra.mxu1 %v4063_v31 }
 0x8de   :  { %1763 = vmatprep.subr.bf16.mxu1 %v4066_v32 }
 0x8e0   :  { %v3245_v57 = vpop.eup %3244 }
 0x8e1   :  { %1157 = vrot.lane.b32.xlu0 %v3245_v57, %s3491_s9  ;;  %1764 = vmatpush1.bf16.msra.mxu1 %v4069_v35 }
 0x8e2   :  { %1765 = vmatprep.subr.bf16.mxu1 %v4936_v55 }
 0x8e5   :  { %1766 = vmatpush1.bf16.msra.mxu1 %v4937_v46 }
 0x8e6   :  { %2990 = vmatprep.subr.bf16.mxu1 %v4912_v53 }
 0x953   :  { %v1158_v8 = vpop.permute.xlu0 %1157 }
 0x954   :  { %v1160_v60 = vmul.f32 %v1158_v8, %v4212_v43  ;;  %v1551_v8 = vld [vmem:[#allocation2 + $0x28] sm:$0x30] }
 0x956   :  { %1164 = vperm.xlu1 %3103, %v1160_v60  }
 0x968   :  { %v4281_v61 = vpop.f32.mrf.mxu1  ;;  %v1587_v39 = vpop.f32.mrf.mxu0 }
 0x969   :  { %4938 = vst [vmem:[#allocation17_spill] sm:$0xff] %v4281_v61  ;;  %v1639_v52 = vrot.slane %v1587_v39, 4 }
 0x96a   :  { %v2968_v41 = vpop.f32.mrf.mxu1  ;;  %v1589_v49 = vpop.f32.mrf.mxu0 }
 0x96b   :  { %v1640_v50 = vrot.slane %v1589_v49, 4  ;;  %v1647_v63 = vadd.f32 %v1639_v52, %v1549_v62 }
 0x96c   :  { %v1516_v48 = vpop.f32.mrf.mxu1  ;;  %v1591_v59 = vpop.f32.mrf.mxu0 }
 0x96d   :  { %v1648_v18 = vadd.f32 %v1640_v50, %v1550_v58  ;;  %v1651_v3 = vmul.f32 0.5, %v1647_v63  ;;  %v1552_v59 = vld [vmem:[#allocation2 + $0x38] sm:$0x30]  ;;  %v1665_v63 = vrot.slane %v4219_v12, 6 }
 0x96e   :  { %v2969_v1 = vpop.f32.mrf.mxu1  ;;  %v1592_v2 = vpop.f32.mrf.mxu0 }
 0x96f   :  { %v1655_v47 = vmul.f32 0.5, %v1648_v18 }
 0x971   :  { %3246 = vtanh.f32 %v1655_v47 }
 0x972   :  { %3248 = vtanh.f32 %v1651_v3 }
 0x97e   :  { %v3247_v39 = vpop.eup %3246 }
 0x97f   :  { %v3249_v2 = vpop.eup %3248  ;;  %v1657_v50 = vmul.f32 0.5, %v3247_v39 }
 0x980   :  { %v1653_v52 = vmul.f32 0.5, %v3249_v2  ;;  %v4941_v2 = vld [vmem:[#allocation22_spill] sm:$0xff] }
 0x981   :  { %v1658_v18 = vadd.f32 0.5, %v1657_v50 }
 0x982   :  { %v1654_v62 = vadd.f32 0.5, %v1653_v52 }
 0x983   :  { %v1667_v3 = vmul.f32 %v1665_v63, %v1658_v18 }
 0x988   :  { %v1628_v43 = vpop.f32.mrf.mxu1 }
 0x989   :  { %v1641_v57 = vrot.slane %v1628_v43, 4 }
 0x98a   :  { %v1630_v60 = vpop.f32.mrf.mxu1 }
 0x98b   :  { %v1649_v41 = vadd.f32 %v1641_v57, %v1551_v8  ;;  %v1642_v61 = vrot.slane %v1630_v60, 4 }
 0x98c   :  { %v1632_v48 = vpop.f32.mrf.mxu1 }
 0x98d   :  { %3250 = vtanh.f32 %v1649_v41  ;;  %v1650_v49 = vadd.f32 %v1642_v61, %v1552_v59 }
 0x98e   :  { %v1633_v1 = vpop.f32.mrf.mxu1 }
 0x98f   :  { %v1660_v58 = vmul.f32 0.5, %v1650_v49  ;;  %v4326_v49 = vld [vmem:[%s4844_s5] ss:$0 sm:$0xff] }
 0x990   :  { %4940 = vst [vmem:[#allocation24_spill] sm:$0xff] %v4326_v49 }
 0x991   :  { %3252 = vtanh.f32 %v1660_v58  ;;  %v4338_v58 = vld [vmem:[%s4845_s6] ss:$0 sm:$0xff] }
 0x992   :  { %4942 = vst [vmem:[#allocation22_spill] sm:$0xff] %v4338_v58 }
 0x99a   :  { %v3251_v47 = vpop.eup %3250 }
 0x99b   :  { %v1668_v43 = vmul.f32 %v3251_v47, %v1654_v62 }
 0x99d   :  { %v4284_v57 = vadd.f32 %v1668_v43, %v1667_v3 }
 0x99e   :  { %v3253_v8 = vpop.eup %3252 }
 0x99f   :  { %3254 = vtanh.f32 %v4284_v57  ;;  %v1662_v60 = vmul.f32 0.5, %v3253_v8 }
 0x9a1   :  { %v1663_v61 = vadd.f32 0.5, %v1662_v60 }
 0x9ac   :  { %v3255_v41 = vpop.eup %3254 }
 0x9ad   :  { %v1671_v48 = vmul.f32 %v3255_v41, %v1663_v61 }
 0x9af   :  { %v1672_v59 = vpack.c.bf16 %v1671_v48, %v1671_v48 }
 0x9b1   :  { %v1675_v1 = vrot.slane %v1672_v59, 2 }
 0x9b3   :  { %2987 = vmatmul.mubr.bf16.vlgmr.msra.gmra.mxu0 %v1675_v1  ;;  %1784 = vmatmul.mubr.bf16.vlgmr.msra.gmra.mxu1 %v1675_v1 }
 0x9b4   :  { %1793 = vmatpush1.bf16.msra.mxu0 %v3963_v5  ;;  %1824 = vmatprep.mubr.bf16.mxu0 %v4911_v56 }
 0x9b5   :  { %1794 = vmatprep.subr.bf16.mxu0 %v3967_v0  ;;  %2991 = vmatpush3.bf16.msra.mxu1 %v4117_v27 }
 0x9b6   :  { %2992 = vmatprep.subr.bf16.mxu1 %v4912_v53  ;;  %3006 = vmatprep.mubr.msk.bf16.mxu1 %vm3487_vm0, %v4912_v53 }
 0x9b8   :  { %1795 = vmatpush1.bf16.msra.mxu0 %v3974_v7 }
 0x9b9   :  { %1796 = vmatprep.subr.bf16.mxu0 %v3977_v10  ;;  %2993 = vmatpush3.bf16.msra.mxu1 %v4128_v33 }
 0x9ba   :  { %2994 = vmatprep.subr.bf16.mxu1 %v4912_v53 }
 0x9bc   :  { %1797 = vmatpush1.bf16.msra.mxu0 %v3983_v34 }
 0x9bd   :  { %1798 = vmatprep.subr.bf16.mxu0 %v3986_v13  ;;  %2995 = vmatpush3.bf16.msra.mxu1 %v4137_v4 }
 0x9be   :  { %2996 = vmatprep.subr.bf16.mxu1 %v4912_v53 }
 0x9c0   :  { %1799 = vmatpush1.bf16.msra.mxu0 %v3991_v14 }
 0x9c1   :  { %1800 = vmatprep.subr.bf16.mxu0 %v3994_v36  ;;  %2997 = vmatpush3.bf16.msra.mxu1 %v4146_v6 }
 0x9c2   :  { %2998 = vmatprep.subr.bf16.mxu1 %v4912_v53 }
 0x9c4   :  { %1801 = vmatpush1.bf16.msra.mxu0 %v3999_v9 }
 0x9c5   :  { %1802 = vmatprep.subr.bf16.mxu0 %v4002_v37  ;;  %2999 = vmatpush3.bf16.msra.mxu1 %v4155_v38 }
 0x9c6   :  { %3000 = vmatprep.subr.bf16.mxu1 %v4912_v53 }
 0x9c8   :  { %1803 = vmatpush1.bf16.msra.mxu0 %v4007_v15 }
 0x9c9   :  { %1804 = vmatprep.subr.bf16.mxu0 %v4010_v16  ;;  %3001 = vmatpush3.bf16.msra.mxu1 %v4164_v21 }
 0x9ca   :  { %3002 = vmatprep.subr.bf16.mxu1 %v4912_v53 }
 0x9cc   :  { %1805 = vmatpush1.bf16.msra.mxu0 %v4015_v17 }
 0x9cd   :  { %1806 = vmatprep.subr.bf16.mxu0 %v4018_v40  ;;  %3003 = vmatpush3.bf16.msra.mxu1 %v4173_v45 }
 0x9ce   :  { %3004 = vmatprep.subr.bf16.mxu1 %v4912_v53 }
 0x9d0   :  { %1807 = vmatpush1.bf16.msra.mxu0 %v4177_v20 }
 0x9d1   :  { %v4319_v12 = vpop.permute.xlu1 %1164  ;;  %1953 = vmatprep.subr.bf16.mxu0 %v4024_v19  ;;  %3005 = vmatpush3.bf16.msra.mxu1 %v4184_v54 }
 0x9d2   :  { %4939 = vst [vmem:[#allocation23_spill] sm:$0xff] %v4319_v12  ;;  %v1280_v39 = vmul.f32 %v4326_v49, %v4319_v12  ;;  %1994 = vmatprep.subr.bf16.mxu1 %v4028_v42 }
 0x9d3   :  { %1825 = vmatmul.mubr.bf16.vlgmr.msra.gmra.mxu0 %v1675_v1 }
 0x9d4   :  { %v1316_v50 = vadd.f32 %v4941_v2, %v1280_v39  ;;  %1954 = vmatpush1.bf16.msra.mxu0 %v4031_v22  ;;  %1985 = vmatprep.mubr.bf16.mxu0 %v4911_v56 }
 0x9d5   :  { %1955 = vmatprep.subr.bf16.mxu0 %v4035_v44 }
 0x9d6   :  { %v1321_v52 = vadd.f32 %v4338_v58, %v1316_v50 }
 0x9d8   :  { %3256 = vtanh.f32 %v1321_v52  ;;  %1956 = vmatpush1.bf16.msra.mxu0 %v4039_v51  ;;  %v1322_v62 = vmul.f32 0.5, %v1321_v52 }
 0x9d9   :  { %1957 = vmatprep.subr.bf16.mxu0 %v4042_v23 }
 0x9da   :  { %3258 = vtanh.f32 %v1322_v62 }
 0x9dc   :  { %1958 = vmatpush1.bf16.msra.mxu0 %v4045_v24 }
 0x9dd   :  { %1959 = vmatprep.subr.bf16.mxu0 %v4048_v25 }
 0x9e0   :  { %1960 = vmatpush1.bf16.msra.mxu0 %v4051_v26 }
 0x9e1   :  { %1961 = vmatprep.subr.bf16.mxu0 %v4054_v28 }
 0x9e4   :  { %1962 = vmatpush1.bf16.msra.mxu0 %v4057_v29 }
 0x9e5   :  { %v3257_v18 = vpop.eup %3256  ;;  %1963 = vmatprep.subr.bf16.mxu0 %v4060_v30 }
 0x9e6   :  { %1329 = vrot.lane.b32.xlu0 %v3257_v18, %s3488_s1  ;;  %v1748_v18 = vld [vmem:[#allocation2 + $0x20] sm:$0xc0] }
 0x9e7   :  { %v3259_v63 = vpop.eup %3258 }
 0x9e8   :  { %1964 = vmatpush1.bf16.msra.mxu0 %v4063_v31  ;;  %v1324_v47 = vmul.f32 0.5, %v3259_v63  ;;  %v1747_v63 = vld [vmem:[#allocation2 + $0x8] sm:$0xc0] }
 0x9e9   :  { %1965 = vmatprep.subr.bf16.mxu0 %v4066_v32 }
 0x9ea   :  { %v4356_v3 = vadd.f32 0.5, %v1324_v47 }
 0x9ec   :  { %1966 = vmatpush1.bf16.msra.mxu0 %v4069_v35 }
 0x9ed   :  { %1967 = vmatprep.subr.bf16.mxu0 %v4936_v55 }
 0x9f0   :  { %1968 = vmatpush1.bf16.msra.mxu0 %v4937_v46 }
 0x9f1   :  { %3010 = vmatprep.subr.bf16.mxu0 %v4912_v53 }
 0xa58   :  { %v1330_v43 = vpop.permute.xlu0 %1329 }
 0xa59   :  { %v1332_v8 = vmul.f32 %v1330_v43, %v4356_v3 }
 0xa5b   :  { %1334 = vrot.lane.b32.xlu1 %v1332_v8, %s3489_s8 }
 0xa73   :  { %v4360_v60 = vpop.f32.mrf.mxu0  ;;  %v1785_v61 = vpop.f32.mrf.mxu1 }
 0xa74   :  { %4943 = vst [vmem:[#allocation25_spill] sm:$0xff] %v4360_v60  ;;  %v1837_v52 = vrot.slane %v1785_v61, 2  ;;  %v1749_v60 = vld [vmem:[#allocation2 + $0x28] sm:$0xc0] }
 0xa75   :  { %v2988_v41 = vpop.f32.mrf.mxu0  ;;  %v1787_v48 = vpop.f32.mrf.mxu1 }
 0xa76   :  { %v1838_v50 = vrot.slane %v1787_v48, 2  ;;  %v1845_v47 = vadd.f32 %v1837_v52, %v1747_v63 }
 0xa77   :  { %v1714_v59 = vpop.f32.mrf.mxu0  ;;  %v1789_v1 = vpop.f32.mrf.mxu1 }
 0xa78   :  { %v1846_v62 = vadd.f32 %v1838_v50, %v1748_v18  ;;  %v1849_v58 = vmul.f32 0.5, %v1845_v47  ;;  %v1750_v1 = vld [vmem:[#allocation2 + $0x38] sm:$0xc0] }
 0xa79   :  { %v2989_v39 = vpop.f32.mrf.mxu0  ;;  %v1790_v2 = vpop.f32.mrf.mxu1 }
 0xa7a   :  { %v1853_v12 = vmul.f32 0.5, %v1846_v62 }
 0xa7c   :  { %3260 = vtanh.f32 %v1853_v12 }
 0xa7d   :  { %3262 = vtanh.f32 %v1849_v58  ;;  %v1863_v58 = vrot.slane %v4284_v57, 6 }
 0xa89   :  { %v3261_v61 = vpop.eup %3260 }
 0xa8a   :  { %v3263_v2 = vpop.eup %3262  ;;  %v1855_v50 = vmul.f32 0.5, %v3261_v61 }
 0xa8b   :  { %v1851_v52 = vmul.f32 0.5, %v3263_v2 }
 0xa8c   :  { %v1856_v62 = vadd.f32 0.5, %v1855_v50 }
 0xa8d   :  { %v1852_v12 = vadd.f32 0.5, %v1851_v52 }
 0xa8e   :  { %v1865_v47 = vmul.f32 %v1863_v58, %v1856_v62 }
 0xa93   :  { %v1826_v43 = vpop.f32.mrf.mxu0 }
 0xa94   :  { %v1839_v8 = vrot.slane %v1826_v43, 2 }
 0xa95   :  { %v1828_v49 = vpop.f32.mrf.mxu0 }
 0xa96   :  { %v1847_v41 = vadd.f32 %v1839_v8, %v1749_v60  ;;  %v1840_v46 = vrot.slane %v1828_v49, 2 }
 0xa97   :  { %v1830_v59 = vpop.f32.mrf.mxu0 }
 0xa98   :  { %3264 = vtanh.f32 %v1847_v41  ;;  %v1848_v48 = vadd.f32 %v1840_v46, %v1750_v1 }
 0xa99   :  { %v1831_v39 = vpop.f32.mrf.mxu0 }
 0xa9a   :  { %v1858_v18 = vmul.f32 0.5, %v1848_v48 }
 0xa9c   :  { %3266 = vtanh.f32 %v1858_v18 }
 0xaa5   :  { %v3265_v63 = vpop.eup %3264 }
 0xaa6   :  { %v1866_v43 = vmul.f32 %v3265_v63, %v1852_v12 }
 0xaa8   :  { %v4363_v60 = vadd.f32 %v1866_v43, %v1865_v47 }
 0xaa9   :  { %v3267_v49 = vpop.eup %3266 }
 0xaaa   :  { %3268 = vtanh.f32 %v4363_v60  ;;  %v1860_v8 = vmul.f32 0.5, %v3267_v49 }
 0xaac   :  { %v1861_v46 = vadd.f32 0.5, %v1860_v8 }
 0xab7   :  { %v3269_v41 = vpop.eup %3268 }
 0xab8   :  { %v1869_v59 = vmul.f32 %v3269_v41, %v1861_v46 }
 0xaba   :  { %v1870_v1 = vpack.c.bf16 %v1869_v59, %v1869_v59 }
 0xabc   :  { %v1873_v39 = vrot.slane %v1870_v1, 3 }
 0xabe   :  { %3007 = vmatmul.mubr.bf16.vlgmr.msra.gmra.mxu1 %v1873_v39  ;;  %1986 = vmatmul.mubr.bf16.vlgmr.msra.gmra.mxu0 %v1873_v39 }
 0xabf   :  { %1995 = vmatpush1.bf16.msra.mxu1 %v3963_v5  ;;  %2026 = vmatprep.mubr.bf16.mxu1 %v4911_v56  ;;  %v1327_v5 = vmul.f32 %v4356_v3, %v4264_v11 }
 0xac0   :  { %1996 = vmatprep.subr.bf16.mxu1 %v3967_v0  ;;  %3011 = vmatpush3.bf16.msra.mxu0 %v4117_v27 }
 0xac1   :  { %3012 = vmatprep.subr.bf16.mxu0 %v4912_v53  ;;  %3026 = vmatprep.mubr.msk.bf16.mxu0 %vm3487_vm0, %v4912_v53 }
 0xac3   :  { %1997 = vmatpush1.bf16.msra.mxu1 %v3974_v7 }
 0xac4   :  { %1998 = vmatprep.subr.bf16.mxu1 %v3977_v10  ;;  %3013 = vmatpush3.bf16.msra.mxu0 %v4128_v33 }
 0xac5   :  { %3014 = vmatprep.subr.bf16.mxu0 %v4912_v53 }
 0xac7   :  { %1999 = vmatpush1.bf16.msra.mxu1 %v3983_v34  ;;  %v4944_v34 = vld [vmem:[#allocation20_spill] sm:$0xff] }
 0xac8   :  { %2000 = vmatprep.subr.bf16.mxu1 %v3986_v13  ;;  %3015 = vmatpush3.bf16.msra.mxu0 %v4137_v4 }
 0xac9   :  { %3016 = vmatprep.subr.bf16.mxu0 %v4912_v53 }
 0xacb   :  { %2001 = vmatpush1.bf16.msra.mxu1 %v3991_v14 }
 0xacc   :  { %2002 = vmatprep.subr.bf16.mxu1 %v3994_v36  ;;  %3017 = vmatpush3.bf16.msra.mxu0 %v4146_v6 }
 0xacd   :  { %v1335_v0 = vpop.permute.xlu1 %1334  ;;  %3018 = vmatprep.subr.bf16.mxu0 %v4912_v53 }
 0xace   :  { %v4387_v7 = vadd.f32 %v1335_v0, %v1327_v5 }
 0xacf   :  { %2003 = vmatpush1.bf16.msra.mxu1 %v3999_v9 }
 0xad0   :  { %3270 = vtanh.f32 %v4387_v7  ;;  %2004 = vmatprep.subr.bf16.mxu1 %v4002_v37  ;;  %3019 = vmatpush3.bf16.msra.mxu0 %v4155_v38 }
 0xad1   :  { %3020 = vmatprep.subr.bf16.mxu0 %v4912_v53 }
 0xad3   :  { %2005 = vmatpush1.bf16.msra.mxu1 %v4007_v15 }
 0xad4   :  { %2006 = vmatprep.subr.bf16.mxu1 %v4010_v16  ;;  %3021 = vmatpush3.bf16.msra.mxu0 %v4164_v21 }
 0xad5   :  { %3022 = vmatprep.subr.bf16.mxu0 %v4912_v53 }
 0xad7   :  { %2007 = vmatpush1.bf16.msra.mxu1 %v4015_v17 }
 0xad8   :  { %2008 = vmatprep.subr.bf16.mxu1 %v4018_v40  ;;  %3023 = vmatpush3.bf16.msra.mxu0 %v4173_v45 }
 0xad9   :  { %3024 = vmatprep.subr.bf16.mxu0 %v4912_v53 }
 0xadb   :  { %2009 = vmatpush1.bf16.msra.mxu1 %v4177_v20 }
 0xadc   :  { %2140 = vmatprep.subr.bf16.mxu1 %v4024_v19  ;;  %3025 = vmatpush3.bf16.msra.mxu0 %v4184_v54 }
 0xadd   :  { %v3271_v10 = vpop.eup %3270  ;;  %2181 = vmatprep.subr.bf16.mxu0 %v4028_v42 }
 0xade   :  { %2027 = vmatmul.mubr.bf16.vlgmr.msra.gmra.mxu1 %v1873_v39  ;;  %1340 = vrot.lane.b32.xlu0 %v3271_v10, %s3491_s9 }
 0xadf   :  { %2141 = vmatpush1.bf16.msra.mxu1 %v4031_v22  ;;  %2172 = vmatprep.mubr.bf16.mxu1 %v4911_v56 }
 0xae0   :  { %2142 = vmatprep.subr.bf16.mxu1 %v4035_v44 }
 0xae3   :  { %2143 = vmatpush1.bf16.msra.mxu1 %v4039_v51 }
 0xae4   :  { %2144 = vmatprep.subr.bf16.mxu1 %v4042_v23 }
 0xae7   :  { %2145 = vmatpush1.bf16.msra.mxu1 %v4045_v24  ;;  %v4946_v24 = vld [vmem:[#allocation24_spill] sm:$0xff] }
 0xae8   :  { %2146 = vmatprep.subr.bf16.mxu1 %v4048_v25 }
 0xaeb   :  { %2147 = vmatpush1.bf16.msra.mxu1 %v4051_v26  ;;  %v4947_v26 = vld [vmem:[#allocation17_spill] sm:$0xff] }
 0xaec   :  { %2148 = vmatprep.subr.bf16.mxu1 %v4054_v28 }
 0xaef   :  { %2149 = vmatpush1.bf16.msra.mxu1 %v4057_v29  ;;  %v4948_v29 = vld [vmem:[#allocation22_spill] sm:$0xff] }
 0xaf0   :  { %2150 = vmatprep.subr.bf16.mxu1 %v4060_v30 }
 0xaf3   :  { %2151 = vmatpush1.bf16.msra.mxu1 %v4063_v31 }
 0xaf4   :  { %2152 = vmatprep.subr.bf16.mxu1 %v4066_v32 }
 0xaf7   :  { %2153 = vmatpush1.bf16.msra.mxu1 %v4069_v35 }
 0xaf8   :  { %2154 = vmatprep.subr.bf16.mxu1 %v4936_v55 }
 0xafb   :  { %2155 = vmatpush1.bf16.msra.mxu1 %v4944_v34 }
 0xafc   :  { %3030 = vmatprep.subr.bf16.mxu1 %v4912_v53 }
 0xb50   :  { %v1341_v13 = vpop.permute.xlu0 %1340 }
 0xb51   :  { %v1343_v14 = vmul.f32 %v1341_v13, %v4356_v3  ;;  %v4950_v3 = vld [vmem:[#allocation25_spill] sm:$0xff] }
 0xb53   :  { %1347 = vperm.xlu1 %3103, %v1343_v14  }
 0xb7e   :  { %v1909_v36 = vpop.f32.mrf.mxu1  ;;  %v4425_v9 = vpop.f32.mrf.mxu0 }
 0xb80   :  { %v3008_v37 = vpop.f32.mrf.mxu1  ;;  %v4427_v15 = vpop.f32.mrf.mxu0 }
 0xb82   :  { %v1912_v16 = vpop.f32.mrf.mxu1  ;;  %v1991_v17 = vpop.f32.mrf.mxu0 }
 0xb84   :  { %v3009_v40 = vpop.f32.mrf.mxu1  ;;  %v1992_v19 = vpop.f32.mrf.mxu0 }
 0xb9e   :  { %v4429_v42 = vpop.f32.mrf.mxu1 }
 0xba0   :  { %v4431_v22 = vpop.f32.mrf.mxu1 }
 0xba2   :  { %v2032_v44 = vpop.f32.mrf.mxu1 }
 0xba4   :  { %v2033_v51 = vpop.f32.mrf.mxu1 }
 0xba5   :  { %v4953_v51 = vld [vmem:[#allocation9_spill] sm:$0xff] }
 0xbce   :  { %v4433_v23 = vpop.permute.xlu1 %1347 }
 0xbcf   :  { %4945 = vst [vmem:[#allocation20_spill] sm:$0xff] %v4433_v23  ;;  %v1475_v25 = vmul.f32 %v4946_v24, %v4433_v23 }
 0xbd1   :  { %v1514_v28 = vadd.f32 %v4947_v26, %v1475_v25  ;;  %v4954_v26 = vld [vmem:[#allocation10_spill] sm:$0xff] }
 0xbd3   :  { %v1519_v30 = vadd.f32 %v4948_v29, %v1514_v28 }
 0xbd5   :  { %3272 = vtanh.f32 %v1519_v30  ;;  %v1520_v32 = vmul.f32 0.5, %v1519_v30  ;;  %v4955_v30 = vld [vmem:[#allocation11_spill] sm:$0xff] }
 0xbd7   :  { %3274 = vtanh.f32 %v1520_v32  ;;  %v4956_v32 = vld [vmem:[#allocation13_spill] sm:$0xff] }
 0xbe2   :  { %v3273_v31 = vpop.eup %3272 }
 0xbe3   :  { %1527 = vrot.lane.b32.xlu0 %v3273_v31, %s3488_s1 }
 0xbe4   :  { %v3275_v35 = vpop.eup %3274 }
 0xbe5   :  { %v1522_v27 = vmul.f32 0.5, %v3275_v35 }
 0xbe7   :  { %v1523_v33 = vadd.f32 0.5, %v1522_v27  ;;  %v4957_v27 = vld [vmem:[#allocation14_spill] sm:$0xff] }
 0xbe9   :  { %v1525_v38 = vmul.f32 %v1523_v33, %v4387_v7 }
 0xc55   :  { %v1528_v4 = vpop.permute.xlu0 %1527 }
 0xc56   :  { %v1530_v6 = vmul.f32 %v1528_v4, %v1523_v33  ;;  %v4958_v4 = vld [vmem:[#allocation15_spill] sm:$0xff] }
 0xc58   :  { %1532 = vrot.lane.b32.xlu1 %v1530_v6, %s3489_s8 }
 0xcca   :  { %v1533_v21 = vpop.permute.xlu1 %1532 }
 0xccb   :  { %v1535_v45 = vadd.f32 %v1533_v21, %v1525_v38 }
 0xccd   :  { %3276 = vtanh.f32 %v1535_v45 }
 0xcda   :  { %v3277_v20 = vpop.eup %3276 }
 0xcdb   :  { %1538 = vrot.lane.b32.xlu0 %v3277_v20, %s3491_s9 }
 0xd4d   :  { %v1539_v54 = vpop.permute.xlu0 %1538 }
 0xd4e   :  { %v1541_v11 = vmul.f32 %v1539_v54, %v1523_v33  ;;  %v4959_v54 = vld [vmem:[#allocation12_spill] sm:$0xff] }
 0xd50   :  { %1545 = vperm.xlu1 %3103, %v1541_v11  }
 0xdcb   :  { %v4443_v55 = vpop.permute.xlu1 %1545 }
 0xdcc   :  { %4949 = vst [vmem:[#allocation17_spill] sm:$0xff] %v4443_v55  ;;  %v1673_v57 = vmul.f32 %v4946_v24, %v4443_v55 }
 0xdce   :  { %v1712_v48 = vadd.f32 %v4950_v3, %v1673_v57  ;;  %v4960_v3 = vld [vmem:[#allocation16_spill] sm:$0xff] }
 0xdd0   :  { %v1717_v61 = vadd.f32 %v4948_v29, %v1712_v48 }
 0xdd2   :  { %3278 = vtanh.f32 %v1717_v61  ;;  %v1718_v50 = vmul.f32 0.5, %v1717_v61 }
 0xdd4   :  { %3280 = vtanh.f32 %v1718_v50 }
 0xddf   :  { %v3279_v2 = vpop.eup %3278 }
 0xde0   :  { %1725 = vrot.lane.b32.xlu0 %v3279_v2, %s3488_s1 }
 0xde1   :  { %v3281_v18 = vpop.eup %3280 }
 0xde2   :  { %v1720_v52 = vmul.f32 0.5, %v3281_v18 }
 0xde4   :  { %v1721_v62 = vadd.f32 0.5, %v1720_v52 }
 0xde6   :  { %v1723_v63 = vmul.f32 %v1721_v62, %v1535_v45 }
 0xe52   :  { %v1726_v12 = vpop.permute.xlu0 %1725 }
 0xe53   :  { %v1728_v58 = vmul.f32 %v1726_v12, %v1721_v62  ;;  %v2053_v12 = vrot.slane %v4363_v60, 6  ;;  %v4489_v60 = vld [vmem:[#allocation3 + $0xcc] ss:$16 sps:$4 sm:$0xff]  }
 0xe55   :  { %1730 = vrot.lane.b32.xlu1 %v1728_v58, %s3489_s8 }
 0xec7   :  { %v1731_v47 = vpop.permute.xlu1 %1730 }
 0xec8   :  { %v1733_v43 = vadd.f32 %v1731_v47, %v1723_v63 }
 0xeca   :  { %3282 = vtanh.f32 %v1733_v43 }
 0xed7   :  { %v3283_v49 = vpop.eup %3282 }
 0xed8   :  { %1736 = vrot.lane.b32.xlu0 %v3283_v49, %s3491_s9 }
 0xf4a   :  { %v1737_v8 = vpop.permute.xlu0 %1736 }
 0xf4b   :  { %v1739_v46 = vmul.f32 %v1737_v8, %v1721_v62 }
 0xf4d   :  { %1743 = vperm.xlu1 %3103, %v1739_v46  }
 0xfc8   :  { %v4452_v41 = vpop.permute.xlu1 %1743 }
 0xfc9   :  { %4951 = vst [vmem:[#allocation22_spill] sm:$0xff] %v4452_v41  ;;  %v1871_v59 = vmul.f32 %v4946_v24, %v4452_v41 }
 0xfcb   :  { %v1910_v1 = vadd.f32 %v1909_v36, %v1871_v59 }
 0xfcd   :  { %v1915_v39 = vadd.f32 %v4948_v29, %v1910_v1  ;;  %v4485_v1 = vld [vmem:[#allocation3 + $0xe8] ss:$16 sps:$4 sm:$0xff]  }
 0xfcf   :  { %3284 = vtanh.f32 %v1915_v39  ;;  %v1916_v0 = vmul.f32 0.5, %v1915_v39  ;;  %v4495_v39 = vld [vmem:[%s4843_s4 + $0x38] sm:$0xff]  }
 0xfd1   :  { %3286 = vtanh.f32 %v1916_v0  ;;  %v4504_v0 = vld [vmem:[#allocation3 + $0xac] ss:$16 sps:$4 sm:$0xff]  }
 0xfdc   :  { %v3285_v5 = vpop.eup %3284 }
 0xfdd   :  { %1923 = vrot.lane.b32.xlu0 %v3285_v5, %s3488_s1  ;;  %v4501_v5 = vld [vmem:[#allocation3 + $0xc8] ss:$16 sps:$4 sm:$0xff]  }
 0xfde   :  { %v3287_v7 = vpop.eup %3286 }
 0xfdf   :  { %v1918_v10 = vmul.f32 0.5, %v3287_v7  ;;  %v4510_v7 = vld [vmem:[%s4843_s4 + $0x30] sm:$0xff]  }
 0xfe1   :  { %v1919_v34 = vadd.f32 0.5, %v1918_v10  ;;  %v4514_v10 = vld [vmem:[#allocation3 + $0xa8] ss:$16 sps:$4 sm:$0xff]  }
 0xfe3   :  { %v1921_v37 = vmul.f32 %v1919_v34, %v1733_v43 }
0x104f   :  { %v1924_v13 = vpop.permute.xlu0 %1923 }
0x1050   :  { %v1926_v14 = vmul.f32 %v1924_v13, %v1919_v34  ;;  %v4523_v13 = vld [vmem:[%s4843_s4 + $0x28] sm:$0xff]  }
0x1052   :  { %1928 = vrot.lane.b32.xlu1 %v1926_v14, %s3489_s8  ;;  %v4527_v14 = vld [vmem:[#allocation3 + $0x88] ss:$16 sps:$4 sm:$0xff]  }
0x10c4   :  { %v1929_v16 = vpop.permute.xlu1 %1928 }
0x10c5   :  { %v4459_v17 = vadd.f32 %v1929_v16, %v1921_v37  ;;  %v4530_v37 = vld [vmem:[#allocation3 + $0x6c] ss:$16 sps:$4 sm:$0xff]   ;;  %v4536_v16 = vld [vmem:[%s4843_s4 + $0x20] sm:$0xff]  }
0x10c7   :  { %3288 = vtanh.f32 %v4459_v17 }
0x10d4   :  { %v3289_v36 = vpop.eup %3288 }
0x10d5   :  { %1934 = vrot.lane.b32.xlu0 %v3289_v36, %s3491_s9  ;;  %v4540_v36 = vld [vmem:[#allocation3 + $0x68] ss:$16 sps:$4 sm:$0xff]  }
0x1147   :  { %v1935_v40 = vpop.permute.xlu0 %1934 }
0x1148   :  { %v1937_v19 = vmul.f32 %v1935_v40, %v1919_v34  ;;  %v4517_v34 = vld [vmem:[#allocation3 + $0x8c] ss:$16 sps:$4 sm:$0xff]  }
0x1149   :  { %v4543_v40 = vld [vmem:[#allocation3 + $0x4c] ss:$16 sps:$4 sm:$0xff]  }
0x114a   :  { %1941 = vperm.xlu1 %3103, %v1937_v19   ;;  %v4549_v19 = vld [vmem:[%s4843_s4 + $0x18] sm:$0xff]  }
0x11c5   :  { %v4463_v44 = vpop.permute.xlu1 %1941 }
0x11c6   :  { %4952 = vst [vmem:[#allocation25_spill] sm:$0xff] %v4463_v44  ;;  %v1945_v25 = vmul.f32 %v4463_v44, %v4953_v51  ;;  %v1946_v28 = vmul.f32 %v4463_v44, %v4954_v26  ;;  %v1947_v31 = vmul.f32 %v4463_v44, %v4955_v30  ;;  %v1948_v11 = vmul.f32 %v4463_v44, %v4959_v54 }
0x11c8   :  { %v1949_v35 = vadd.f32 %v1945_v25, %v4956_v32  ;;  %v1950_v33 = vadd.f32 %v1946_v28, %v4957_v27  ;;  %v1951_v6 = vadd.f32 %v1947_v31, %v4958_v4  ;;  %v1952_v48 = vadd.f32 %v1948_v11, %v4960_v3  ;;  %v4553_v25 = vld [vmem:[#allocation3 + $0x48] ss:$16 sps:$4 sm:$0xff]   ;;  %v4556_v28 = vld [vmem:[#allocation3 + $0x2c] ss:$16 sps:$4 sm:$0xff]   ;;  %v4562_v31 = vld [vmem:[%s4843_s4 + $0x10] sm:$0xff]  }
0x11c9   :  { %v4594_v11 = vld [vmem:[#allocation3 + $0xe0] ss:$16 sps:$4 sm:$0xff]  }
0x11ca   :  { %v2035_v38 = vadd.f32 %v4425_v9, %v1949_v35  ;;  %v2036_v21 = vadd.f32 %v4427_v15, %v1950_v33  ;;  %v2037_v57 = vadd.f32 %v4429_v42, %v1951_v6  ;;  %v2038_v61 = vadd.f32 %v4431_v22, %v1952_v48  ;;  %v4566_v35 = vld [vmem:[#allocation3 + $0x28] ss:$16 sps:$4 sm:$0xff]   ;;  %v4569_v33 = vld [vmem:[#allocation3 + $0xc] ss:$16 sps:$4 sm:$0xff]   ;;  %v4601_v48 = vld [vmem:[#allocation3 + $0xc0] ss:$16 sps:$4 sm:$0xff]  }
0x11cb   :  { %v4575_v6 = vld [vmem:[%s4843_s4 + $0x8] sm:$0xff]  }
0x11cc   :  { %v2039_v45 = vmul.f32 0.5, %v2035_v38  ;;  %v2043_v20 = vmul.f32 0.5, %v2036_v21  ;;  %v2048_v2 = vmul.f32 0.5, %v2038_v61  ;;  %v4579_v38 = vld [vmem:[#allocation3 + $0x8] ss:$16 sps:$4 sm:$0xff]  }
0x11cd   :  { %v4582_v21 = vld [vmem:[#allocation3 + $0xe4] ss:$16 sps:$4 sm:$0xff]  }
0x11ce   :  { %3290 = vtanh.f32 %v2039_v45  ;;  %v4588_v45 = vld [vmem:[%s4843_s4] sm:$0xff]  }
0x11cf   :  { %3292 = vtanh.f32 %v2043_v20  ;;  %v4591_v20 = vld [vmem:[#allocation3 + $0xec] ss:$16 sps:$4 sm:$0xff]   ;;  %v4604_v61 = vld [vmem:[#allocation3 + $0xa4] ss:$16 sps:$4 sm:$0xff]  }
0x11d0   :  { %3294 = vtanh.f32 %v2037_v57  ;;  %v4598_v57 = vld [vmem:[#allocation3 + $0xc4] ss:$16 sps:$4 sm:$0xff]  }
0x11d1   :  { %3296 = vtanh.f32 %v2048_v2  ;;  %v4607_v2 = vld [vmem:[#allocation3 + $0xa0] ss:$16 sps:$4 sm:$0xff]  }
0x11db   :  { %v3291_v50 = vpop.eup %3290 }
0x11dc   :  { %v3293_v18 = vpop.eup %3292  ;;  %v2041_v9 = vmul.f32 0.5, %v3291_v50  ;;  %v4610_v50 = vld [vmem:[#allocation3 + $0x84] ss:$16 sps:$4 sm:$0xff]  }
0x11dd   :  { %v2045_v52 = vmul.f32 0.5, %v3293_v18  ;;  %v3295_v62 = vpop.eup %3294  ;;  %v4613_v18 = vld [vmem:[#allocation3 + $0x80] ss:$16 sps:$4 sm:$0xff]  }
0x11de   :  { %v2042_v15 = vadd.f32 0.5, %v2041_v9  ;;  %v3297_v43 = vpop.eup %3296  ;;  %v4616_v9 = vld [vmem:[#allocation3 + $0x64] ss:$16 sps:$4 sm:$0xff]  }
0x11df   :  { %v2046_v58 = vadd.f32 0.5, %v2045_v52  ;;  %v2050_v49 = vmul.f32 0.5, %v3297_v43  ;;  %4961 = vst [vmem:[#allocation9_spill] sm:$0xff] %v4616_v9  ;;  %v4619_v52 = vld [vmem:[#allocation3 + $0x60] ss:$16 sps:$4 sm:$0xff]   ;;  %v2061_v43 = vmul.f32 %v4946_v24, %v4463_v44 }
0x11e0   :  { %v2056_v63 = vmul.f32 %v3295_v62, %v2042_v15  ;;  %4962 = vst [vmem:[#allocation10_spill] sm:$0xff] %v4619_v52  ;;  %v4622_v15 = vld [vmem:[#allocation3 + $0x44] ss:$16 sps:$4 sm:$0xff]   ;;  %v4625_v62 = vld [vmem:[#allocation3 + $0x40] ss:$16 sps:$4 sm:$0xff]  }
0x11e1   :  { %v2055_v42 = vmul.f32 %v2053_v12, %v2046_v58  ;;  %v2051_v22 = vadd.f32 0.5, %v2050_v49  ;;  %4963 = vst [vmem:[#allocation15_spill] sm:$0xff] %v4622_v15  ;;  %4964 = vst [vmem:[#allocation12_spill] sm:$0xff] %v4625_v62  ;;  %v4628_v12 = vld [vmem:[#allocation3 + $0x24] ss:$16 sps:$4 sm:$0xff]  }
0x11e2   :  { %4965 = vst [vmem:[#allocation16_spill] sm:$0xff] %v4628_v12  ;;  %v4631_v58 = vld [vmem:[#allocation3 + $0x20] ss:$16 sps:$4 sm:$0xff]  }
0x11e3   :  { %v4482_v47 = vadd.f32 %v2056_v63, %v2055_v42  ;;  %4966 = vst [vmem:[#allocation26_spill] sm:$0xff] %v4631_v58  ;;  %v4634_v63 = vld [vmem:[#allocation3 + $0x4] ss:$16 sps:$4 sm:$0xff]   ;;  %v4637_v42 = vld [vmem:[#allocation3] ss:$16 sps:$4 sm:$0xff]  }
0x11e4   :  { %4967 = vst [vmem:[#allocation27_spill] sm:$0xff] %v4634_v63  ;;  %4968 = vst [vmem:[#allocation28_spill] sm:$0xff] %v4637_v42 }
0x11e5   :  { %3298 = vtanh.f32 %v4482_v47 }
0x11f2   :  { %v3299_v8 = vpop.eup %3298 }
0x11f3   :  { %v2059_v46 = vmul.f32 %v3299_v8, %v2051_v22 }
0x11f5   :  { %v2060_v59 = vpack.c.bf16 %v2059_v46, %v2059_v46 }
0x11f7   :  { %3027 = vmatmul.mubr.bf16.vlgmr.msra.gmra.mxu0 %v2060_v59  ;;  %2173 = vmatmul.mubr.bf16.vlgmr.msra.gmra.mxu1 %v2060_v59 }
0x11f8   :  { %2182 = vmatpush1.bf16.msra.mxu0 %v4485_v1  ;;  %2213 = vmatprep.mubr.bf16.mxu0 %v4911_v56 }
0x11f9   :  { %2183 = vmatprep.subr.bf16.mxu0 %v4489_v60  ;;  %3031 = vmatpush3.bf16.msra.mxu1 %v4495_v39 }
0x11fa   :  { %3032 = vmatprep.subr.bf16.mxu1 %v4912_v53  ;;  %3046 = vmatprep.mubr.msk.bf16.mxu1 %vm3487_vm0, %v4912_v53 }
0x11fc   :  { %2184 = vmatpush1.bf16.msra.mxu0 %v4501_v5 }
0x11fd   :  { %2185 = vmatprep.subr.bf16.mxu0 %v4504_v0  ;;  %3033 = vmatpush3.bf16.msra.mxu1 %v4510_v7 }
0x11fe   :  { %3034 = vmatprep.subr.bf16.mxu1 %v4912_v53 }
0x1200   :  { %2186 = vmatpush1.bf16.msra.mxu0 %v4514_v10 }
0x1201   :  { %2187 = vmatprep.subr.bf16.mxu0 %v4517_v34  ;;  %3035 = vmatpush3.bf16.msra.mxu1 %v4523_v13 }
0x1202   :  { %3036 = vmatprep.subr.bf16.mxu1 %v4912_v53 }
0x1204   :  { %2188 = vmatpush1.bf16.msra.mxu0 %v4527_v14 }
0x1205   :  { %2189 = vmatprep.subr.bf16.mxu0 %v4530_v37  ;;  %3037 = vmatpush3.bf16.msra.mxu1 %v4536_v16 }
0x1206   :  { %3038 = vmatprep.subr.bf16.mxu1 %v4912_v53 }
0x1208   :  { %2190 = vmatpush1.bf16.msra.mxu0 %v4540_v36 }
0x1209   :  { %2191 = vmatprep.subr.bf16.mxu0 %v4543_v40  ;;  %3039 = vmatpush3.bf16.msra.mxu1 %v4549_v19 }
0x120a   :  { %3040 = vmatprep.subr.bf16.mxu1 %v4912_v53 }
0x120c   :  { %2192 = vmatpush1.bf16.msra.mxu0 %v4553_v25 }
0x120d   :  { %2193 = vmatprep.subr.bf16.mxu0 %v4556_v28  ;;  %3041 = vmatpush3.bf16.msra.mxu1 %v4562_v31 }
0x120e   :  { %3042 = vmatprep.subr.bf16.mxu1 %v4912_v53 }
0x1210   :  { %2194 = vmatpush1.bf16.msra.mxu0 %v4566_v35 }
0x1211   :  { %2195 = vmatprep.subr.bf16.mxu0 %v4569_v33  ;;  %3043 = vmatpush3.bf16.msra.mxu1 %v4575_v6 }
0x1212   :  { %3044 = vmatprep.subr.bf16.mxu1 %v4912_v53 }
0x1214   :  { %2196 = vmatpush1.bf16.msra.mxu0 %v4579_v38 }
0x1215   :  { %2324 = vmatprep.subr.bf16.mxu0 %v4582_v21  ;;  %3045 = vmatpush3.bf16.msra.mxu1 %v4588_v45 }
0x1216   :  { %2365 = vmatprep.subr.bf16.mxu1 %v4591_v20 }
0x1217   :  { %2214 = vmatmul.mubr.bf16.vlgmr.msra.gmra.mxu0 %v2060_v59 }
0x1218   :  { %2325 = vmatpush1.bf16.msra.mxu0 %v4594_v11  ;;  %2356 = vmatprep.mubr.bf16.mxu0 %v4911_v56 }
0x1219   :  { %2326 = vmatprep.subr.bf16.mxu0 %v4598_v57 }
0x121c   :  { %2327 = vmatpush1.bf16.msra.mxu0 %v4601_v48 }
0x121d   :  { %2328 = vmatprep.subr.bf16.mxu0 %v4604_v61 }
0x1220   :  { %2329 = vmatpush1.bf16.msra.mxu0 %v4607_v2 }
0x1221   :  { %2330 = vmatprep.subr.bf16.mxu0 %v4610_v50 }
0x1224   :  { %2331 = vmatpush1.bf16.msra.mxu0 %v4613_v18 }
0x1225   :  { %2332 = vmatprep.subr.bf16.mxu0 %v4616_v9 }
0x1228   :  { %2333 = vmatpush1.bf16.msra.mxu0 %v4619_v52 }
0x1229   :  { %2334 = vmatprep.subr.bf16.mxu0 %v4622_v15 }
0x122c   :  { %2335 = vmatpush1.bf16.msra.mxu0 %v4625_v62 }
0x122d   :  { %2336 = vmatprep.subr.bf16.mxu0 %v4628_v12 }
0x1230   :  { %2337 = vmatpush1.bf16.msra.mxu0 %v4631_v58 }
0x1231   :  { %2338 = vmatprep.subr.bf16.mxu0 %v4634_v63 }
0x1234   :  { %2339 = vmatpush1.bf16.msra.mxu0 %v4637_v42 }
0x1235   :  { %3050 = vmatprep.subr.bf16.mxu0 %v4912_v53 }
0x12b7   :  { %v2096_v49 = vpop.f32.mrf.mxu0  ;;  %v2174_v22 = vpop.f32.mrf.mxu1 }
0x12b8   :  { %v2097_v8 = vadd.f32 %v2096_v49, %v2061_v43 }
0x12b9   :  { %v3028_v46 = vpop.f32.mrf.mxu0  ;;  %v2176_v59 = vpop.f32.mrf.mxu1 }
0x12ba   :  { %v2102_v41 = vadd.f32 %v4948_v29, %v2097_v8 }
0x12bb   :  { %v2099_v55 = vpop.f32.mrf.mxu0  ;;  %v2178_v23 = vpop.f32.mrf.mxu1 }
0x12bc   :  { %3300 = vtanh.f32 %v2102_v41  ;;  %v2103_v44 = vmul.f32 0.5, %v2102_v41 }
0x12bd   :  { %v3029_v63 = vpop.f32.mrf.mxu0  ;;  %v2179_v58 = vpop.f32.mrf.mxu1 }
0x12be   :  { %3302 = vtanh.f32 %v2103_v44 }
0x12c9   :  { %v3301_v12 = vpop.eup %3300 }
0x12ca   :  { %2110 = vrot.lane.b32.xlu0 %v3301_v12, %s3488_s1 }
0x12cb   :  { %v3303_v24 = vpop.eup %3302 }
0x12cc   :  { %v2105_v43 = vmul.f32 0.5, %v3303_v24 }
0x12ce   :  { %v2106_v49 = vadd.f32 0.5, %v2105_v43 }
0x12d0   :  { %v2108_v23 = vmul.f32 %v2106_v49, %v4459_v17 }
0x12d7   :  { %v2215_v42 = vpop.f32.mrf.mxu0 }
0x12d9   :  { %v2217_v62 = vpop.f32.mrf.mxu0 }
0x12db   :  { %v2219_v15 = vpop.f32.mrf.mxu0 }
0x12dd   :  { %v2220_v52 = vpop.f32.mrf.mxu0 }
0x133c   :  { %v2111_v46 = vpop.permute.xlu0 %2110 }
0x133d   :  { %v2113_v9 = vmul.f32 %v2111_v46, %v2106_v49 }
0x133f   :  { %2115 = vrot.lane.b32.xlu1 %v2113_v9, %s3489_s8 }
0x13b1   :  { %v2116_v55 = vpop.permute.xlu1 %2115 }
0x13b2   :  { %v4647_v58 = vadd.f32 %v2116_v55, %v2108_v23 }
0x13b4   :  { %3304 = vtanh.f32 %v4647_v58 }
0x13c1   :  { %v3305_v12 = vpop.eup %3304 }
0x13c2   :  { %2121 = vrot.lane.b32.xlu0 %v3305_v12, %s3491_s9 }
0x1434   :  { %v2122_v52 = vpop.permute.xlu0 %2121 }
0x1435   :  { %v2124_v41 = vmul.f32 %v2122_v52, %v2106_v49 }
0x1437   :  { %2128 = vperm.xlu1 %3103, %v2124_v41  }
0x14b2   :  { %v4651_v44 = vpop.permute.xlu1 %2128 }
0x14b3   :  { %v2132_v24 = vmul.f32 %v4651_v44, %v4953_v51  ;;  %v2133_v9 = vmul.f32 %v4651_v44, %v4954_v26  ;;  %v2134_v17 = vmul.f32 %v4651_v44, %v4955_v30  ;;  %v2135_v55 = vmul.f32 %v4651_v44, %v4959_v54 }
0x14b5   :  { %v2136_v15 = vadd.f32 %v2132_v24, %v4956_v32  ;;  %v2137_v63 = vadd.f32 %v2133_v9, %v4957_v27  ;;  %v2138_v8 = vadd.f32 %v2134_v17, %v4958_v4  ;;  %v2139_v52 = vadd.f32 %v2135_v55, %v4960_v3 }
0x14b7   :  { %v2222_v43 = vadd.f32 %v2174_v22, %v2136_v15  ;;  %v2223_v49 = vadd.f32 %v2176_v59, %v2137_v63  ;;  %v2224_v12 = vadd.f32 %v2215_v42, %v2138_v8  ;;  %v2225_v41 = vadd.f32 %v2217_v62, %v2139_v52 }
0x14b9   :  { %v2226_v46 = vmul.f32 0.5, %v2222_v43  ;;  %v2230_v23 = vmul.f32 0.5, %v2223_v49  ;;  %v2235_v30 = vmul.f32 0.5, %v2225_v41 }
0x14bb   :  { %3306 = vtanh.f32 %v2226_v46 }
0x14bc   :  { %3308 = vtanh.f32 %v2230_v23 }
0x14bd   :  { %3310 = vtanh.f32 %v2224_v12 }
0x14be   :  { %3312 = vtanh.f32 %v2235_v30  ;;  %v4969_v30 = vld [vmem:[#allocation9_spill] sm:$0xff] }
0x14c8   :  { %v3307_v24 = vpop.eup %3306 }
0x14c9   :  { %v3309_v32 = vpop.eup %3308  ;;  %v2228_v9 = vmul.f32 0.5, %v3307_v24 }
0x14ca   :  { %v2232_v27 = vmul.f32 0.5, %v3309_v32  ;;  %v3311_v59 = vpop.eup %3310  ;;  %v4970_v32 = vld [vmem:[#allocation10_spill] sm:$0xff] }
0x14cb   :  { %v2229_v22 = vadd.f32 0.5, %v2228_v9  ;;  %v3313_v42 = vpop.eup %3312 }
0x14cc   :  { %v2233_v17 = vadd.f32 0.5, %v2232_v27  ;;  %v2237_v8 = vmul.f32 0.5, %v3313_v42  ;;  %v4971_v27 = vld [vmem:[#allocation15_spill] sm:$0xff] }
0x14cd   :  { %v2240_v15 = vmul.f32 %v3311_v59, %v2229_v22 }
0x14ce   :  { %v2239_v63 = vmul.f32 %v2233_v17, %v4482_v47  ;;  %v2238_v49 = vadd.f32 0.5, %v2237_v8  ;;  %v4972_v47 = vld [vmem:[#allocation12_spill] sm:$0xff] }
0x14d0   :  { %v4666_v43 = vadd.f32 %v2240_v15, %v2239_v63 }
0x14d2   :  { %3314 = vtanh.f32 %v4666_v43 }
0x14df   :  { %v3315_v62 = vpop.eup %3314 }
0x14e0   :  { %v2243_v46 = vmul.f32 %v3315_v62, %v2238_v49 }
0x14e2   :  { %v2244_v23 = vpack.c.bf16 %v2243_v46, %v2243_v46 }
0x14e4   :  { %3047 = vmatmul.mubr.bf16.vlgmr.msra.gmra.mxu1 %v2244_v23  ;;  %2357 = vmatmul.mubr.bf16.vlgmr.msra.gmra.mxu0 %v2244_v23 }
0x14e5   :  { %2366 = vmatpush1.bf16.msra.mxu1 %v4485_v1  ;;  %2397 = vmatprep.mubr.bf16.mxu1 %v4911_v56 }
0x14e6   :  { %2367 = vmatprep.subr.bf16.mxu1 %v4489_v60  ;;  %3051 = vmatpush3.bf16.msra.mxu0 %v4495_v39 }
0x14e7   :  { %3052 = vmatprep.subr.bf16.mxu0 %v4912_v53  ;;  %3066 = vmatprep.mubr.msk.bf16.mxu0 %vm3487_vm0, %v4912_v53 }
0x14e9   :  { %2368 = vmatpush1.bf16.msra.mxu1 %v4501_v5 }
0x14ea   :  { %2369 = vmatprep.subr.bf16.mxu1 %v4504_v0  ;;  %3053 = vmatpush3.bf16.msra.mxu0 %v4510_v7 }
0x14eb   :  { %3054 = vmatprep.subr.bf16.mxu0 %v4912_v53 }
0x14ed   :  { %2370 = vmatpush1.bf16.msra.mxu1 %v4514_v10 }
0x14ee   :  { %2371 = vmatprep.subr.bf16.mxu1 %v4517_v34  ;;  %3055 = vmatpush3.bf16.msra.mxu0 %v4523_v13 }
0x14ef   :  { %3056 = vmatprep.subr.bf16.mxu0 %v4912_v53 }
0x14f1   :  { %2372 = vmatpush1.bf16.msra.mxu1 %v4527_v14 }
0x14f2   :  { %2373 = vmatprep.subr.bf16.mxu1 %v4530_v37  ;;  %3057 = vmatpush3.bf16.msra.mxu0 %v4536_v16 }
0x14f3   :  { %3058 = vmatprep.subr.bf16.mxu0 %v4912_v53 }
0x14f5   :  { %2374 = vmatpush1.bf16.msra.mxu1 %v4540_v36 }
0x14f6   :  { %2375 = vmatprep.subr.bf16.mxu1 %v4543_v40  ;;  %3059 = vmatpush3.bf16.msra.mxu0 %v4549_v19 }
0x14f7   :  { %3060 = vmatprep.subr.bf16.mxu0 %v4912_v53 }
0x14f9   :  { %2376 = vmatpush1.bf16.msra.mxu1 %v4553_v25 }
0x14fa   :  { %2377 = vmatprep.subr.bf16.mxu1 %v4556_v28  ;;  %3061 = vmatpush3.bf16.msra.mxu0 %v4562_v31 }
0x14fb   :  { %3062 = vmatprep.subr.bf16.mxu0 %v4912_v53 }
0x14fd   :  { %2378 = vmatpush1.bf16.msra.mxu1 %v4566_v35 }
0x14fe   :  { %2379 = vmatprep.subr.bf16.mxu1 %v4569_v33  ;;  %3063 = vmatpush3.bf16.msra.mxu0 %v4575_v6 }
0x14ff   :  { %3064 = vmatprep.subr.bf16.mxu0 %v4912_v53 }
0x1501   :  { %2380 = vmatpush1.bf16.msra.mxu1 %v4579_v38 }
0x1502   :  { %2508 = vmatprep.subr.bf16.mxu1 %v4582_v21  ;;  %3065 = vmatpush3.bf16.msra.mxu0 %v4588_v45  ;;  %v4973_v21 = vld [vmem:[#allocation16_spill] sm:$0xff] }
0x1503   :  { %2549 = vmatprep.subr.bf16.mxu0 %v4591_v20  ;;  %v4974_v20 = vld [vmem:[#allocation26_spill] sm:$0xff] }
0x1504   :  { %2398 = vmatmul.mubr.bf16.vlgmr.msra.gmra.mxu1 %v2244_v23 }
0x1505   :  { %2509 = vmatpush1.bf16.msra.mxu1 %v4594_v11  ;;  %2540 = vmatprep.mubr.bf16.mxu1 %v4911_v56  ;;  %v4975_v11 = vld [vmem:[#allocation27_spill] sm:$0xff] }
0x1506   :  { %2510 = vmatprep.subr.bf16.mxu1 %v4598_v57  ;;  %v4976_v57 = vld [vmem:[#allocation28_spill] sm:$0xff] }
0x1509   :  { %2511 = vmatpush1.bf16.msra.mxu1 %v4601_v48  ;;  %v4977_v48 = vld [vmem:[#allocation24_spill] sm:$0xff] }
0x150a   :  { %2512 = vmatprep.subr.bf16.mxu1 %v4604_v61  ;;  %v2245_v61 = vmul.f32 %v4977_v48, %v4651_v44 }
0x150d   :  { %2513 = vmatpush1.bf16.msra.mxu1 %v4607_v2 }
0x150e   :  { %2514 = vmatprep.subr.bf16.mxu1 %v4610_v50 }
0x1511   :  { %2515 = vmatpush1.bf16.msra.mxu1 %v4613_v18 }
0x1512   :  { %2516 = vmatprep.subr.bf16.mxu1 %v4969_v30 }
0x1515   :  { %2517 = vmatpush1.bf16.msra.mxu1 %v4970_v32 }
0x1516   :  { %2518 = vmatprep.subr.bf16.mxu1 %v4971_v27 }
0x1519   :  { %2519 = vmatpush1.bf16.msra.mxu1 %v4972_v47 }
0x151a   :  { %2520 = vmatprep.subr.bf16.mxu1 %v4973_v21 }
0x151d   :  { %2521 = vmatpush1.bf16.msra.mxu1 %v4974_v20 }
0x151e   :  { %2522 = vmatprep.subr.bf16.mxu1 %v4975_v11 }
0x1521   :  { %2523 = vmatpush1.bf16.msra.mxu1 %v4976_v57 }
0x1522   :  { %3070 = vmatprep.subr.bf16.mxu1 %v4912_v53 }
0x15a4   :  { %v2280_v2 = vpop.f32.mrf.mxu1  ;;  %v2358_v50 = vpop.f32.mrf.mxu0 }
0x15a5   :  { %v2281_v18 = vadd.f32 %v2280_v2, %v2245_v61  ;;  %v4979_v2 = vld [vmem:[#allocation13_spill] sm:$0xff] }
0x15a6   :  { %v3048_v55 = vpop.f32.mrf.mxu1  ;;  %v2360_v12 = vpop.f32.mrf.mxu0 }
0x15a7   :  { %v2286_v52 = vadd.f32 %v4948_v29, %v2281_v18  ;;  %v4980_v55 = vld [vmem:[#allocation14_spill] sm:$0xff] }
0x15a8   :  { %v2283_v41 = vpop.f32.mrf.mxu1  ;;  %v2362_v24 = vpop.f32.mrf.mxu0 }
0x15a9   :  { %3316 = vtanh.f32 %v2286_v52  ;;  %v2287_v8 = vmul.f32 0.5, %v2286_v52 }
0x15aa   :  { %v3049_v9 = vpop.f32.mrf.mxu1  ;;  %v2363_v22 = vpop.f32.mrf.mxu0 }
0x15ab   :  { %3318 = vtanh.f32 %v2287_v8 }
0x15b6   :  { %v3317_v59 = vpop.eup %3316 }
0x15b7   :  { %2294 = vrot.lane.b32.xlu0 %v3317_v59, %s3488_s1 }
0x15b8   :  { %v3319_v49 = vpop.eup %3318 }
0x15b9   :  { %v2289_v62 = vmul.f32 0.5, %v3319_v49 }
0x15bb   :  { %v2290_v46 = vadd.f32 0.5, %v2289_v62 }
0x15bd   :  { %v2292_v29 = vmul.f32 %v2290_v46, %v4647_v58  ;;  %v4978_v58 = vld [vmem:[#allocation11_spill] sm:$0xff] }
0x15c4   :  { %v2399_v17 = vpop.f32.mrf.mxu1 }
0x15c6   :  { %v2401_v15 = vpop.f32.mrf.mxu1 }
0x15c8   :  { %v2403_v63 = vpop.f32.mrf.mxu1 }
0x15ca   :  { %v2404_v42 = vpop.f32.mrf.mxu1 }
0x1629   :  { %v2295_v23 = vpop.permute.xlu0 %2294 }
0x162a   :  { %v2297_v30 = vmul.f32 %v2295_v23, %v2290_v46 }
0x162c   :  { %2299 = vrot.lane.b32.xlu1 %v2297_v30, %s3489_s8 }
0x169e   :  { %v2300_v32 = vpop.permute.xlu1 %2299 }
0x169f   :  { %v4727_v27 = vadd.f32 %v2300_v32, %v2292_v29 }
0x16a1   :  { %3320 = vtanh.f32 %v4727_v27 }
0x16ae   :  { %v3321_v47 = vpop.eup %3320 }
0x16af   :  { %2305 = vrot.lane.b32.xlu0 %v3321_v47, %s3491_s9 }
0x1721   :  { %v2306_v21 = vpop.permute.xlu0 %2305 }
0x1722   :  { %v2308_v20 = vmul.f32 %v2306_v21, %v2290_v46 }
0x1724   :  { %2312 = vperm.xlu1 %3103, %v2308_v20  }
0x179f   :  { %v4731_v11 = vpop.permute.xlu1 %2312 }
0x17a0   :  { %v2316_v57 = vmul.f32 %v4731_v11, %v4953_v51  ;;  %v2317_v48 = vmul.f32 %v4731_v11, %v4954_v26  ;;  %v2318_v61 = vmul.f32 %v4731_v11, %v4978_v58  ;;  %v2319_v63 = vmul.f32 %v4731_v11, %v4959_v54 }
0x17a2   :  { %v2320_v18 = vadd.f32 %v2316_v57, %v4979_v2  ;;  %v2321_v52 = vadd.f32 %v2317_v48, %v4980_v55  ;;  %v2322_v41 = vadd.f32 %v2318_v61, %v4958_v4  ;;  %v2323_v8 = vadd.f32 %v2319_v63, %v4960_v3 }
0x17a4   :  { %v2406_v24 = vadd.f32 %v2358_v50, %v2320_v18  ;;  %v2407_v9 = vadd.f32 %v2360_v12, %v2321_v52  ;;  %v2408_v42 = vadd.f32 %v2399_v17, %v2322_v41  ;;  %v2409_v49 = vadd.f32 %v2401_v15, %v2323_v8 }
0x17a6   :  { %v2410_v22 = vmul.f32 0.5, %v2406_v24  ;;  %v2414_v59 = vmul.f32 0.5, %v2407_v9  ;;  %v2419_v62 = vmul.f32 0.5, %v2409_v49 }
0x17a8   :  { %3322 = vtanh.f32 %v2410_v22 }
0x17a9   :  { %3324 = vtanh.f32 %v2414_v59 }
0x17aa   :  { %3326 = vtanh.f32 %v2408_v42 }
0x17ab   :  { %3328 = vtanh.f32 %v2419_v62 }
0x17b5   :  { %v3323_v46 = vpop.eup %3322 }
0x17b6   :  { %v3325_v23 = vpop.eup %3324  ;;  %v2412_v30 = vmul.f32 0.5, %v3323_v46 }
0x17b7   :  { %v2416_v29 = vmul.f32 0.5, %v3325_v23  ;;  %v3327_v12 = vpop.eup %3326 }
0x17b8   :  { %v2413_v50 = vadd.f32 0.5, %v2412_v30  ;;  %v3329_v17 = vpop.eup %3328 }
0x17b9   :  { %v2417_v32 = vadd.f32 0.5, %v2416_v29  ;;  %v2421_v57 = vmul.f32 0.5, %v3329_v17 }
0x17ba   :  { %v2424_v47 = vmul.f32 %v3327_v12, %v2413_v50 }
0x17bb   :  { %v2423_v21 = vmul.f32 %v2417_v32, %v4666_v43  ;;  %v2422_v48 = vadd.f32 0.5, %v2421_v57 }
0x17bd   :  { %v4746_v20 = vadd.f32 %v2424_v47, %v2423_v21 }
0x17bf   :  { %3330 = vtanh.f32 %v4746_v20 }
0x17cc   :  { %v3331_v15 = vpop.eup %3330 }
0x17cd   :  { %v2427_v61 = vmul.f32 %v3331_v15, %v2422_v48 }
0x17cf   :  { %v2428_v18 = vpack.c.bf16 %v2427_v61, %v2427_v61 }
0x17d1   :  { %3067 = vmatmul.mubr.bf16.vlgmr.msra.gmra.mxu0 %v2428_v18  ;;  %2541 = vmatmul.mubr.bf16.vlgmr.msra.gmra.mxu1 %v2428_v18 }
0x17d2   :  { %2550 = vmatpush1.bf16.msra.mxu0 %v4485_v1  ;;  %2581 = vmatprep.mubr.bf16.mxu0 %v4911_v56  ;;  %v4785_v56 = vld [vmem:[%s4844_s5] ss:$0 sm:$0xff]  ;;  %s3492_s5 = smov [#allocation6]  }
0x17d3   :  { %2551 = vmatprep.subr.bf16.mxu0 %v4489_v60  ;;  %3071 = vmatpush3.bf16.msra.mxu1 %v4495_v39  ;;  %v2429_v1 = vmul.f32 %v4785_v56, %v4731_v11 }
0x17d4   :  { %3072 = vmatprep.subr.bf16.mxu1 %v4912_v53  ;;  %3086 = vmatprep.mubr.msk.bf16.mxu1 %vm3487_vm0, %v4912_v53 }
0x17d6   :  { %2552 = vmatpush1.bf16.msra.mxu0 %v4501_v5 }
0x17d7   :  { %2553 = vmatprep.subr.bf16.mxu0 %v4504_v0  ;;  %3073 = vmatpush3.bf16.msra.mxu1 %v4510_v7 }
0x17d8   :  { %3074 = vmatprep.subr.bf16.mxu1 %v4912_v53 }
0x17da   :  { %2554 = vmatpush1.bf16.msra.mxu0 %v4514_v10 }
0x17db   :  { %2555 = vmatprep.subr.bf16.mxu0 %v4517_v34  ;;  %3075 = vmatpush3.bf16.msra.mxu1 %v4523_v13 }
0x17dc   :  { %3076 = vmatprep.subr.bf16.mxu1 %v4912_v53 }
0x17de   :  { %2556 = vmatpush1.bf16.msra.mxu0 %v4527_v14 }
0x17df   :  { %2557 = vmatprep.subr.bf16.mxu0 %v4530_v37  ;;  %3077 = vmatpush3.bf16.msra.mxu1 %v4536_v16 }
0x17e0   :  { %3078 = vmatprep.subr.bf16.mxu1 %v4912_v53 }
0x17e2   :  { %2558 = vmatpush1.bf16.msra.mxu0 %v4540_v36 }
0x17e3   :  { %2559 = vmatprep.subr.bf16.mxu0 %v4543_v40  ;;  %3079 = vmatpush3.bf16.msra.mxu1 %v4549_v19 }
0x17e4   :  { %3080 = vmatprep.subr.bf16.mxu1 %v4912_v53 }
0x17e6   :  { %2560 = vmatpush1.bf16.msra.mxu0 %v4553_v25 }
0x17e7   :  { %2561 = vmatprep.subr.bf16.mxu0 %v4556_v28  ;;  %3081 = vmatpush3.bf16.msra.mxu1 %v4562_v31 }
0x17e8   :  { %3082 = vmatprep.subr.bf16.mxu1 %v4912_v53 }
0x17ea   :  { %2562 = vmatpush1.bf16.msra.mxu0 %v4566_v35 }
0x17eb   :  { %2563 = vmatprep.subr.bf16.mxu0 %v4569_v33  ;;  %3083 = vmatpush3.bf16.msra.mxu1 %v4575_v6 }
0x17ec   :  { %3084 = vmatprep.subr.bf16.mxu1 %v4912_v53  ;;  %v4792_v53 = vld [vmem:[%s4845_s6] ss:$0 sm:$0xff]  ;;  %s2691_s6 = sshll.u32 %s3492_s5, 4  ;;  %s2692_s6 = int_to_ptr.vmem [resolvable:$true] %s2691_s6 }
0x17ed   :  { %p3463_p6 = scmp.lt.s32.totalorder %s2692_s6, %s2692_s6 }
0x17ee   :  { %2564 = vmatpush1.bf16.msra.mxu0 %v4579_v38 }
0x17ef   :  { %3085 = vmatpush3.bf16.msra.mxu1 %v4588_v45 }
0x17f1   :  { %2582 = vmatmul.mubr.bf16.vlgmr.msra.gmra.mxu0 %v2428_v18 }
0x1891   :  { %v2464_v60 = vpop.f32.mrf.mxu0  ;;  %v2542_v39 = vpop.f32.mrf.mxu1 }
0x1892   :  { %v2465_v5 = vadd.f32 %v2464_v60, %v2429_v1 }
0x1893   :  { %v3068_v0 = vpop.f32.mrf.mxu0  ;;  %v2544_v7 = vpop.f32.mrf.mxu1 }
0x1894   :  { %v2470_v10 = vadd.f32 %v4792_v53, %v2465_v5 }
0x1895   :  { %v2467_v34 = vpop.f32.mrf.mxu0  ;;  %v2546_v13 = vpop.f32.mrf.mxu1 }
0x1896   :  { %3332 = vtanh.f32 %v2470_v10  ;;  %v2471_v28 = vmul.f32 0.5, %v2470_v10 }
0x1897   :  { %v3069_v14 = vpop.f32.mrf.mxu0  ;;  %v2547_v37 = vpop.f32.mrf.mxu1 }
0x1898   :  { %3334 = vtanh.f32 %v2471_v28 }
0x18a3   :  { %v3333_v16 = vpop.eup %3332 }
0x18a4   :  { %2478 = vrot.lane.b32.xlu0 %v3333_v16, %s3488_s1 }
0x18a5   :  { %v3335_v31 = vpop.eup %3334 }
0x18a6   :  { %v2473_v35 = vmul.f32 0.5, %v3335_v31 }
0x18a8   :  { %v2474_v33 = vadd.f32 0.5, %v2473_v35  ;;  %v4981_v35 = vlaneseq }
0x18aa   :  { %v2476_v45 = vmul.f32 %v2474_v33, %v4727_v27 }
0x18b1   :  { %v2583_v36 = vpop.f32.mrf.mxu0 }
0x18b3   :  { %v2585_v40 = vpop.f32.mrf.mxu0 }
0x18b5   :  { %v2587_v19 = vpop.f32.mrf.mxu0 }
0x18b7   :  { %v2588_v25 = vpop.f32.mrf.mxu0 }
0x1916   :  { %v2479_v6 = vpop.permute.xlu0 %2478 }
0x1917   :  { %v2481_v38 = vmul.f32 %v2479_v6, %v2474_v33  ;;  %v4982_v6 = vld [vmem:[#allocation21_spill] sm:$0xff] }
0x1919   :  { %2483 = vrot.lane.b32.xlu1 %v2481_v38, %s3489_s8 }
0x198b   :  { %v2484_v43 = vpop.permute.xlu1 %2483 }
0x198c   :  { %v4798_v52 = vadd.f32 %v2484_v43, %v2476_v45  ;;  %v4983_v45 = vld [vmem:[#allocation18_spill] sm:$0xff] }
0x198e   :  { %3336 = vtanh.f32 %v4798_v52 }
0x199b   :  { %v3337_v41 = vpop.eup %3336 }
0x199c   :  { %2489 = vrot.lane.b32.xlu0 %v3337_v41, %s3491_s9 }
0x1a0e   :  { %v2490_v24 = vpop.permute.xlu0 %2489 }
0x1a0f   :  { %v2492_v9 = vmul.f32 %v2490_v24, %v2474_v33  ;;  %v173_v33 = vand.u32 127, %v4981_v35  ;;  %v4985_v24 = vld [vmem:[#allocation23_spill] sm:$0xff] }
0x1a11   :  { %2496 = vperm.xlu1 %3103, %v2492_v9   ;;  %vm567_vm1 = vcmp.eq.s32.totalorder %v173_v33, 0  ;;  %vm765_vm2 = vcmp.eq.s32.totalorder %v173_v33, 1  ;;  %vm963_vm3 = vcmp.eq.s32.totalorder %v173_v33, 2  ;;  %vm1161_vm4 = vcmp.eq.s32.totalorder %v173_v33, 3 }
0x1a12   :  { %v573_v38 = vsel %vm567_vm1, %v4982_v6, 0.0  ;;  %vm1344_vm5 = vcmp.eq.s32.totalorder %v173_v33, 4  ;;  %vm1542_vm6 = vcmp.eq.s32.totalorder %v173_v33, 5  ;;  %vm1740_vm7 = vcmp.eq.s32.totalorder %v173_v33, 6 }
0x1a13   :  { %v771_v43 = vsel %vm765_vm2, %v4983_v45, %v573_v38  ;;  %vm1938_vm8 = vcmp.eq.s32.totalorder %v173_v33, 7  ;;  %vm2125_vm9 = vcmp.eq.s32.totalorder %v173_v33, 8  ;;  %vm2309_vm10 = vcmp.eq.s32.totalorder %v173_v33, 9 }
0x1a14   :  { %vm2493_vm11 = vcmp.eq.s32.totalorder %v173_v33, 10  ;;  %vm2677_vm12 = vcmp.eq.s32.totalorder %v173_v33, 11 }
0x1a8c   :  { %v4802_v22 = vpop.permute.xlu1 %2496 }
0x1a8d   :  { %v2500_v59 = vmul.f32 %v4802_v22, %v4953_v51  ;;  %v2501_v63 = vmul.f32 %v4802_v22, %v4954_v26  ;;  %v2502_v27 = vmul.f32 %v4802_v22, %v4978_v58  ;;  %v2503_v29 = vmul.f32 %v4802_v22, %v4959_v54 }
0x1a8e   :  { %v2613_v60 = vmul.f32 %v4785_v56, %v4802_v22 }
0x1a8f   :  { %v2504_v42 = vadd.f32 %v2500_v59, %v4979_v2  ;;  %v2505_v8 = vadd.f32 %v2501_v63, %v4980_v55  ;;  %v2506_v49 = vadd.f32 %v2502_v27, %v4958_v4  ;;  %v2507_v26 = vadd.f32 %v2503_v29, %v4960_v3  ;;  %v4986_v59 = vld [vmem:[#allocation20_spill] sm:$0xff]  ;;  %v4987_v27 = vld [vmem:[#allocation17_spill] sm:$0xff] }
0x1a91   :  { %v2590_v62 = vadd.f32 %v2542_v39, %v2504_v42  ;;  %v2591_v46 = vadd.f32 %v2544_v7, %v2505_v8  ;;  %v2592_v51 = vadd.f32 %v2583_v36, %v2506_v49  ;;  %v2593_v58 = vadd.f32 %v2585_v40, %v2507_v26  ;;  %v4988_v8 = vld [vmem:[#allocation22_spill] sm:$0xff] }
0x1a93   :  { %v2594_v23 = vmul.f32 0.5, %v2590_v62  ;;  %v2598_v30 = vmul.f32 0.5, %v2591_v46  ;;  %v2603_v50 = vmul.f32 0.5, %v2593_v58  ;;  %v4989_v62 = vld [vmem:[#allocation25_spill] sm:$0xff] }
0x1a95   :  { %3338 = vtanh.f32 %v2594_v23 }
0x1a96   :  { %3340 = vtanh.f32 %v2598_v30 }
0x1a97   :  { %3342 = vtanh.f32 %v2592_v51 }
0x1a98   :  { %3344 = vtanh.f32 %v2603_v50 }
0x1aa2   :  { %v3339_v2 = vpop.eup %3338 }
0x1aa3   :  { %v3341_v12 = vpop.eup %3340  ;;  %v2596_v55 = vmul.f32 0.5, %v3339_v2 }
0x1aa4   :  { %v2600_v32 = vmul.f32 0.5, %v3341_v12  ;;  %v3343_v47 = vpop.eup %3342 }
0x1aa5   :  { %v2597_v4 = vadd.f32 0.5, %v2596_v55  ;;  %v3345_v48 = vpop.eup %3344 }
0x1aa6   :  { %v2601_v21 = vadd.f32 0.5, %v2600_v32  ;;  %v2605_v15 = vmul.f32 0.5, %v3345_v48 }
0x1aa7   :  { %v2608_v17 = vmul.f32 %v3343_v47, %v2597_v4 }
0x1aa8   :  { %v2607_v57 = vmul.f32 %v2601_v21, %v4746_v20  ;;  %v2606_v61 = vadd.f32 0.5, %v2605_v15 }
0x1aaa   :  { %v2609_v54 = vadd.f32 %v2608_v17, %v2607_v57 }
0x1aac   :  { %3346 = vtanh.f32 %v2609_v54 }
0x1ab9   :  { %v3347_v3 = vpop.eup %3346 }
0x1aba   :  { %v2611_v18 = vmul.f32 %v3347_v3, %v2606_v61 }
0x1abc   :  { %v2612_v1 = vpack.c.bf16 %v2611_v18, %v2611_v18 }
0x1abe   :  { %3087 = vmatmul.mubr.bf16.vlgmr.msra.gmra.mxu1 %v2612_v1 }
0x1b7e   :  { %v2648_v39 = vpop.f32.mrf.mxu1 }
0x1b7f   :  { %v2649_v5 = vadd.f32 %v2648_v39, %v2613_v60 }
0x1b80   :  { %v3088_v0 = vpop.f32.mrf.mxu1 }
0x1b81   :  { %v2654_v7 = vadd.f32 %v4792_v53, %v2649_v5 }
0x1b82   :  { %v2651_v10 = vpop.f32.mrf.mxu1 }
0x1b83   :  { %3348 = vtanh.f32 %v2654_v7  ;;  %v2655_v13 = vmul.f32 0.5, %v2654_v7 }
0x1b84   :  { %v3089_v20 = vpop.f32.mrf.mxu1 }
0x1b85   :  { %3350 = vtanh.f32 %v2655_v13 }
0x1b90   :  { %v3349_v34 = vpop.eup %3348 }
0x1b91   :  { %2662 = vrot.lane.b32.xlu0 %v3349_v34, %s3488_s1  ;;  %s3458_s1 = scalar_lea.vmem %s2692_s6, 32 }
0x1b92   :  { %v3351_v14 = vpop.eup %3350  ;;  %p3459_p5 = scmp.ne.s32.totalorder %s2692_s6, %s3458_s1  ;;  %p3464_p7 = scmp.lt.s32.totalorder %s3458_s1, %s3458_s1 }
0x1b93   :  { %v2657_v37 = vmul.f32 0.5, %v3351_v14 }
0x1b94   :  { %p3465_p8 = por %p3464_p7, %p3463_p6 }
0x1b95   :  { %v2658_v16 = vadd.f32 0.5, %v2657_v37 }
0x1b96   :  { %p3466_p9 = pnand %p3465_p8, %p3459_p5 }
0x1b97   :  { %v2660_v56 = vmul.f32 %v2658_v16, %v4798_v52  ;;  %v4984_v52 = vld [vmem:[#allocation19_spill] sm:$0xff] }
0x1b98   :  { %v969_v41 = vsel %vm963_vm3, %v4984_v52, %v771_v43 }
0x1b99   :  { %v1167_v9 = vsel %vm1161_vm4, %v4985_v24, %v969_v41 }
0x1b9a   :  { %v1350_v63 = vsel %vm1344_vm5, %v4986_v59, %v1167_v9 }
0x1b9b   :  { %v1548_v42 = vsel %vm1542_vm6, %v4987_v27, %v1350_v63 }
0x1b9c   :  { %v1746_v49 = vsel %vm1740_vm7, %v4988_v8, %v1548_v42 }
0x1b9d   :  { %v1944_v46 = vsel %vm1938_vm8, %v4989_v62, %v1746_v49 }
0x1b9e   :  { %v2131_v23 = vsel %vm2125_vm9, %v4651_v44, %v1944_v46 }
0x1b9f   :  { %v2315_v30 = vsel %vm2309_vm10, %v4731_v11, %v2131_v23 }
0x1ba0   :  { %v2499_v29 = vsel %vm2493_vm11, %v4802_v22, %v2315_v30 }
0x1c03   :  { %v2663_v36 = vpop.permute.xlu0 %2662 }
0x1c04   :  { %v2665_v40 = vmul.f32 %v2663_v36, %v2658_v16 }
0x1c06   :  { %2667 = vrot.lane.b32.xlu1 %v2665_v40, %s3489_s8 }
0x1c78   :  { %v2668_v19 = vpop.permute.xlu1 %2667 }
0x1c79   :  { %v2670_v25 = vadd.f32 %v2668_v19, %v2660_v56 }
0x1c7b   :  { %3352 = vtanh.f32 %v2670_v25 }
0x1c88   :  { %v3353_v53 = vpop.eup %3352 }
0x1c89   :  { %2673 = vrot.lane.b32.xlu0 %v3353_v53, %s3491_s9 }
0x1cfb   :  { %v2674_v28 = vpop.permute.xlu0 %2673 }
0x1cfc   :  { %v2676_v31 = vmul.f32 %v2674_v28, %v2658_v16 }
0x1cfe   :  { %2680 = vperm.xlu1 %3103, %v2676_v31  }
0x1d79   :  { %v2681_v51 = vpop.permute.xlu1 %2680 }
0x1d7a   :  { %v2683_v26 = vsel %vm2677_vm12, %v2681_v51, %v2499_v29 }
0x1d7b   :  { %2684 = vst [vmem:[#allocation6] sm:$0x3] %v2683_v26 }
0x1d7c   :  { %3469 = shalt.err (!%p3466_p9)
}
0x1d7d   :  { %2694 = dma.vmem_to_hbm [thread:$0]  %s2692_s6, 32, %s4846_s7, [#allocation5]  }
0x1d7e   :  { %3480 = dma.done.wait [#allocation5], 32  }
0x1d7f   :  { %3481 = vsyncadd [#allocation5], 4294967264 }
0x1d80   :  { %2698 = vsyncpa [#allocation4], 1 }
0x1d81   :  { %2699 = vsyncpa [#allocation5], 1 }

</bundles_post_ra>
